<compile_context>
chip_gen: v7x
topology: tpu7x:2x2x1
jax: 0.10.0
libtpu: 0.0.40
codegen_flags: <defaults>
</compile_context>

<pallas_src>
import jax
import jax.numpy as jnp
from jax.experimental import pallas as pl
from jax.experimental.pallas import tpu as pltpu

_LANE = 128
_POOL = 9                                   # MaxPool2d(9): kernel 9, stride 9, floor mode
_PP = _POOL * _POOL                         # 81 window offsets per pooled pixel
_GROUP = 8                                  # pooled pixels packed per sublane group
_ROWS_PER_GROUP = _PP * _GROUP              # 648 im2col rows per group
_VMEM_LIMIT = 16 * 1024 * 1024              # ample headroom, << v7x 64 MiB physical VMEM
_MAX_COLS_BYTES = 4 * 1024 * 1024           # per-step im2col block cap (double-buffered)


def _round_up(n, m):
    return (n + m - 1) // m * m


def _cdiv(a, b):
    return (a + b - 1) // b


# ----------------------------------------------------------------------------
# Pallas kernels
# ----------------------------------------------------------------------------
def _conv_relu_pool_kernel(cols_ref, w_ref, b_ref, o_ref):
    """Fused conv + MaxPool2d(9) + bias + ReLU for one block of pooled-pixel groups.

    cols_ref: (gb*648, Kp)  im2col slab; row (g*648 + t*8 + j) is window offset t
              (t = dh*9 + dw) of pooled pixel j in group g.  K zero-padded to Kp.
    w_ref:    (Kp, Cn)      flattened weights (bf16), Cout zero-padded to Cn (=128).
    b_ref:    (1, Cn)       bias (f32).
    o_ref:    (gb*8, Cn)    pooled + bias + ReLU output (padding rows cropped in glue).
    """
    gb = o_ref.shape[0] // _GROUP
    # Single K-concatenated MXU pass; f32 accumulation.
    y = jnp.dot(cols_ref[...], w_ref[...], preferred_element_type=jnp.float32)
    bias = b_ref[...]
    for g in range(gb):
        base = g * _ROWS_PER_GROUP
        # 4 interleaved max chains over the 81 window-offset planes (tile-aligned
        # static slices -> pure VPU maxes), then a 2-level combine.
        acc = [y[base + c * _GROUP: base + (c + 1) * _GROUP, :] for c in range(4)]
        for t in range(4, _PP):
            c = t & 3
            acc[c] = jnp.maximum(acc[c], y[base + t * _GROUP: base + (t + 1) * _GROUP, :])
        m = jnp.maximum(jnp.maximum(acc[0], acc[1]), jnp.maximum(acc[2], acc[3]))
        # bias + ReLU once, after the pool (exact by monotonicity of x -> relu(x+b)).
        o_ref[g * _GROUP:(g + 1) * _GROUP, :] = jnp.maximum(m + bias, 0.0)


def _conv_relu_kernel(cols_ref, w_ref, b_ref, o_ref):
    """conv + bias + ReLU (no pool): o = relu(cols @ w + b), single grid step."""
    y = jnp.dot(cols_ref[...], w_ref[...], preferred_element_type=jnp.float32)
    o_ref[...] = jnp.maximum(y + b_ref[...], 0.0)


# ----------------------------------------------------------------------------
# Glue (padding / im2col layout / un-padding; all compute stays in the kernels)
# ----------------------------------------------------------------------------
def _conv_out_size(h, k, stride, pad):
    return (h + 2 * pad - k) // stride + 1


def _tap_slabs(x_hwc, k, stride, pad, ho, wo):
    """(Ho, Wo, Cin) slab per (kh, kw) kernel offset, kh-major (matches weight flatten)."""
    xp = jnp.pad(x_hwc, ((pad, pad), (pad, pad), (0, 0)))
    slabs = []
    for kh in range(k):
        for kw in range(k):
            slabs.append(xp[kh:kh + stride * (ho - 1) + 1:stride,
                            kw:kw + stride * (wo - 1) + 1:stride, :])
    return slabs


def _flatten_weights(w_oihw, b, kp, cn):
    cout, cin, kh, kw = w_oihw.shape
    kk = kh * kw * cin
    w_flat = jnp.transpose(w_oihw, (2, 3, 1, 0)).reshape(kk, cout)
    w_flat = jnp.pad(w_flat, ((0, kp - kk), (0, cn - cout))).astype(jnp.bfloat16)
    b_row = jnp.pad(b.astype(jnp.float32), (0, cn - cout)).reshape(1, cn)
    return w_flat, b_row


def conv2d_relu_maxpool(x_hwc, w_oihw, b, stride, pad):
    """Fused Conv2d(pad, stride) + bias + ReLU + MaxPool2d(9).  x: (H, W, Cin)."""
    cout, cin, k, _ = w_oihw.shape
    h, w, _ = x_hwc.shape
    ho, wo = _conv_out_size(h, k, stride, pad), _conv_out_size(w, k, stride, pad)
    po, qo = ho // _POOL, wo // _POOL
    if po == 0 or qo == 0:
        raise ValueError("MaxPool2d(9): output size is too small")
    npool = po * qo
    ng = _cdiv(npool, _GROUP)
    kk = k * k * cin
    kp = _round_up(kk, _LANE)
    cn = _round_up(cout, _LANE)

    # Few large grid steps: >= 2 when possible (pipeline overlap + equal megacore
    # split on v7x), capped so the per-step im2col block stays modest.
    nsteps = 1 if ng == 1 else 2
    while _cdiv(ng, nsteps) * _ROWS_PER_GROUP * kp * 2 > _MAX_COLS_BYTES and nsteps < ng:
        nsteps += 1
    gb = _cdiv(ng, nsteps)
    ng_pad = nsteps * gb
    rows_per_step = gb * _ROWS_PER_GROUP

    # im2col in pool-friendly order, bf16 from the start (halves glue HBM bytes):
    # row (g*648 + t*8 + j) is window offset t of pooled pixel g*8 + j.
    xb = x_hwc.astype(jnp.bfloat16)
    slabs = []
    for s in _tap_slabs(xb, k, stride, pad, ho, wo):
        s = s[:_POOL * po, :_POOL * qo, :]
        s = s.reshape(po, _POOL, qo, _POOL, cin).transpose(0, 2, 1, 3, 4)  # (p,q,dh,dw,c)
        slabs.append(s.reshape(npool, _PP, cin))
    cols = jnp.concatenate(slabs, axis=-1)                        # (Npool, 81, K) bf16
    cols = jnp.pad(cols, ((0, ng_pad * _GROUP - npool), (0, 0), (0, kp - kk)))
    cols = cols.reshape(ng_pad, _GROUP, _PP, kp).transpose(0, 2, 1, 3)
    cols = cols.reshape(ng_pad * _ROWS_PER_GROUP, kp)

    w_flat, b_row = _flatten_weights(w_oihw, b, kp, cn)

    out = pl.pallas_call(
        _conv_relu_pool_kernel,
        out_shape=jax.ShapeDtypeStruct((ng_pad * _GROUP, cn), jnp.float32),
        grid=(nsteps,),
        in_specs=[
            pl.BlockSpec((rows_per_step, kp), lambda s: (s, 0)),
            pl.BlockSpec((kp, cn), lambda s: (0, 0)),
            pl.BlockSpec((1, cn), lambda s: (0, 0)),
        ],
        out_specs=pl.BlockSpec((gb * _GROUP, cn), lambda s: (s, 0)),
        compiler_params=pltpu.CompilerParams(
            dimension_semantics=("parallel",),      # steps independent -> both TCs on v7x
            vmem_limit_bytes=_VMEM_LIMIT,
        ),
    )(cols, w_flat, b_row)

    # Rows >= npool and lanes >= cout hold relu(bias) garbage from the zero padding;
    # keep this crop if the raw kernel output is ever reused.
    return out[:npool].reshape(po, qo, cn)[:, :, :cout]            # (Po, Qo, Cout)


def conv2d_relu(x_hwc, w_oihw, b, stride, pad):
    """Conv2d(pad, stride) + bias + ReLU (used when MaxPool2d(9) would raise)."""
    cout, cin, k, _ = w_oihw.shape
    h, w, _ = x_hwc.shape
    ho, wo = _conv_out_size(h, k, stride, pad), _conv_out_size(w, k, stride, pad)
    if ho <= 0 or wo <= 0:
        raise ValueError("Conv2d: output size is too small")
    m = ho * wo
    m8 = _round_up(m, 8)
    kk = k * k * cin
    kp = _round_up(kk, _LANE)
    cn = _round_up(cout, _LANE)

    xb = x_hwc.astype(jnp.bfloat16)
    slabs = [s.reshape(m, cin) for s in _tap_slabs(xb, k, stride, pad, ho, wo)]
    cols = jnp.concatenate(slabs, axis=-1)                         # (M, K) bf16
    cols = jnp.pad(cols, ((0, m8 - m), (0, kp - kk)))

    w_flat, b_row = _flatten_weights(w_oihw, b, kp, cn)

    out = pl.pallas_call(
        _conv_relu_kernel,
        out_shape=jax.ShapeDtypeStruct((m8, cn), jnp.float32),
        grid=(1,),
        in_specs=[
            pl.BlockSpec((m8, kp), lambda i: (0, 0)),
            pl.BlockSpec((kp, cn), lambda i: (0, 0)),
            pl.BlockSpec((1, cn), lambda i: (0, 0)),
        ],
        out_specs=pl.BlockSpec((m8, cn), lambda i: (0, 0)),
        compiler_params=pltpu.CompilerParams(
            dimension_semantics=("arbitrary",),
            vmem_limit_bytes=_VMEM_LIMIT,
        ),
    )(cols, w_flat, b_row)
    return out[:m, :cout].reshape(ho, wo, cout)


# ----------------------------------------------------------------------------
# Model
# ----------------------------------------------------------------------------
_CONV_CFG = [  # (name, Cout, Cin, K, stride, pad)
    ("1", 8, 25, 3, 2, 1),
    ("2", 17, 8, 3, 2, 1),
    ("3", 19, 17, 3, 2, 1),
    ("4", 32, 19, 3, 2, 1),
    ("5", 48, 32, 7, 1, 3),
]


def init_params(key):
    params = {}
    for name, cout, cin, k, _, _ in _CONV_CFG:
        key, kw_, kb = jax.random.split(key, 3)
        bound = 1.0 / (cin * k * k) ** 0.5          # PyTorch default-ish uniform init
        params["w" + name] = jax.random.uniform(kw_, (cout, cin, k, k), jnp.float32,
                                                minval=-bound, maxval=bound)
        params["b" + name] = jax.random.uniform(kb, (cout,), jnp.float32,
                                                minval=-bound, maxval=bound)
    return params


def model_tanh_forward(x_nchw, params):
    assert x_nchw.shape[0] == 1, "batch=1, as in the reference module"
    x = jnp.transpose(x_nchw, (0, 2, 3, 1))[0].astype(jnp.float32)   # (H, W, C)
    for name, _, _, k, stride, pad in _CONV_CFG:
        ho = _conv_out_size(x.shape[0], k, stride, pad)
        wo = _conv_out_size(x.shape[1], k, stride, pad)
        if ho >= _POOL and wo >= _POOL:
            x = conv2d_relu_maxpool(x, params["w" + name], params["b" + name], stride, pad)
        else:
            x = conv2d_relu(x, params["w" + name], params["b" + name], stride, pad)
            # TODO(synk): torch.nn.MaxPool2d(9) raises "Output size is too small" here in
            # PyTorch, so the remaining stages of the original forward are unreachable;
            # stop at the last PyTorch-reachable tensor.
            break
    return jnp.transpose(x, (2, 0, 1))[None]                          # back to NCHW


# ----------------------------------------------------------------------------
# Pure-JAX references (for correctness checking only)
# ----------------------------------------------------------------------------
def conv2d_relu_ref(x_hwc, w_oihw, b, stride, pad):
    w = jnp.transpose(w_oihw, (2, 3, 1, 0))  # HWIO
    y = jax.lax.conv_general_dilated(
        x_hwc[None], w, window_strides=(stride, stride),
        padding=((pad, pad), (pad, pad)),
        dimension_numbers=("NHWC", "HWIO", "NHWC"),
        precision=jax.lax.Precision.HIGHEST)
    return jnp.maximum(y[0] + b, 0.0)


def maxpool_ref(x_hwc):
    return jax.lax.reduce_window(x_hwc, -jnp.inf, jax.lax.max,
                                 (_POOL, _POOL, 1), (_POOL, _POOL, 1), "VALID")


def model_tanh_forward_ref(x_nchw, params):
    x = jnp.transpose(x_nchw, (0, 2, 3, 1))[0].astype(jnp.float32)
    for name, _, _, _, stride, pad in _CONV_CFG:
        x = conv2d_relu_ref(x, params["w" + name], params["b" + name], stride, pad)
        if x.shape[0] < _POOL or x.shape[1] < _POOL:
            break
        x = maxpool_ref(x)
    return jnp.transpose(x, (2, 0, 1))[None]


# ----------------------------------------------------------------------------
if __name__ == "__main__":
    root = jax.random.PRNGKey(0)
    kx, kp_, ks = jax.random.split(root, 3)

    params = init_params(kp_)
    x = jax.random.normal(kx, (1, 25, 128, 128), dtype=jnp.float32)

    out = jax.jit(model_tanh_forward)(x, params)
    jax.block_until_ready(out)

    ref = model_tanh_forward_ref(x, params)
    assert out.shape == ref.shape, (out.shape, ref.shape)
    # Kernels use bf16 matmul operands with f32 accumulation; compare vs. f32 XLA ref.
    assert bool(jnp.allclose(out, ref, rtol=2e-2, atol=2e-2)), "mismatch vs JAX reference"

    # Standalone tests for conv3/conv4/conv5 (+fused pool) on valid shapes
    # (these stages are unreachable in the faithful chain -- see TODO above).
    k3, k4, k5 = jax.random.split(ks, 3)
    for key, name, shape, stride, pad in [
        (k3, "3", (18, 18, 17), 2, 1),
        (k4, "4", (18, 18, 19), 2, 1),
        (k5, "5", (9, 9, 32), 1, 3),
    ]:
        xs = jax.random.normal(key, shape, jnp.float32)
        ys = conv2d_relu_maxpool(xs, params["w" + name], params["b" + name], stride, pad)
        rs = maxpool_ref(conv2d_relu_ref(xs, params["w" + name], params["b" + name],
                                         stride, pad))
        jax.block_until_ready(ys)
        assert ys.shape == rs.shape, (name, ys.shape, rs.shape)
        assert bool(jnp.allclose(ys, rs, rtol=2e-2, atol=2e-2)), f"conv{name} mismatch"

    print("KERNEL_OK")
</pallas_src>

<mosaic_0001>
module attributes {stable_mosaic.version = 11 : i64} {
  func.func @_conv_relu_pool_kernel(%arg0: i32, %arg1: memref<2592x256xbf16, #tpu.memory_space<vmem>>, %arg2: memref<256x128xbf16, #tpu.memory_space<vmem>>, %arg3: memref<1x128xf32, #tpu.memory_space<vmem>>, %arg4: memref<32x128xf32, #tpu.memory_space<vmem>>) attributes {dimension_semantics = [#tpu.dimension_semantics<parallel>], iteration_bounds = array<i64: 2>, scalar_prefetch = 0 : i64, scratch_operands = 0 : i64, tpu.core_type = #tpu.core_type<tc>, window_params = [{transform_indices = @transform_0, window_bounds = array<i64: 2592, 256>}, {pipeline_mode = #tpu.pipeline_mode<synchronous>, transform_indices = @transform_1, window_bounds = array<i64: 256, 128>}, {pipeline_mode = #tpu.pipeline_mode<synchronous>, transform_indices = @transform_2, window_bounds = array<i64: 1, 128>}, {transform_indices = @transform_3, window_bounds = array<i64: 32, 128>}]} {
    %c0 = arith.constant 0 : index
    %c0_0 = arith.constant 0 : index
    %0 = vector.load %arg1[%c0, %c0_0] : memref<2592x256xbf16, #tpu.memory_space<vmem>>, vector<2592x256xbf16>
    %c0_1 = arith.constant 0 : index
    %c0_2 = arith.constant 0 : index
    %1 = vector.load %arg2[%c0_1, %c0_2] : memref<256x128xbf16, #tpu.memory_space<vmem>>, vector<256x128xbf16>
    %cst = arith.constant dense<0.000000e+00> : vector<2592x128xf32>
    %2 = tpu.matmul %0, %1, %cst {dimension_numbers = #tpu.dot_dimension_numbers<[1], [0], [0], [1], [0, 0, 1, 1], [], []>} : vector<2592x256xbf16>, vector<256x128xbf16>, vector<2592x128xf32> -> vector<2592x128xf32>
    %c0_3 = arith.constant 0 : index
    %c0_4 = arith.constant 0 : index
    %3 = vector.load %arg3[%c0_3, %c0_4] : memref<1x128xf32, #tpu.memory_space<vmem>>, vector<1x128xf32>
    %4 = vector.extract_strided_slice %2 {offsets = [0, 0], sizes = [8, 128], strides = [1, 1]} : vector<2592x128xf32> to vector<8x128xf32>
    %5 = vector.extract_strided_slice %2 {offsets = [8, 0], sizes = [8, 128], strides = [1, 1]} : vector<2592x128xf32> to vector<8x128xf32>
    %6 = vector.extract_strided_slice %2 {offsets = [16, 0], sizes = [8, 128], strides = [1, 1]} : vector<2592x128xf32> to vector<8x128xf32>
    %7 = vector.extract_strided_slice %2 {offsets = [24, 0], sizes = [8, 128], strides = [1, 1]} : vector<2592x128xf32> to vector<8x128xf32>
    %8 = vector.extract_strided_slice %2 {offsets = [32, 0], sizes = [8, 128], strides = [1, 1]} : vector<2592x128xf32> to vector<8x128xf32>
    %9 = arith.maximumf %4, %8 : vector<8x128xf32>
    %10 = vector.extract_strided_slice %2 {offsets = [40, 0], sizes = [8, 128], strides = [1, 1]} : vector<2592x128xf32> to vector<8x128xf32>
    %11 = arith.maximumf %5, %10 : vector<8x128xf32>
    %12 = vector.extract_strided_slice %2 {offsets = [48, 0], sizes = [8, 128], strides = [1, 1]} : vector<2592x128xf32> to vector<8x128xf32>
    %13 = arith.maximumf %6, %12 : vector<8x128xf32>
    %14 = vector.extract_strided_slice %2 {offsets = [56, 0], sizes = [8, 128], strides = [1, 1]} : vector<2592x128xf32> to vector<8x128xf32>
    %15 = arith.maximumf %7, %14 : vector<8x128xf32>
    %16 = vector.extract_strided_slice %2 {offsets = [64, 0], sizes = [8, 128], strides = [1, 1]} : vector<2592x128xf32> to vector<8x128xf32>
    %17 = arith.maximumf %9, %16 : vector<8x128xf32>
    %18 = vector.extract_strided_slice %2 {offsets = [72, 0], sizes = [8, 128], strides = [1, 1]} : vector<2592x128xf32> to vector<8x128xf32>
    %19 = arith.maximumf %11, %18 : vector<8x128xf32>
    %20 = vector.extract_strided_slice %2 {offsets = [80, 0], sizes = [8, 128], strides = [1, 1]} : vector<2592x128xf32> to vector<8x128xf32>
    %21 = arith.maximumf %13, %20 : vector<8x128xf32>
    %22 = vector.extract_strided_slice %2 {offsets = [88, 0], sizes = [8, 128], strides = [1, 1]} : vector<2592x128xf32> to vector<8x128xf32>
    %23 = arith.maximumf %15, %22 : vector<8x128xf32>
    %24 = vector.extract_strided_slice %2 {offsets = [96, 0], sizes = [8, 128], strides = [1, 1]} : vector<2592x128xf32> to vector<8x128xf32>
    %25 = arith.maximumf %17, %24 : vector<8x128xf32>
    %26 = vector.extract_strided_slice %2 {offsets = [104, 0], sizes = [8, 128], strides = [1, 1]} : vector<2592x128xf32> to vector<8x128xf32>
    %27 = arith.maximumf %19, %26 : vector<8x128xf32>
    %28 = vector.extract_strided_slice %2 {offsets = [112, 0], sizes = [8, 128], strides = [1, 1]} : vector<2592x128xf32> to vector<8x128xf32>
    %29 = arith.maximumf %21, %28 : vector<8x128xf32>
    %30 = vector.extract_strided_slice %2 {offsets = [120, 0], sizes = [8, 128], strides = [1, 1]} : vector<2592x128xf32> to vector<8x128xf32>
    %31 = arith.maximumf %23, %30 : vector<8x128xf32>
    %32 = vector.extract_strided_slice %2 {offsets = [128, 0], sizes = [8, 128], strides = [1, 1]} : vector<2592x128xf32> to vector<8x128xf32>
    %33 = arith.maximumf %25, %32 : vector<8x128xf32>
    %34 = vector.extract_strided_slice %2 {offsets = [136, 0], sizes = [8, 128], strides = [1, 1]} : vector<2592x128xf32> to vector<8x128xf32>
    %35 = arith.maximumf %27, %34 : vector<8x128xf32>
    %36 = vector.extract_strided_slice %2 {offsets = [144, 0], sizes = [8, 128], strides = [1, 1]} : vector<2592x128xf32> to vector<8x128xf32>
    %37 = arith.maximumf %29, %36 : vector<8x128xf32>
    %38 = vector.extract_strided_slice %2 {offsets = [152, 0], sizes = [8, 128], strides = [1, 1]} : vector<2592x128xf32> to vector<8x128xf32>
    %39 = arith.maximumf %31, %38 : vector<8x128xf32>
    %40 = vector.extract_strided_slice %2 {offsets = [160, 0], sizes = [8, 128], strides = [1, 1]} : vector<2592x128xf32> to vector<8x128xf32>
    %41 = arith.maximumf %33, %40 : vector<8x128xf32>
    %42 = vector.extract_strided_slice %2 {offsets = [168, 0], sizes = [8, 128], strides = [1, 1]} : vector<2592x128xf32> to vector<8x128xf32>
    %43 = arith.maximumf %35, %42 : vector<8x128xf32>
    %44 = vector.extract_strided_slice %2 {offsets = [176, 0], sizes = [8, 128], strides = [1, 1]} : vector<2592x128xf32> to vector<8x128xf32>
    %45 = arith.maximumf %37, %44 : vector<8x128xf32>
    %46 = vector.extract_strided_slice %2 {offsets = [184, 0], sizes = [8, 128], strides = [1, 1]} : vector<2592x128xf32> to vector<8x128xf32>
    %47 = arith.maximumf %39, %46 : vector<8x128xf32>
    %48 = vector.extract_strided_slice %2 {offsets = [192, 0], sizes = [8, 128], strides = [1, 1]} : vector<2592x128xf32> to vector<8x128xf32>
    %49 = arith.maximumf %41, %48 : vector<8x128xf32>
    %50 = vector.extract_strided_slice %2 {offsets = [200, 0], sizes = [8, 128], strides = [1, 1]} : vector<2592x128xf32> to vector<8x128xf32>
    %51 = arith.maximumf %43, %50 : vector<8x128xf32>
    %52 = vector.extract_strided_slice %2 {offsets = [208, 0], sizes = [8, 128], strides = [1, 1]} : vector<2592x128xf32> to vector<8x128xf32>
    %53 = arith.maximumf %45, %52 : vector<8x128xf32>
    %54 = vector.extract_strided_slice %2 {offsets = [216, 0], sizes = [8, 128], strides = [1, 1]} : vector<2592x128xf32> to vector<8x128xf32>
    %55 = arith.maximumf %47, %54 : vector<8x128xf32>
    %56 = vector.extract_strided_slice %2 {offsets = [224, 0], sizes = [8, 128], strides = [1, 1]} : vector<2592x128xf32> to vector<8x128xf32>
    %57 = arith.maximumf %49, %56 : vector<8x128xf32>
    %58 = vector.extract_strided_slice %2 {offsets = [232, 0], sizes = [8, 128], strides = [1, 1]} : vector<2592x128xf32> to vector<8x128xf32>
    %59 = arith.maximumf %51, %58 : vector<8x128xf32>
    %60 = vector.extract_strided_slice %2 {offsets = [240, 0], sizes = [8, 128], strides = [1, 1]} : vector<2592x128xf32> to vector<8x128xf32>
    %61 = arith.maximumf %53, %60 : vector<8x128xf32>
    %62 = vector.extract_strided_slice %2 {offsets = [248, 0], sizes = [8, 128], strides = [1, 1]} : vector<2592x128xf32> to vector<8x128xf32>
    %63 = arith.maximumf %55, %62 : vector<8x128xf32>
    %64 = vector.extract_strided_slice %2 {offsets = [256, 0], sizes = [8, 128], strides = [1, 1]} : vector<2592x128xf32> to vector<8x128xf32>
    %65 = arith.maximumf %57, %64 : vector<8x128xf32>
    %66 = vector.extract_strided_slice %2 {offsets = [264, 0], sizes = [8, 128], strides = [1, 1]} : vector<2592x128xf32> to vector<8x128xf32>
    %67 = arith.maximumf %59, %66 : vector<8x128xf32>
    %68 = vector.extract_strided_slice %2 {offsets = [272, 0], sizes = [8, 128], strides = [1, 1]} : vector<2592x128xf32> to vector<8x128xf32>
    %69 = arith.maximumf %61, %68 : vector<8x128xf32>
    %70 = vector.extract_strided_slice %2 {offsets = [280, 0], sizes = [8, 128], strides = [1, 1]} : vector<2592x128xf32> to vector<8x128xf32>
    %71 = arith.maximumf %63, %70 : vector<8x128xf32>
    %72 = vector.extract_strided_slice %2 {offsets = [288, 0], sizes = [8, 128], strides = [1, 1]} : vector<2592x128xf32> to vector<8x128xf32>
    %73 = arith.maximumf %65, %72 : vector<8x128xf32>
    %74 = vector.extract_strided_slice %2 {offsets = [296, 0], sizes = [8, 128], strides = [1, 1]} : vector<2592x128xf32> to vector<8x128xf32>
    %75 = arith.maximumf %67, %74 : vector<8x128xf32>
    %76 = vector.extract_strided_slice %2 {offsets = [304, 0], sizes = [8, 128], strides = [1, 1]} : vector<2592x128xf32> to vector<8x128xf32>
    %77 = arith.maximumf %69, %76 : vector<8x128xf32>
    %78 = vector.extract_strided_slice %2 {offsets = [312, 0], sizes = [8, 128], strides = [1, 1]} : vector<2592x128xf32> to vector<8x128xf32>
    %79 = arith.maximumf %71, %78 : vector<8x128xf32>
    %80 = vector.extract_strided_slice %2 {offsets = [320, 0], sizes = [8, 128], strides = [1, 1]} : vector<2592x128xf32> to vector<8x128xf32>
    %81 = arith.maximumf %73, %80 : vector<8x128xf32>
    %82 = vector.extract_strided_slice %2 {offsets = [328, 0], sizes = [8, 128], strides = [1, 1]} : vector<2592x128xf32> to vector<8x128xf32>
    %83 = arith.maximumf %75, %82 : vector<8x128xf32>
    %84 = vector.extract_strided_slice %2 {offsets = [336, 0], sizes = [8, 128], strides = [1, 1]} : vector<2592x128xf32> to vector<8x128xf32>
    %85 = arith.maximumf %77, %84 : vector<8x128xf32>
    %86 = vector.extract_strided_slice %2 {offsets = [344, 0], sizes = [8, 128], strides = [1, 1]} : vector<2592x128xf32> to vector<8x128xf32>
    %87 = arith.maximumf %79, %86 : vector<8x128xf32>
    %88 = vector.extract_strided_slice %2 {offsets = [352, 0], sizes = [8, 128], strides = [1, 1]} : vector<2592x128xf32> to vector<8x128xf32>
    %89 = arith.maximumf %81, %88 : vector<8x128xf32>
    %90 = vector.extract_strided_slice %2 {offsets = [360, 0], sizes = [8, 128], strides = [1, 1]} : vector<2592x128xf32> to vector<8x128xf32>
    %91 = arith.maximumf %83, %90 : vector<8x128xf32>
    %92 = vector.extract_strided_slice %2 {offsets = [368, 0], sizes = [8, 128], strides = [1, 1]} : vector<2592x128xf32> to vector<8x128xf32>
    %93 = arith.maximumf %85, %92 : vector<8x128xf32>
    %94 = vector.extract_strided_slice %2 {offsets = [376, 0], sizes = [8, 128], strides = [1, 1]} : vector<2592x128xf32> to vector<8x128xf32>
    %95 = arith.maximumf %87, %94 : vector<8x128xf32>
    %96 = vector.extract_strided_slice %2 {offsets = [384, 0], sizes = [8, 128], strides = [1, 1]} : vector<2592x128xf32> to vector<8x128xf32>
    %97 = arith.maximumf %89, %96 : vector<8x128xf32>
    %98 = vector.extract_strided_slice %2 {offsets = [392, 0], sizes = [8, 128], strides = [1, 1]} : vector<2592x128xf32> to vector<8x128xf32>
    %99 = arith.maximumf %91, %98 : vector<8x128xf32>
    %100 = vector.extract_strided_slice %2 {offsets = [400, 0], sizes = [8, 128], strides = [1, 1]} : vector<2592x128xf32> to vector<8x128xf32>
    %101 = arith.maximumf %93, %100 : vector<8x128xf32>
    %102 = vector.extract_strided_slice %2 {offsets = [408, 0], sizes = [8, 128], strides = [1, 1]} : vector<2592x128xf32> to vector<8x128xf32>
    %103 = arith.maximumf %95, %102 : vector<8x128xf32>
    %104 = vector.extract_strided_slice %2 {offsets = [416, 0], sizes = [8, 128], strides = [1, 1]} : vector<2592x128xf32> to vector<8x128xf32>
    %105 = arith.maximumf %97, %104 : vector<8x128xf32>
    %106 = vector.extract_strided_slice %2 {offsets = [424, 0], sizes = [8, 128], strides = [1, 1]} : vector<2592x128xf32> to vector<8x128xf32>
    %107 = arith.maximumf %99, %106 : vector<8x128xf32>
    %108 = vector.extract_strided_slice %2 {offsets = [432, 0], sizes = [8, 128], strides = [1, 1]} : vector<2592x128xf32> to vector<8x128xf32>
    %109 = arith.maximumf %101, %108 : vector<8x128xf32>
    %110 = vector.extract_strided_slice %2 {offsets = [440, 0], sizes = [8, 128], strides = [1, 1]} : vector<2592x128xf32> to vector<8x128xf32>
    %111 = arith.maximumf %103, %110 : vector<8x128xf32>
    %112 = vector.extract_strided_slice %2 {offsets = [448, 0], sizes = [8, 128], strides = [1, 1]} : vector<2592x128xf32> to vector<8x128xf32>
    %113 = arith.maximumf %105, %112 : vector<8x128xf32>
    %114 = vector.extract_strided_slice %2 {offsets = [456, 0], sizes = [8, 128], strides = [1, 1]} : vector<2592x128xf32> to vector<8x128xf32>
    %115 = arith.maximumf %107, %114 : vector<8x128xf32>
    %116 = vector.extract_strided_slice %2 {offsets = [464, 0], sizes = [8, 128], strides = [1, 1]} : vector<2592x128xf32> to vector<8x128xf32>
    %117 = arith.maximumf %109, %116 : vector<8x128xf32>
    %118 = vector.extract_strided_slice %2 {offsets = [472, 0], sizes = [8, 128], strides = [1, 1]} : vector<2592x128xf32> to vector<8x128xf32>
    %119 = arith.maximumf %111, %118 : vector<8x128xf32>
    %120 = vector.extract_strided_slice %2 {offsets = [480, 0], sizes = [8, 128], strides = [1, 1]} : vector<2592x128xf32> to vector<8x128xf32>
    %121 = arith.maximumf %113, %120 : vector<8x128xf32>
    %122 = vector.extract_strided_slice %2 {offsets = [488, 0], sizes = [8, 128], strides = [1, 1]} : vector<2592x128xf32> to vector<8x128xf32>
    %123 = arith.maximumf %115, %122 : vector<8x128xf32>
    %124 = vector.extract_strided_slice %2 {offsets = [496, 0], sizes = [8, 128], strides = [1, 1]} : vector<2592x128xf32> to vector<8x128xf32>
    %125 = arith.maximumf %117, %124 : vector<8x128xf32>
    %126 = vector.extract_strided_slice %2 {offsets = [504, 0], sizes = [8, 128], strides = [1, 1]} : vector<2592x128xf32> to vector<8x128xf32>
    %127 = arith.maximumf %119, %126 : vector<8x128xf32>
    %128 = vector.extract_strided_slice %2 {offsets = [512, 0], sizes = [8, 128], strides = [1, 1]} : vector<2592x128xf32> to vector<8x128xf32>
    %129 = arith.maximumf %121, %128 : vector<8x128xf32>
    %130 = vector.extract_strided_slice %2 {offsets = [520, 0], sizes = [8, 128], strides = [1, 1]} : vector<2592x128xf32> to vector<8x128xf32>
    %131 = arith.maximumf %123, %130 : vector<8x128xf32>
    %132 = vector.extract_strided_slice %2 {offsets = [528, 0], sizes = [8, 128], strides = [1, 1]} : vector<2592x128xf32> to vector<8x128xf32>
    %133 = arith.maximumf %125, %132 : vector<8x128xf32>
    %134 = vector.extract_strided_slice %2 {offsets = [536, 0], sizes = [8, 128], strides = [1, 1]} : vector<2592x128xf32> to vector<8x128xf32>
    %135 = arith.maximumf %127, %134 : vector<8x128xf32>
    %136 = vector.extract_strided_slice %2 {offsets = [544, 0], sizes = [8, 128], strides = [1, 1]} : vector<2592x128xf32> to vector<8x128xf32>
    %137 = arith.maximumf %129, %136 : vector<8x128xf32>
    %138 = vector.extract_strided_slice %2 {offsets = [552, 0], sizes = [8, 128], strides = [1, 1]} : vector<2592x128xf32> to vector<8x128xf32>
    %139 = arith.maximumf %131, %138 : vector<8x128xf32>
    %140 = vector.extract_strided_slice %2 {offsets = [560, 0], sizes = [8, 128], strides = [1, 1]} : vector<2592x128xf32> to vector<8x128xf32>
    %141 = arith.maximumf %133, %140 : vector<8x128xf32>
    %142 = vector.extract_strided_slice %2 {offsets = [568, 0], sizes = [8, 128], strides = [1, 1]} : vector<2592x128xf32> to vector<8x128xf32>
    %143 = arith.maximumf %135, %142 : vector<8x128xf32>
    %144 = vector.extract_strided_slice %2 {offsets = [576, 0], sizes = [8, 128], strides = [1, 1]} : vector<2592x128xf32> to vector<8x128xf32>
    %145 = arith.maximumf %137, %144 : vector<8x128xf32>
    %146 = vector.extract_strided_slice %2 {offsets = [584, 0], sizes = [8, 128], strides = [1, 1]} : vector<2592x128xf32> to vector<8x128xf32>
    %147 = arith.maximumf %139, %146 : vector<8x128xf32>
    %148 = vector.extract_strided_slice %2 {offsets = [592, 0], sizes = [8, 128], strides = [1, 1]} : vector<2592x128xf32> to vector<8x128xf32>
    %149 = arith.maximumf %141, %148 : vector<8x128xf32>
    %150 = vector.extract_strided_slice %2 {offsets = [600, 0], sizes = [8, 128], strides = [1, 1]} : vector<2592x128xf32> to vector<8x128xf32>
    %151 = arith.maximumf %143, %150 : vector<8x128xf32>
    %152 = vector.extract_strided_slice %2 {offsets = [608, 0], sizes = [8, 128], strides = [1, 1]} : vector<2592x128xf32> to vector<8x128xf32>
    %153 = arith.maximumf %145, %152 : vector<8x128xf32>
    %154 = vector.extract_strided_slice %2 {offsets = [616, 0], sizes = [8, 128], strides = [1, 1]} : vector<2592x128xf32> to vector<8x128xf32>
    %155 = arith.maximumf %147, %154 : vector<8x128xf32>
    %156 = vector.extract_strided_slice %2 {offsets = [624, 0], sizes = [8, 128], strides = [1, 1]} : vector<2592x128xf32> to vector<8x128xf32>
    %157 = arith.maximumf %149, %156 : vector<8x128xf32>
    %158 = vector.extract_strided_slice %2 {offsets = [632, 0], sizes = [8, 128], strides = [1, 1]} : vector<2592x128xf32> to vector<8x128xf32>
    %159 = arith.maximumf %151, %158 : vector<8x128xf32>
    %160 = vector.extract_strided_slice %2 {offsets = [640, 0], sizes = [8, 128], strides = [1, 1]} : vector<2592x128xf32> to vector<8x128xf32>
    %161 = arith.maximumf %153, %160 : vector<8x128xf32>
    %162 = arith.maximumf %161, %155 : vector<8x128xf32>
    %163 = arith.maximumf %157, %159 : vector<8x128xf32>
    %164 = arith.maximumf %162, %163 : vector<8x128xf32>
    %165 = vector.broadcast %3 : vector<1x128xf32> to vector<8x128xf32>
    %166 = arith.addf %164, %165 : vector<8x128xf32>
    %cst_5 = arith.constant 0.000000e+00 : f32
    %167 = vector.broadcast %cst_5 : f32 to vector<8x128xf32>
    %168 = arith.maximumf %166, %167 : vector<8x128xf32>
    %c0_6 = arith.constant 0 : index
    %c0_7 = arith.constant 0 : index
    %169 = vector.load %arg4[%c0_6, %c0_7] : memref<32x128xf32, #tpu.memory_space<vmem>>, vector<8x128xf32>
    tpu.vector_store %arg4[%c0_6, %c0_7], %168 {strides = array<i32>} : memref<32x128xf32, #tpu.memory_space<vmem>>, vector<8x128xf32>,
    %170 = vector.extract_strided_slice %2 {offsets = [648, 0], sizes = [8, 128], strides = [1, 1]} : vector<2592x128xf32> to vector<8x128xf32>
    %171 = vector.extract_strided_slice %2 {offsets = [656, 0], sizes = [8, 128], strides = [1, 1]} : vector<2592x128xf32> to vector<8x128xf32>
    %172 = vector.extract_strided_slice %2 {offsets = [664, 0], sizes = [8, 128], strides = [1, 1]} : vector<2592x128xf32> to vector<8x128xf32>
    %173 = vector.extract_strided_slice %2 {offsets = [672, 0], sizes = [8, 128], strides = [1, 1]} : vector<2592x128xf32> to vector<8x128xf32>
    %174 = vector.extract_strided_slice %2 {offsets = [680, 0], sizes = [8, 128], strides = [1, 1]} : vector<2592x128xf32> to vector<8x128xf32>
    %175 = arith.maximumf %170, %174 : vector<8x128xf32>
    %176 = vector.extract_strided_slice %2 {offsets = [688, 0], sizes = [8, 128], strides = [1, 1]} : vector<2592x128xf32> to vector<8x128xf32>
    %177 = arith.maximumf %171, %176 : vector<8x128xf32>
    %178 = vector.extract_strided_slice %2 {offsets = [696, 0], sizes = [8, 128], strides = [1, 1]} : vector<2592x128xf32> to vector<8x128xf32>
    %179 = arith.maximumf %172, %178 : vector<8x128xf32>
    %180 = vector.extract_strided_slice %2 {offsets = [704, 0], sizes = [8, 128], strides = [1, 1]} : vector<2592x128xf32> to vector<8x128xf32>
    %181 = arith.maximumf %173, %180 : vector<8x128xf32>
    %182 = vector.extract_strided_slice %2 {offsets = [712, 0], sizes = [8, 128], strides = [1, 1]} : vector<2592x128xf32> to vector<8x128xf32>
    %183 = arith.maximumf %175, %182 : vector<8x128xf32>
    %184 = vector.extract_strided_slice %2 {offsets = [720, 0], sizes = [8, 128], strides = [1, 1]} : vector<2592x128xf32> to vector<8x128xf32>
    %185 = arith.maximumf %177, %184 : vector<8x128xf32>
    %186 = vector.extract_strided_slice %2 {offsets = [728, 0], sizes = [8, 128], strides = [1, 1]} : vector<2592x128xf32> to vector<8x128xf32>
    %187 = arith.maximumf %179, %186 : vector<8x128xf32>
    %188 = vector.extract_strided_slice %2 {offsets = [736, 0], sizes = [8, 128], strides = [1, 1]} : vector<2592x128xf32> to vector<8x128xf32>
    %189 = arith.maximumf %181, %188 : vector<8x128xf32>
    %190 = vector.extract_strided_slice %2 {offsets = [744, 0], sizes = [8, 128], strides = [1, 1]} : vector<2592x128xf32> to vector<8x128xf32>
    %191 = arith.maximumf %183, %190 : vector<8x128xf32>
    %192 = vector.extract_strided_slice %2 {offsets = [752, 0], sizes = [8, 128], strides = [1, 1]} : vector<2592x128xf32> to vector<8x128xf32>
    %193 = arith.maximumf %185, %192 : vector<8x128xf32>
    %194 = vector.extract_strided_slice %2 {offsets = [760, 0], sizes = [8, 128], strides = [1, 1]} : vector<2592x128xf32> to vector<8x128xf32>
    %195 = arith.maximumf %187, %194 : vector<8x128xf32>
    %196 = vector.extract_strided_slice %2 {offsets = [768, 0], sizes = [8, 128], strides = [1, 1]} : vector<2592x128xf32> to vector<8x128xf32>
    %197 = arith.maximumf %189, %196 : vector<8x128xf32>
    %198 = vector.extract_strided_slice %2 {offsets = [776, 0], sizes = [8, 128], strides = [1, 1]} : vector<2592x128xf32> to vector<8x128xf32>
    %199 = arith.maximumf %191, %198 : vector<8x128xf32>
    %200 = vector.extract_strided_slice %2 {offsets = [784, 0], sizes = [8, 128], strides = [1, 1]} : vector<2592x128xf32> to vector<8x128xf32>
    %201 = arith.maximumf %193, %200 : vector<8x128xf32>
    %202 = vector.extract_strided_slice %2 {offsets = [792, 0], sizes = [8, 128], strides = [1, 1]} : vector<2592x128xf32> to vector<8x128xf32>
    %203 = arith.maximumf %195, %202 : vector<8x128xf32>
    %204 = vector.extract_strided_slice %2 {offsets = [800, 0], sizes = [8, 128], strides = [1, 1]} : vector<2592x128xf32> to vector<8x128xf32>
    %205 = arith.maximumf %197, %204 : vector<8x128xf32>
    %206 = vector.extract_strided_slice %2 {offsets = [808, 0], sizes = [8, 128], strides = [1, 1]} : vector<2592x128xf32> to vector<8x128xf32>
    %207 = arith.maximumf %199, %206 : vector<8x128xf32>
    %208 = vector.extract_strided_slice %2 {offsets = [816, 0], sizes = [8, 128], strides = [1, 1]} : vector<2592x128xf32> to vector<8x128xf32>
    %209 = arith.maximumf %201, %208 : vector<8x128xf32>
    %210 = vector.extract_strided_slice %2 {offsets = [824, 0], sizes = [8, 128], strides = [1, 1]} : vector<2592x128xf32> to vector<8x128xf32>
    %211 = arith.maximumf %203, %210 : vector<8x128xf32>
    %212 = vector.extract_strided_slice %2 {offsets = [832, 0], sizes = [8, 128], strides = [1, 1]} : vector<2592x128xf32> to vector<8x128xf32>
    %213 = arith.maximumf %205, %212 : vector<8x128xf32>
    %214 = vector.extract_strided_slice %2 {offsets = [840, 0], sizes = [8, 128], strides = [1, 1]} : vector<2592x128xf32> to vector<8x128xf32>
    %215 = arith.maximumf %207, %214 : vector<8x128xf32>
    %216 = vector.extract_strided_slice %2 {offsets = [848, 0], sizes = [8, 128], strides = [1, 1]} : vector<2592x128xf32> to vector<8x128xf32>
    %217 = arith.maximumf %209, %216 : vector<8x128xf32>
    %218 = vector.extract_strided_slice %2 {offsets = [856, 0], sizes = [8, 128], strides = [1, 1]} : vector<2592x128xf32> to vector<8x128xf32>
    %219 = arith.maximumf %211, %218 : vector<8x128xf32>
    %220 = vector.extract_strided_slice %2 {offsets = [864, 0], sizes = [8, 128], strides = [1, 1]} : vector<2592x128xf32> to vector<8x128xf32>
    %221 = arith.maximumf %213, %220 : vector<8x128xf32>
    %222 = vector.extract_strided_slice %2 {offsets = [872, 0], sizes = [8, 128], strides = [1, 1]} : vector<2592x128xf32> to vector<8x128xf32>
    %223 = arith.maximumf %215, %222 : vector<8x128xf32>
    %224 = vector.extract_strided_slice %2 {offsets = [880, 0], sizes = [8, 128], strides = [1, 1]} : vector<2592x128xf32> to vector<8x128xf32>
    %225 = arith.maximumf %217, %224 : vector<8x128xf32>
    %226 = vector.extract_strided_slice %2 {offsets = [888, 0], sizes = [8, 128], strides = [1, 1]} : vector<2592x128xf32> to vector<8x128xf32>
    %227 = arith.maximumf %219, %226 : vector<8x128xf32>
    %228 = vector.extract_strided_slice %2 {offsets = [896, 0], sizes = [8, 128], strides = [1, 1]} : vector<2592x128xf32> to vector<8x128xf32>
    %229 = arith.maximumf %221, %228 : vector<8x128xf32>
    %230 = vector.extract_strided_slice %2 {offsets = [904, 0], sizes = [8, 128], strides = [1, 1]} : vector<2592x128xf32> to vector<8x128xf32>
    %231 = arith.maximumf %223, %230 : vector<8x128xf32>
    %232 = vector.extract_strided_slice %2 {offsets = [912, 0], sizes = [8, 128], strides = [1, 1]} : vector<2592x128xf32> to vector<8x128xf32>
    %233 = arith.maximumf %225, %232 : vector<8x128xf32>
    %234 = vector.extract_strided_slice %2 {offsets = [920, 0], sizes = [8, 128], strides = [1, 1]} : vector<2592x128xf32> to vector<8x128xf32>
    %235 = arith.maximumf %227, %234 : vector<8x128xf32>
    %236 = vector.extract_strided_slice %2 {offsets = [928, 0], sizes = [8, 128], strides = [1, 1]} : vector<2592x128xf32> to vector<8x128xf32>
    %237 = arith.maximumf %229, %236 : vector<8x128xf32>
    %238 = vector.extract_strided_slice %2 {offsets = [936, 0], sizes = [8, 128], strides = [1, 1]} : vector<2592x128xf32> to vector<8x128xf32>
    %239 = arith.maximumf %231, %238 : vector<8x128xf32>
    %240 = vector.extract_strided_slice %2 {offsets = [944, 0], sizes = [8, 128], strides = [1, 1]} : vector<2592x128xf32> to vector<8x128xf32>
    %241 = arith.maximumf %233, %240 : vector<8x128xf32>
    %242 = vector.extract_strided_slice %2 {offsets = [952, 0], sizes = [8, 128], strides = [1, 1]} : vector<2592x128xf32> to vector<8x128xf32>
    %243 = arith.maximumf %235, %242 : vector<8x128xf32>
    %244 = vector.extract_strided_slice %2 {offsets = [960, 0], sizes = [8, 128], strides = [1, 1]} : vector<2592x128xf32> to vector<8x128xf32>
    %245 = arith.maximumf %237, %244 : vector<8x128xf32>
    %246 = vector.extract_strided_slice %2 {offsets = [968, 0], sizes = [8, 128], strides = [1, 1]} : vector<2592x128xf32> to vector<8x128xf32>
    %247 = arith.maximumf %239, %246 : vector<8x128xf32>
    %248 = vector.extract_strided_slice %2 {offsets = [976, 0], sizes = [8, 128], strides = [1, 1]} : vector<2592x128xf32> to vector<8x128xf32>
    %249 = arith.maximumf %241, %248 : vector<8x128xf32>
    %250 = vector.extract_strided_slice %2 {offsets = [984, 0], sizes = [8, 128], strides = [1, 1]} : vector<2592x128xf32> to vector<8x128xf32>
    %251 = arith.maximumf %243, %250 : vector<8x128xf32>
    %252 = vector.extract_strided_slice %2 {offsets = [992, 0], sizes = [8, 128], strides = [1, 1]} : vector<2592x128xf32> to vector<8x128xf32>
    %253 = arith.maximumf %245, %252 : vector<8x128xf32>
    %254 = vector.extract_strided_slice %2 {offsets = [1000, 0], sizes = [8, 128], strides = [1, 1]} : vector<2592x128xf32> to vector<8x128xf32>
    %255 = arith.maximumf %247, %254 : vector<8x128xf32>
    %256 = vector.extract_strided_slice %2 {offsets = [1008, 0], sizes = [8, 128], strides = [1, 1]} : vector<2592x128xf32> to vector<8x128xf32>
    %257 = arith.maximumf %249, %256 : vector<8x128xf32>
    %258 = vector.extract_strided_slice %2 {offsets = [1016, 0], sizes = [8, 128], strides = [1, 1]} : vector<2592x128xf32> to vector<8x128xf32>
    %259 = arith.maximumf %251, %258 : vector<8x128xf32>
    %260 = vector.extract_strided_slice %2 {offsets = [1024, 0], sizes = [8, 128], strides = [1, 1]} : vector<2592x128xf32> to vector<8x128xf32>
    %261 = arith.maximumf %253, %260 : vector<8x128xf32>
    %262 = vector.extract_strided_slice %2 {offsets = [1032, 0], sizes = [8, 128], strides = [1, 1]} : vector<2592x128xf32> to vector<8x128xf32>
    %263 = arith.maximumf %255, %262 : vector<8x128xf32>
    %264 = vector.extract_strided_slice %2 {offsets = [1040, 0], sizes = [8, 128], strides = [1, 1]} : vector<2592x128xf32> to vector<8x128xf32>
    %265 = arith.maximumf %257, %264 : vector<8x128xf32>
    %266 = vector.extract_strided_slice %2 {offsets = [1048, 0], sizes = [8, 128], strides = [1, 1]} : vector<2592x128xf32> to vector<8x128xf32>
    %267 = arith.maximumf %259, %266 : vector<8x128xf32>
    %268 = vector.extract_strided_slice %2 {offsets = [1056, 0], sizes = [8, 128], strides = [1, 1]} : vector<2592x128xf32> to vector<8x128xf32>
    %269 = arith.maximumf %261, %268 : vector<8x128xf32>
    %270 = vector.extract_strided_slice %2 {offsets = [1064, 0], sizes = [8, 128], strides = [1, 1]} : vector<2592x128xf32> to vector<8x128xf32>
    %271 = arith.maximumf %263, %270 : vector<8x128xf32>
    %272 = vector.extract_strided_slice %2 {offsets = [1072, 0], sizes = [8, 128], strides = [1, 1]} : vector<2592x128xf32> to vector<8x128xf32>
    %273 = arith.maximumf %265, %272 : vector<8x128xf32>
    %274 = vector.extract_strided_slice %2 {offsets = [1080, 0], sizes = [8, 128], strides = [1, 1]} : vector<2592x128xf32> to vector<8x128xf32>
    %275 = arith.maximumf %267, %274 : vector<8x128xf32>
    %276 = vector.extract_strided_slice %2 {offsets = [1088, 0], sizes = [8, 128], strides = [1, 1]} : vector<2592x128xf32> to vector<8x128xf32>
    %277 = arith.maximumf %269, %276 : vector<8x128xf32>
    %278 = vector.extract_strided_slice %2 {offsets = [1096, 0], sizes = [8, 128], strides = [1, 1]} : vector<2592x128xf32> to vector<8x128xf32>
    %279 = arith.maximumf %271, %278 : vector<8x128xf32>
    %280 = vector.extract_strided_slice %2 {offsets = [1104, 0], sizes = [8, 128], strides = [1, 1]} : vector<2592x128xf32> to vector<8x128xf32>
    %281 = arith.maximumf %273, %280 : vector<8x128xf32>
    %282 = vector.extract_strided_slice %2 {offsets = [1112, 0], sizes = [8, 128], strides = [1, 1]} : vector<2592x128xf32> to vector<8x128xf32>
    %283 = arith.maximumf %275, %282 : vector<8x128xf32>
    %284 = vector.extract_strided_slice %2 {offsets = [1120, 0], sizes = [8, 128], strides = [1, 1]} : vector<2592x128xf32> to vector<8x128xf32>
    %285 = arith.maximumf %277, %284 : vector<8x128xf32>
    %286 = vector.extract_strided_slice %2 {offsets = [1128, 0], sizes = [8, 128], strides = [1, 1]} : vector<2592x128xf32> to vector<8x128xf32>
    %287 = arith.maximumf %279, %286 : vector<8x128xf32>
    %288 = vector.extract_strided_slice %2 {offsets = [1136, 0], sizes = [8, 128], strides = [1, 1]} : vector<2592x128xf32> to vector<8x128xf32>
    %289 = arith.maximumf %281, %288 : vector<8x128xf32>
    %290 = vector.extract_strided_slice %2 {offsets = [1144, 0], sizes = [8, 128], strides = [1, 1]} : vector<2592x128xf32> to vector<8x128xf32>
    %291 = arith.maximumf %283, %290 : vector<8x128xf32>
    %292 = vector.extract_strided_slice %2 {offsets = [1152, 0], sizes = [8, 128], strides = [1, 1]} : vector<2592x128xf32> to vector<8x128xf32>
    %293 = arith.maximumf %285, %292 : vector<8x128xf32>
    %294 = vector.extract_strided_slice %2 {offsets = [1160, 0], sizes = [8, 128], strides = [1, 1]} : vector<2592x128xf32> to vector<8x128xf32>
    %295 = arith.maximumf %287, %294 : vector<8x128xf32>
    %296 = vector.extract_strided_slice %2 {offsets = [1168, 0], sizes = [8, 128], strides = [1, 1]} : vector<2592x128xf32> to vector<8x128xf32>
    %297 = arith.maximumf %289, %296 : vector<8x128xf32>
    %298 = vector.extract_strided_slice %2 {offsets = [1176, 0], sizes = [8, 128], strides = [1, 1]} : vector<2592x128xf32> to vector<8x128xf32>
    %299 = arith.maximumf %291, %298 : vector<8x128xf32>
    %300 = vector.extract_strided_slice %2 {offsets = [1184, 0], sizes = [8, 128], strides = [1, 1]} : vector<2592x128xf32> to vector<8x128xf32>
    %301 = arith.maximumf %293, %300 : vector<8x128xf32>
    %302 = vector.extract_strided_slice %2 {offsets = [1192, 0], sizes = [8, 128], strides = [1, 1]} : vector<2592x128xf32> to vector<8x128xf32>
    %303 = arith.maximumf %295, %302 : vector<8x128xf32>
    %304 = vector.extract_strided_slice %2 {offsets = [1200, 0], sizes = [8, 128], strides = [1, 1]} : vector<2592x128xf32> to vector<8x128xf32>
    %305 = arith.maximumf %297, %304 : vector<8x128xf32>
    %306 = vector.extract_strided_slice %2 {offsets = [1208, 0], sizes = [8, 128], strides = [1, 1]} : vector<2592x128xf32> to vector<8x128xf32>
    %307 = arith.maximumf %299, %306 : vector<8x128xf32>
    %308 = vector.extract_strided_slice %2 {offsets = [1216, 0], sizes = [8, 128], strides = [1, 1]} : vector<2592x128xf32> to vector<8x128xf32>
    %309 = arith.maximumf %301, %308 : vector<8x128xf32>
    %310 = vector.extract_strided_slice %2 {offsets = [1224, 0], sizes = [8, 128], strides = [1, 1]} : vector<2592x128xf32> to vector<8x128xf32>
    %311 = arith.maximumf %303, %310 : vector<8x128xf32>
    %312 = vector.extract_strided_slice %2 {offsets = [1232, 0], sizes = [8, 128], strides = [1, 1]} : vector<2592x128xf32> to vector<8x128xf32>
    %313 = arith.maximumf %305, %312 : vector<8x128xf32>
    %314 = vector.extract_strided_slice %2 {offsets = [1240, 0], sizes = [8, 128], strides = [1, 1]} : vector<2592x128xf32> to vector<8x128xf32>
    %315 = arith.maximumf %307, %314 : vector<8x128xf32>
    %316 = vector.extract_strided_slice %2 {offsets = [1248, 0], sizes = [8, 128], strides = [1, 1]} : vector<2592x128xf32> to vector<8x128xf32>
    %317 = arith.maximumf %309, %316 : vector<8x128xf32>
    %318 = vector.extract_strided_slice %2 {offsets = [1256, 0], sizes = [8, 128], strides = [1, 1]} : vector<2592x128xf32> to vector<8x128xf32>
    %319 = arith.maximumf %311, %318 : vector<8x128xf32>
    %320 = vector.extract_strided_slice %2 {offsets = [1264, 0], sizes = [8, 128], strides = [1, 1]} : vector<2592x128xf32> to vector<8x128xf32>
    %321 = arith.maximumf %313, %320 : vector<8x128xf32>
    %322 = vector.extract_strided_slice %2 {offsets = [1272, 0], sizes = [8, 128], strides = [1, 1]} : vector<2592x128xf32> to vector<8x128xf32>
    %323 = arith.maximumf %315, %322 : vector<8x128xf32>
    %324 = vector.extract_strided_slice %2 {offsets = [1280, 0], sizes = [8, 128], strides = [1, 1]} : vector<2592x128xf32> to vector<8x128xf32>
    %325 = arith.maximumf %317, %324 : vector<8x128xf32>
    %326 = vector.extract_strided_slice %2 {offsets = [1288, 0], sizes = [8, 128], strides = [1, 1]} : vector<2592x128xf32> to vector<8x128xf32>
    %327 = arith.maximumf %319, %326 : vector<8x128xf32>
    %328 = arith.maximumf %327, %321 : vector<8x128xf32>
    %329 = arith.maximumf %323, %325 : vector<8x128xf32>
    %330 = arith.maximumf %328, %329 : vector<8x128xf32>
    %331 = vector.broadcast %3 : vector<1x128xf32> to vector<8x128xf32>
    %332 = arith.addf %330, %331 : vector<8x128xf32>
    %cst_8 = arith.constant 0.000000e+00 : f32
    %333 = vector.broadcast %cst_8 : f32 to vector<8x128xf32>
    %334 = arith.maximumf %332, %333 : vector<8x128xf32>
    %c8 = arith.constant 8 : index
    %c0_9 = arith.constant 0 : index
    %335 = vector.load %arg4[%c8, %c0_9] : memref<32x128xf32, #tpu.memory_space<vmem>>, vector<8x128xf32>
    tpu.vector_store %arg4[%c8, %c0_9], %334 {strides = array<i32>} : memref<32x128xf32, #tpu.memory_space<vmem>>, vector<8x128xf32>,
    %336 = vector.extract_strided_slice %2 {offsets = [1296, 0], sizes = [8, 128], strides = [1, 1]} : vector<2592x128xf32> to vector<8x128xf32>
    %337 = vector.extract_strided_slice %2 {offsets = [1304, 0], sizes = [8, 128], strides = [1, 1]} : vector<2592x128xf32> to vector<8x128xf32>
    %338 = vector.extract_strided_slice %2 {offsets = [1312, 0], sizes = [8, 128], strides = [1, 1]} : vector<2592x128xf32> to vector<8x128xf32>
    %339 = vector.extract_strided_slice %2 {offsets = [1320, 0], sizes = [8, 128], strides = [1, 1]} : vector<2592x128xf32> to vector<8x128xf32>
    %340 = vector.extract_strided_slice %2 {offsets = [1328, 0], sizes = [8, 128], strides = [1, 1]} : vector<2592x128xf32> to vector<8x128xf32>
    %341 = arith.maximumf %336, %340 : vector<8x128xf32>
    %342 = vector.extract_strided_slice %2 {offsets = [1336, 0], sizes = [8, 128], strides = [1, 1]} : vector<2592x128xf32> to vector<8x128xf32>
    %343 = arith.maximumf %337, %342 : vector<8x128xf32>
    %344 = vector.extract_strided_slice %2 {offsets = [1344, 0], sizes = [8, 128], strides = [1, 1]} : vector<2592x128xf32> to vector<8x128xf32>
    %345 = arith.maximumf %338, %344 : vector<8x128xf32>
    %346 = vector.extract_strided_slice %2 {offsets = [1352, 0], sizes = [8, 128], strides = [1, 1]} : vector<2592x128xf32> to vector<8x128xf32>
    %347 = arith.maximumf %339, %346 : vector<8x128xf32>
    %348 = vector.extract_strided_slice %2 {offsets = [1360, 0], sizes = [8, 128], strides = [1, 1]} : vector<2592x128xf32> to vector<8x128xf32>
    %349 = arith.maximumf %341, %348 : vector<8x128xf32>
    %350 = vector.extract_strided_slice %2 {offsets = [1368, 0], sizes = [8, 128], strides = [1, 1]} : vector<2592x128xf32> to vector<8x128xf32>
    %351 = arith.maximumf %343, %350 : vector<8x128xf32>
    %352 = vector.extract_strided_slice %2 {offsets = [1376, 0], sizes = [8, 128], strides = [1, 1]} : vector<2592x128xf32> to vector<8x128xf32>
    %353 = arith.maximumf %345, %352 : vector<8x128xf32>
    %354 = vector.extract_strided_slice %2 {offsets = [1384, 0], sizes = [8, 128], strides = [1, 1]} : vector<2592x128xf32> to vector<8x128xf32>
    %355 = arith.maximumf %347, %354 : vector<8x128xf32>
    %356 = vector.extract_strided_slice %2 {offsets = [1392, 0], sizes = [8, 128], strides = [1, 1]} : vector<2592x128xf32> to vector<8x128xf32>
    %357 = arith.maximumf %349, %356 : vector<8x128xf32>
    %358 = vector.extract_strided_slice %2 {offsets = [1400, 0], sizes = [8, 128], strides = [1, 1]} : vector<2592x128xf32> to vector<8x128xf32>
    %359 = arith.maximumf %351, %358 : vector<8x128xf32>
    %360 = vector.extract_strided_slice %2 {offsets = [1408, 0], sizes = [8, 128], strides = [1, 1]} : vector<2592x128xf32> to vector<8x128xf32>
    %361 = arith.maximumf %353, %360 : vector<8x128xf32>
    %362 = vector.extract_strided_slice %2 {offsets = [1416, 0], sizes = [8, 128], strides = [1, 1]} : vector<2592x128xf32> to vector<8x128xf32>
    %363 = arith.maximumf %355, %362 : vector<8x128xf32>
    %364 = vector.extract_strided_slice %2 {offsets = [1424, 0], sizes = [8, 128], strides = [1, 1]} : vector<2592x128xf32> to vector<8x128xf32>
    %365 = arith.maximumf %357, %364 : vector<8x128xf32>
    %366 = vector.extract_strided_slice %2 {offsets = [1432, 0], sizes = [8, 128], strides = [1, 1]} : vector<2592x128xf32> to vector<8x128xf32>
    %367 = arith.maximumf %359, %366 : vector<8x128xf32>
    %368 = vector.extract_strided_slice %2 {offsets = [1440, 0], sizes = [8, 128], strides = [1, 1]} : vector<2592x128xf32> to vector<8x128xf32>
    %369 = arith.maximumf %361, %368 : vector<8x128xf32>
    %370 = vector.extract_strided_slice %2 {offsets = [1448, 0], sizes = [8, 128], strides = [1, 1]} : vector<2592x128xf32> to vector<8x128xf32>
    %371 = arith.maximumf %363, %370 : vector<8x128xf32>
    %372 = vector.extract_strided_slice %2 {offsets = [1456, 0], sizes = [8, 128], strides = [1, 1]} : vector<2592x128xf32> to vector<8x128xf32>
    %373 = arith.maximumf %365, %372 : vector<8x128xf32>
    %374 = vector.extract_strided_slice %2 {offsets = [1464, 0], sizes = [8, 128], strides = [1, 1]} : vector<2592x128xf32> to vector<8x128xf32>
    %375 = arith.maximumf %367, %374 : vector<8x128xf32>
    %376 = vector.extract_strided_slice %2 {offsets = [1472, 0], sizes = [8, 128], strides = [1, 1]} : vector<2592x128xf32> to vector<8x128xf32>
    %377 = arith.maximumf %369, %376 : vector<8x128xf32>
    %378 = vector.extract_strided_slice %2 {offsets = [1480, 0], sizes = [8, 128], strides = [1, 1]} : vector<2592x128xf32> to vector<8x128xf32>
    %379 = arith.maximumf %371, %378 : vector<8x128xf32>
    %380 = vector.extract_strided_slice %2 {offsets = [1488, 0], sizes = [8, 128], strides = [1, 1]} : vector<2592x128xf32> to vector<8x128xf32>
    %381 = arith.maximumf %373, %380 : vector<8x128xf32>
    %382 = vector.extract_strided_slice %2 {offsets = [1496, 0], sizes = [8, 128], strides = [1, 1]} : vector<2592x128xf32> to vector<8x128xf32>
    %383 = arith.maximumf %375, %382 : vector<8x128xf32>
    %384 = vector.extract_strided_slice %2 {offsets = [1504, 0], sizes = [8, 128], strides = [1, 1]} : vector<2592x128xf32> to vector<8x128xf32>
    %385 = arith.maximumf %377, %384 : vector<8x128xf32>
    %386 = vector.extract_strided_slice %2 {offsets = [1512, 0], sizes = [8, 128], strides = [1, 1]} : vector<2592x128xf32> to vector<8x128xf32>
    %387 = arith.maximumf %379, %386 : vector<8x128xf32>
    %388 = vector.extract_strided_slice %2 {offsets = [1520, 0], sizes = [8, 128], strides = [1, 1]} : vector<2592x128xf32> to vector<8x128xf32>
    %389 = arith.maximumf %381, %388 : vector<8x128xf32>
    %390 = vector.extract_strided_slice %2 {offsets = [1528, 0], sizes = [8, 128], strides = [1, 1]} : vector<2592x128xf32> to vector<8x128xf32>
    %391 = arith.maximumf %383, %390 : vector<8x128xf32>
    %392 = vector.extract_strided_slice %2 {offsets = [1536, 0], sizes = [8, 128], strides = [1, 1]} : vector<2592x128xf32> to vector<8x128xf32>
    %393 = arith.maximumf %385, %392 : vector<8x128xf32>
    %394 = vector.extract_strided_slice %2 {offsets = [1544, 0], sizes = [8, 128], strides = [1, 1]} : vector<2592x128xf32> to vector<8x128xf32>
    %395 = arith.maximumf %387, %394 : vector<8x128xf32>
    %396 = vector.extract_strided_slice %2 {offsets = [1552, 0], sizes = [8, 128], strides = [1, 1]} : vector<2592x128xf32> to vector<8x128xf32>
    %397 = arith.maximumf %389, %396 : vector<8x128xf32>
    %398 = vector.extract_strided_slice %2 {offsets = [1560, 0], sizes = [8, 128], strides = [1, 1]} : vector<2592x128xf32> to vector<8x128xf32>
    %399 = arith.maximumf %391, %398 : vector<8x128xf32>
    %400 = vector.extract_strided_slice %2 {offsets = [1568, 0], sizes = [8, 128], strides = [1, 1]} : vector<2592x128xf32> to vector<8x128xf32>
    %401 = arith.maximumf %393, %400 : vector<8x128xf32>
    %402 = vector.extract_strided_slice %2 {offsets = [1576, 0], sizes = [8, 128], strides = [1, 1]} : vector<2592x128xf32> to vector<8x128xf32>
    %403 = arith.maximumf %395, %402 : vector<8x128xf32>
    %404 = vector.extract_strided_slice %2 {offsets = [1584, 0], sizes = [8, 128], strides = [1, 1]} : vector<2592x128xf32> to vector<8x128xf32>
    %405 = arith.maximumf %397, %404 : vector<8x128xf32>
    %406 = vector.extract_strided_slice %2 {offsets = [1592, 0], sizes = [8, 128], strides = [1, 1]} : vector<2592x128xf32> to vector<8x128xf32>
    %407 = arith.maximumf %399, %406 : vector<8x128xf32>
    %408 = vector.extract_strided_slice %2 {offsets = [1600, 0], sizes = [8, 128], strides = [1, 1]} : vector<2592x128xf32> to vector<8x128xf32>
    %409 = arith.maximumf %401, %408 : vector<8x128xf32>
    %410 = vector.extract_strided_slice %2 {offsets = [1608, 0], sizes = [8, 128], strides = [1, 1]} : vector<2592x128xf32> to vector<8x128xf32>
    %411 = arith.maximumf %403, %410 : vector<8x128xf32>
    %412 = vector.extract_strided_slice %2 {offsets = [1616, 0], sizes = [8, 128], strides = [1, 1]} : vector<2592x128xf32> to vector<8x128xf32>
    %413 = arith.maximumf %405, %412 : vector<8x128xf32>
    %414 = vector.extract_strided_slice %2 {offsets = [1624, 0], sizes = [8, 128], strides = [1, 1]} : vector<2592x128xf32> to vector<8x128xf32>
    %415 = arith.maximumf %407, %414 : vector<8x128xf32>
    %416 = vector.extract_strided_slice %2 {offsets = [1632, 0], sizes = [8, 128], strides = [1, 1]} : vector<2592x128xf32> to vector<8x128xf32>
    %417 = arith.maximumf %409, %416 : vector<8x128xf32>
    %418 = vector.extract_strided_slice %2 {offsets = [1640, 0], sizes = [8, 128], strides = [1, 1]} : vector<2592x128xf32> to vector<8x128xf32>
    %419 = arith.maximumf %411, %418 : vector<8x128xf32>
    %420 = vector.extract_strided_slice %2 {offsets = [1648, 0], sizes = [8, 128], strides = [1, 1]} : vector<2592x128xf32> to vector<8x128xf32>
    %421 = arith.maximumf %413, %420 : vector<8x128xf32>
    %422 = vector.extract_strided_slice %2 {offsets = [1656, 0], sizes = [8, 128], strides = [1, 1]} : vector<2592x128xf32> to vector<8x128xf32>
    %423 = arith.maximumf %415, %422 : vector<8x128xf32>
    %424 = vector.extract_strided_slice %2 {offsets = [1664, 0], sizes = [8, 128], strides = [1, 1]} : vector<2592x128xf32> to vector<8x128xf32>
    %425 = arith.maximumf %417, %424 : vector<8x128xf32>
    %426 = vector.extract_strided_slice %2 {offsets = [1672, 0], sizes = [8, 128], strides = [1, 1]} : vector<2592x128xf32> to vector<8x128xf32>
    %427 = arith.maximumf %419, %426 : vector<8x128xf32>
    %428 = vector.extract_strided_slice %2 {offsets = [1680, 0], sizes = [8, 128], strides = [1, 1]} : vector<2592x128xf32> to vector<8x128xf32>
    %429 = arith.maximumf %421, %428 : vector<8x128xf32>
    %430 = vector.extract_strided_slice %2 {offsets = [1688, 0], sizes = [8, 128], strides = [1, 1]} : vector<2592x128xf32> to vector<8x128xf32>
    %431 = arith.maximumf %423, %430 : vector<8x128xf32>
    %432 = vector.extract_strided_slice %2 {offsets = [1696, 0], sizes = [8, 128], strides = [1, 1]} : vector<2592x128xf32> to vector<8x128xf32>
    %433 = arith.maximumf %425, %432 : vector<8x128xf32>
    %434 = vector.extract_strided_slice %2 {offsets = [1704, 0], sizes = [8, 128], strides = [1, 1]} : vector<2592x128xf32> to vector<8x128xf32>
    %435 = arith.maximumf %427, %434 : vector<8x128xf32>
    %436 = vector.extract_strided_slice %2 {offsets = [1712, 0], sizes = [8, 128], strides = [1, 1]} : vector<2592x128xf32> to vector<8x128xf32>
    %437 = arith.maximumf %429, %436 : vector<8x128xf32>
    %438 = vector.extract_strided_slice %2 {offsets = [1720, 0], sizes = [8, 128], strides = [1, 1]} : vector<2592x128xf32> to vector<8x128xf32>
    %439 = arith.maximumf %431, %438 : vector<8x128xf32>
    %440 = vector.extract_strided_slice %2 {offsets = [1728, 0], sizes = [8, 128], strides = [1, 1]} : vector<2592x128xf32> to vector<8x128xf32>
    %441 = arith.maximumf %433, %440 : vector<8x128xf32>
    %442 = vector.extract_strided_slice %2 {offsets = [1736, 0], sizes = [8, 128], strides = [1, 1]} : vector<2592x128xf32> to vector<8x128xf32>
    %443 = arith.maximumf %435, %442 : vector<8x128xf32>
    %444 = vector.extract_strided_slice %2 {offsets = [1744, 0], sizes = [8, 128], strides = [1, 1]} : vector<2592x128xf32> to vector<8x128xf32>
    %445 = arith.maximumf %437, %444 : vector<8x128xf32>
    %446 = vector.extract_strided_slice %2 {offsets = [1752, 0], sizes = [8, 128], strides = [1, 1]} : vector<2592x128xf32> to vector<8x128xf32>
    %447 = arith.maximumf %439, %446 : vector<8x128xf32>
    %448 = vector.extract_strided_slice %2 {offsets = [1760, 0], sizes = [8, 128], strides = [1, 1]} : vector<2592x128xf32> to vector<8x128xf32>
    %449 = arith.maximumf %441, %448 : vector<8x128xf32>
    %450 = vector.extract_strided_slice %2 {offsets = [1768, 0], sizes = [8, 128], strides = [1, 1]} : vector<2592x128xf32> to vector<8x128xf32>
    %451 = arith.maximumf %443, %450 : vector<8x128xf32>
    %452 = vector.extract_strided_slice %2 {offsets = [1776, 0], sizes = [8, 128], strides = [1, 1]} : vector<2592x128xf32> to vector<8x128xf32>
    %453 = arith.maximumf %445, %452 : vector<8x128xf32>
    %454 = vector.extract_strided_slice %2 {offsets = [1784, 0], sizes = [8, 128], strides = [1, 1]} : vector<2592x128xf32> to vector<8x128xf32>
    %455 = arith.maximumf %447, %454 : vector<8x128xf32>
    %456 = vector.extract_strided_slice %2 {offsets = [1792, 0], sizes = [8, 128], strides = [1, 1]} : vector<2592x128xf32> to vector<8x128xf32>
    %457 = arith.maximumf %449, %456 : vector<8x128xf32>
    %458 = vector.extract_strided_slice %2 {offsets = [1800, 0], sizes = [8, 128], strides = [1, 1]} : vector<2592x128xf32> to vector<8x128xf32>
    %459 = arith.maximumf %451, %458 : vector<8x128xf32>
    %460 = vector.extract_strided_slice %2 {offsets = [1808, 0], sizes = [8, 128], strides = [1, 1]} : vector<2592x128xf32> to vector<8x128xf32>
    %461 = arith.maximumf %453, %460 : vector<8x128xf32>
    %462 = vector.extract_strided_slice %2 {offsets = [1816, 0], sizes = [8, 128], strides = [1, 1]} : vector<2592x128xf32> to vector<8x128xf32>
    %463 = arith.maximumf %455, %462 : vector<8x128xf32>
    %464 = vector.extract_strided_slice %2 {offsets = [1824, 0], sizes = [8, 128], strides = [1, 1]} : vector<2592x128xf32> to vector<8x128xf32>
    %465 = arith.maximumf %457, %464 : vector<8x128xf32>
    %466 = vector.extract_strided_slice %2 {offsets = [1832, 0], sizes = [8, 128], strides = [1, 1]} : vector<2592x128xf32> to vector<8x128xf32>
    %467 = arith.maximumf %459, %466 : vector<8x128xf32>
    %468 = vector.extract_strided_slice %2 {offsets = [1840, 0], sizes = [8, 128], strides = [1, 1]} : vector<2592x128xf32> to vector<8x128xf32>
    %469 = arith.maximumf %461, %468 : vector<8x128xf32>
    %470 = vector.extract_strided_slice %2 {offsets = [1848, 0], sizes = [8, 128], strides = [1, 1]} : vector<2592x128xf32> to vector<8x128xf32>
    %471 = arith.maximumf %463, %470 : vector<8x128xf32>
    %472 = vector.extract_strided_slice %2 {offsets = [1856, 0], sizes = [8, 128], strides = [1, 1]} : vector<2592x128xf32> to vector<8x128xf32>
    %473 = arith.maximumf %465, %472 : vector<8x128xf32>
    %474 = vector.extract_strided_slice %2 {offsets = [1864, 0], sizes = [8, 128], strides = [1, 1]} : vector<2592x128xf32> to vector<8x128xf32>
    %475 = arith.maximumf %467, %474 : vector<8x128xf32>
    %476 = vector.extract_strided_slice %2 {offsets = [1872, 0], sizes = [8, 128], strides = [1, 1]} : vector<2592x128xf32> to vector<8x128xf32>
    %477 = arith.maximumf %469, %476 : vector<8x128xf32>
    %478 = vector.extract_strided_slice %2 {offsets = [1880, 0], sizes = [8, 128], strides = [1, 1]} : vector<2592x128xf32> to vector<8x128xf32>
    %479 = arith.maximumf %471, %478 : vector<8x128xf32>
    %480 = vector.extract_strided_slice %2 {offsets = [1888, 0], sizes = [8, 128], strides = [1, 1]} : vector<2592x128xf32> to vector<8x128xf32>
    %481 = arith.maximumf %473, %480 : vector<8x128xf32>
    %482 = vector.extract_strided_slice %2 {offsets = [1896, 0], sizes = [8, 128], strides = [1, 1]} : vector<2592x128xf32> to vector<8x128xf32>
    %483 = arith.maximumf %475, %482 : vector<8x128xf32>
    %484 = vector.extract_strided_slice %2 {offsets = [1904, 0], sizes = [8, 128], strides = [1, 1]} : vector<2592x128xf32> to vector<8x128xf32>
    %485 = arith.maximumf %477, %484 : vector<8x128xf32>
    %486 = vector.extract_strided_slice %2 {offsets = [1912, 0], sizes = [8, 128], strides = [1, 1]} : vector<2592x128xf32> to vector<8x128xf32>
    %487 = arith.maximumf %479, %486 : vector<8x128xf32>
    %488 = vector.extract_strided_slice %2 {offsets = [1920, 0], sizes = [8, 128], strides = [1, 1]} : vector<2592x128xf32> to vector<8x128xf32>
    %489 = arith.maximumf %481, %488 : vector<8x128xf32>
    %490 = vector.extract_strided_slice %2 {offsets = [1928, 0], sizes = [8, 128], strides = [1, 1]} : vector<2592x128xf32> to vector<8x128xf32>
    %491 = arith.maximumf %483, %490 : vector<8x128xf32>
    %492 = vector.extract_strided_slice %2 {offsets = [1936, 0], sizes = [8, 128], strides = [1, 1]} : vector<2592x128xf32> to vector<8x128xf32>
    %493 = arith.maximumf %485, %492 : vector<8x128xf32>
    %494 = arith.maximumf %493, %487 : vector<8x128xf32>
    %495 = arith.maximumf %489, %491 : vector<8x128xf32>
    %496 = arith.maximumf %494, %495 : vector<8x128xf32>
    %497 = vector.broadcast %3 : vector<1x128xf32> to vector<8x128xf32>
    %498 = arith.addf %496, %497 : vector<8x128xf32>
    %cst_10 = arith.constant 0.000000e+00 : f32
    %499 = vector.broadcast %cst_10 : f32 to vector<8x128xf32>
    %500 = arith.maximumf %498, %499 : vector<8x128xf32>
    %c16 = arith.constant 16 : index
    %c0_11 = arith.constant 0 : index
    %501 = vector.load %arg4[%c16, %c0_11] : memref<32x128xf32, #tpu.memory_space<vmem>>, vector<8x128xf32>
    tpu.vector_store %arg4[%c16, %c0_11], %500 {strides = array<i32>} : memref<32x128xf32, #tpu.memory_space<vmem>>, vector<8x128xf32>,
    %502 = vector.extract_strided_slice %2 {offsets = [1944, 0], sizes = [8, 128], strides = [1, 1]} : vector<2592x128xf32> to vector<8x128xf32>
    %503 = vector.extract_strided_slice %2 {offsets = [1952, 0], sizes = [8, 128], strides = [1, 1]} : vector<2592x128xf32> to vector<8x128xf32>
    %504 = vector.extract_strided_slice %2 {offsets = [1960, 0], sizes = [8, 128], strides = [1, 1]} : vector<2592x128xf32> to vector<8x128xf32>
    %505 = vector.extract_strided_slice %2 {offsets = [1968, 0], sizes = [8, 128], strides = [1, 1]} : vector<2592x128xf32> to vector<8x128xf32>
    %506 = vector.extract_strided_slice %2 {offsets = [1976, 0], sizes = [8, 128], strides = [1, 1]} : vector<2592x128xf32> to vector<8x128xf32>
    %507 = arith.maximumf %502, %506 : vector<8x128xf32>
    %508 = vector.extract_strided_slice %2 {offsets = [1984, 0], sizes = [8, 128], strides = [1, 1]} : vector<2592x128xf32> to vector<8x128xf32>
    %509 = arith.maximumf %503, %508 : vector<8x128xf32>
    %510 = vector.extract_strided_slice %2 {offsets = [1992, 0], sizes = [8, 128], strides = [1, 1]} : vector<2592x128xf32> to vector<8x128xf32>
    %511 = arith.maximumf %504, %510 : vector<8x128xf32>
    %512 = vector.extract_strided_slice %2 {offsets = [2000, 0], sizes = [8, 128], strides = [1, 1]} : vector<2592x128xf32> to vector<8x128xf32>
    %513 = arith.maximumf %505, %512 : vector<8x128xf32>
    %514 = vector.extract_strided_slice %2 {offsets = [2008, 0], sizes = [8, 128], strides = [1, 1]} : vector<2592x128xf32> to vector<8x128xf32>
    %515 = arith.maximumf %507, %514 : vector<8x128xf32>
    %516 = vector.extract_strided_slice %2 {offsets = [2016, 0], sizes = [8, 128], strides = [1, 1]} : vector<2592x128xf32> to vector<8x128xf32>
    %517 = arith.maximumf %509, %516 : vector<8x128xf32>
    %518 = vector.extract_strided_slice %2 {offsets = [2024, 0], sizes = [8, 128], strides = [1, 1]} : vector<2592x128xf32> to vector<8x128xf32>
    %519 = arith.maximumf %511, %518 : vector<8x128xf32>
    %520 = vector.extract_strided_slice %2 {offsets = [2032, 0], sizes = [8, 128], strides = [1, 1]} : vector<2592x128xf32> to vector<8x128xf32>
    %521 = arith.maximumf %513, %520 : vector<8x128xf32>
    %522 = vector.extract_strided_slice %2 {offsets = [2040, 0], sizes = [8, 128], strides = [1, 1]} : vector<2592x128xf32> to vector<8x128xf32>
    %523 = arith.maximumf %515, %522 : vector<8x128xf32>
    %524 = vector.extract_strided_slice %2 {offsets = [2048, 0], sizes = [8, 128], strides = [1, 1]} : vector<2592x128xf32> to vector<8x128xf32>
    %525 = arith.maximumf %517, %524 : vector<8x128xf32>
    %526 = vector.extract_strided_slice %2 {offsets = [2056, 0], sizes = [8, 128], strides = [1, 1]} : vector<2592x128xf32> to vector<8x128xf32>
    %527 = arith.maximumf %519, %526 : vector<8x128xf32>
    %528 = vector.extract_strided_slice %2 {offsets = [2064, 0], sizes = [8, 128], strides = [1, 1]} : vector<2592x128xf32> to vector<8x128xf32>
    %529 = arith.maximumf %521, %528 : vector<8x128xf32>
    %530 = vector.extract_strided_slice %2 {offsets = [2072, 0], sizes = [8, 128], strides = [1, 1]} : vector<2592x128xf32> to vector<8x128xf32>
    %531 = arith.maximumf %523, %530 : vector<8x128xf32>
    %532 = vector.extract_strided_slice %2 {offsets = [2080, 0], sizes = [8, 128], strides = [1, 1]} : vector<2592x128xf32> to vector<8x128xf32>
    %533 = arith.maximumf %525, %532 : vector<8x128xf32>
    %534 = vector.extract_strided_slice %2 {offsets = [2088, 0], sizes = [8, 128], strides = [1, 1]} : vector<2592x128xf32> to vector<8x128xf32>
    %535 = arith.maximumf %527, %534 : vector<8x128xf32>
    %536 = vector.extract_strided_slice %2 {offsets = [2096, 0], sizes = [8, 128], strides = [1, 1]} : vector<2592x128xf32> to vector<8x128xf32>
    %537 = arith.maximumf %529, %536 : vector<8x128xf32>
    %538 = vector.extract_strided_slice %2 {offsets = [2104, 0], sizes = [8, 128], strides = [1, 1]} : vector<2592x128xf32> to vector<8x128xf32>
    %539 = arith.maximumf %531, %538 : vector<8x128xf32>
    %540 = vector.extract_strided_slice %2 {offsets = [2112, 0], sizes = [8, 128], strides = [1, 1]} : vector<2592x128xf32> to vector<8x128xf32>
    %541 = arith.maximumf %533, %540 : vector<8x128xf32>
    %542 = vector.extract_strided_slice %2 {offsets = [2120, 0], sizes = [8, 128], strides = [1, 1]} : vector<2592x128xf32> to vector<8x128xf32>
    %543 = arith.maximumf %535, %542 : vector<8x128xf32>
    %544 = vector.extract_strided_slice %2 {offsets = [2128, 0], sizes = [8, 128], strides = [1, 1]} : vector<2592x128xf32> to vector<8x128xf32>
    %545 = arith.maximumf %537, %544 : vector<8x128xf32>
    %546 = vector.extract_strided_slice %2 {offsets = [2136, 0], sizes = [8, 128], strides = [1, 1]} : vector<2592x128xf32> to vector<8x128xf32>
    %547 = arith.maximumf %539, %546 : vector<8x128xf32>
    %548 = vector.extract_strided_slice %2 {offsets = [2144, 0], sizes = [8, 128], strides = [1, 1]} : vector<2592x128xf32> to vector<8x128xf32>
    %549 = arith.maximumf %541, %548 : vector<8x128xf32>
    %550 = vector.extract_strided_slice %2 {offsets = [2152, 0], sizes = [8, 128], strides = [1, 1]} : vector<2592x128xf32> to vector<8x128xf32>
    %551 = arith.maximumf %543, %550 : vector<8x128xf32>
    %552 = vector.extract_strided_slice %2 {offsets = [2160, 0], sizes = [8, 128], strides = [1, 1]} : vector<2592x128xf32> to vector<8x128xf32>
    %553 = arith.maximumf %545, %552 : vector<8x128xf32>
    %554 = vector.extract_strided_slice %2 {offsets = [2168, 0], sizes = [8, 128], strides = [1, 1]} : vector<2592x128xf32> to vector<8x128xf32>
    %555 = arith.maximumf %547, %554 : vector<8x128xf32>
    %556 = vector.extract_strided_slice %2 {offsets = [2176, 0], sizes = [8, 128], strides = [1, 1]} : vector<2592x128xf32> to vector<8x128xf32>
    %557 = arith.maximumf %549, %556 : vector<8x128xf32>
    %558 = vector.extract_strided_slice %2 {offsets = [2184, 0], sizes = [8, 128], strides = [1, 1]} : vector<2592x128xf32> to vector<8x128xf32>
    %559 = arith.maximumf %551, %558 : vector<8x128xf32>
    %560 = vector.extract_strided_slice %2 {offsets = [2192, 0], sizes = [8, 128], strides = [1, 1]} : vector<2592x128xf32> to vector<8x128xf32>
    %561 = arith.maximumf %553, %560 : vector<8x128xf32>
    %562 = vector.extract_strided_slice %2 {offsets = [2200, 0], sizes = [8, 128], strides = [1, 1]} : vector<2592x128xf32> to vector<8x128xf32>
    %563 = arith.maximumf %555, %562 : vector<8x128xf32>
    %564 = vector.extract_strided_slice %2 {offsets = [2208, 0], sizes = [8, 128], strides = [1, 1]} : vector<2592x128xf32> to vector<8x128xf32>
    %565 = arith.maximumf %557, %564 : vector<8x128xf32>
    %566 = vector.extract_strided_slice %2 {offsets = [2216, 0], sizes = [8, 128], strides = [1, 1]} : vector<2592x128xf32> to vector<8x128xf32>
    %567 = arith.maximumf %559, %566 : vector<8x128xf32>
    %568 = vector.extract_strided_slice %2 {offsets = [2224, 0], sizes = [8, 128], strides = [1, 1]} : vector<2592x128xf32> to vector<8x128xf32>
    %569 = arith.maximumf %561, %568 : vector<8x128xf32>
    %570 = vector.extract_strided_slice %2 {offsets = [2232, 0], sizes = [8, 128], strides = [1, 1]} : vector<2592x128xf32> to vector<8x128xf32>
    %571 = arith.maximumf %563, %570 : vector<8x128xf32>
    %572 = vector.extract_strided_slice %2 {offsets = [2240, 0], sizes = [8, 128], strides = [1, 1]} : vector<2592x128xf32> to vector<8x128xf32>
    %573 = arith.maximumf %565, %572 : vector<8x128xf32>
    %574 = vector.extract_strided_slice %2 {offsets = [2248, 0], sizes = [8, 128], strides = [1, 1]} : vector<2592x128xf32> to vector<8x128xf32>
    %575 = arith.maximumf %567, %574 : vector<8x128xf32>
    %576 = vector.extract_strided_slice %2 {offsets = [2256, 0], sizes = [8, 128], strides = [1, 1]} : vector<2592x128xf32> to vector<8x128xf32>
    %577 = arith.maximumf %569, %576 : vector<8x128xf32>
    %578 = vector.extract_strided_slice %2 {offsets = [2264, 0], sizes = [8, 128], strides = [1, 1]} : vector<2592x128xf32> to vector<8x128xf32>
    %579 = arith.maximumf %571, %578 : vector<8x128xf32>
    %580 = vector.extract_strided_slice %2 {offsets = [2272, 0], sizes = [8, 128], strides = [1, 1]} : vector<2592x128xf32> to vector<8x128xf32>
    %581 = arith.maximumf %573, %580 : vector<8x128xf32>
    %582 = vector.extract_strided_slice %2 {offsets = [2280, 0], sizes = [8, 128], strides = [1, 1]} : vector<2592x128xf32> to vector<8x128xf32>
    %583 = arith.maximumf %575, %582 : vector<8x128xf32>
    %584 = vector.extract_strided_slice %2 {offsets = [2288, 0], sizes = [8, 128], strides = [1, 1]} : vector<2592x128xf32> to vector<8x128xf32>
    %585 = arith.maximumf %577, %584 : vector<8x128xf32>
    %586 = vector.extract_strided_slice %2 {offsets = [2296, 0], sizes = [8, 128], strides = [1, 1]} : vector<2592x128xf32> to vector<8x128xf32>
    %587 = arith.maximumf %579, %586 : vector<8x128xf32>
    %588 = vector.extract_strided_slice %2 {offsets = [2304, 0], sizes = [8, 128], strides = [1, 1]} : vector<2592x128xf32> to vector<8x128xf32>
    %589 = arith.maximumf %581, %588 : vector<8x128xf32>
    %590 = vector.extract_strided_slice %2 {offsets = [2312, 0], sizes = [8, 128], strides = [1, 1]} : vector<2592x128xf32> to vector<8x128xf32>
    %591 = arith.maximumf %583, %590 : vector<8x128xf32>
    %592 = vector.extract_strided_slice %2 {offsets = [2320, 0], sizes = [8, 128], strides = [1, 1]} : vector<2592x128xf32> to vector<8x128xf32>
    %593 = arith.maximumf %585, %592 : vector<8x128xf32>
    %594 = vector.extract_strided_slice %2 {offsets = [2328, 0], sizes = [8, 128], strides = [1, 1]} : vector<2592x128xf32> to vector<8x128xf32>
    %595 = arith.maximumf %587, %594 : vector<8x128xf32>
    %596 = vector.extract_strided_slice %2 {offsets = [2336, 0], sizes = [8, 128], strides = [1, 1]} : vector<2592x128xf32> to vector<8x128xf32>
    %597 = arith.maximumf %589, %596 : vector<8x128xf32>
    %598 = vector.extract_strided_slice %2 {offsets = [2344, 0], sizes = [8, 128], strides = [1, 1]} : vector<2592x128xf32> to vector<8x128xf32>
    %599 = arith.maximumf %591, %598 : vector<8x128xf32>
    %600 = vector.extract_strided_slice %2 {offsets = [2352, 0], sizes = [8, 128], strides = [1, 1]} : vector<2592x128xf32> to vector<8x128xf32>
    %601 = arith.maximumf %593, %600 : vector<8x128xf32>
    %602 = vector.extract_strided_slice %2 {offsets = [2360, 0], sizes = [8, 128], strides = [1, 1]} : vector<2592x128xf32> to vector<8x128xf32>
    %603 = arith.maximumf %595, %602 : vector<8x128xf32>
    %604 = vector.extract_strided_slice %2 {offsets = [2368, 0], sizes = [8, 128], strides = [1, 1]} : vector<2592x128xf32> to vector<8x128xf32>
    %605 = arith.maximumf %597, %604 : vector<8x128xf32>
    %606 = vector.extract_strided_slice %2 {offsets = [2376, 0], sizes = [8, 128], strides = [1, 1]} : vector<2592x128xf32> to vector<8x128xf32>
    %607 = arith.maximumf %599, %606 : vector<8x128xf32>
    %608 = vector.extract_strided_slice %2 {offsets = [2384, 0], sizes = [8, 128], strides = [1, 1]} : vector<2592x128xf32> to vector<8x128xf32>
    %609 = arith.maximumf %601, %608 : vector<8x128xf32>
    %610 = vector.extract_strided_slice %2 {offsets = [2392, 0], sizes = [8, 128], strides = [1, 1]} : vector<2592x128xf32> to vector<8x128xf32>
    %611 = arith.maximumf %603, %610 : vector<8x128xf32>
    %612 = vector.extract_strided_slice %2 {offsets = [2400, 0], sizes = [8, 128], strides = [1, 1]} : vector<2592x128xf32> to vector<8x128xf32>
    %613 = arith.maximumf %605, %612 : vector<8x128xf32>
    %614 = vector.extract_strided_slice %2 {offsets = [2408, 0], sizes = [8, 128], strides = [1, 1]} : vector<2592x128xf32> to vector<8x128xf32>
    %615 = arith.maximumf %607, %614 : vector<8x128xf32>
    %616 = vector.extract_strided_slice %2 {offsets = [2416, 0], sizes = [8, 128], strides = [1, 1]} : vector<2592x128xf32> to vector<8x128xf32>
    %617 = arith.maximumf %609, %616 : vector<8x128xf32>
    %618 = vector.extract_strided_slice %2 {offsets = [2424, 0], sizes = [8, 128], strides = [1, 1]} : vector<2592x128xf32> to vector<8x128xf32>
    %619 = arith.maximumf %611, %618 : vector<8x128xf32>
    %620 = vector.extract_strided_slice %2 {offsets = [2432, 0], sizes = [8, 128], strides = [1, 1]} : vector<2592x128xf32> to vector<8x128xf32>
    %621 = arith.maximumf %613, %620 : vector<8x128xf32>
    %622 = vector.extract_strided_slice %2 {offsets = [2440, 0], sizes = [8, 128], strides = [1, 1]} : vector<2592x128xf32> to vector<8x128xf32>
    %623 = arith.maximumf %615, %622 : vector<8x128xf32>
    %624 = vector.extract_strided_slice %2 {offsets = [2448, 0], sizes = [8, 128], strides = [1, 1]} : vector<2592x128xf32> to vector<8x128xf32>
    %625 = arith.maximumf %617, %624 : vector<8x128xf32>
    %626 = vector.extract_strided_slice %2 {offsets = [2456, 0], sizes = [8, 128], strides = [1, 1]} : vector<2592x128xf32> to vector<8x128xf32>
    %627 = arith.maximumf %619, %626 : vector<8x128xf32>
    %628 = vector.extract_strided_slice %2 {offsets = [2464, 0], sizes = [8, 128], strides = [1, 1]} : vector<2592x128xf32> to vector<8x128xf32>
    %629 = arith.maximumf %621, %628 : vector<8x128xf32>
    %630 = vector.extract_strided_slice %2 {offsets = [2472, 0], sizes = [8, 128], strides = [1, 1]} : vector<2592x128xf32> to vector<8x128xf32>
    %631 = arith.maximumf %623, %630 : vector<8x128xf32>
    %632 = vector.extract_strided_slice %2 {offsets = [2480, 0], sizes = [8, 128], strides = [1, 1]} : vector<2592x128xf32> to vector<8x128xf32>
    %633 = arith.maximumf %625, %632 : vector<8x128xf32>
    %634 = vector.extract_strided_slice %2 {offsets = [2488, 0], sizes = [8, 128], strides = [1, 1]} : vector<2592x128xf32> to vector<8x128xf32>
    %635 = arith.maximumf %627, %634 : vector<8x128xf32>
    %636 = vector.extract_strided_slice %2 {offsets = [2496, 0], sizes = [8, 128], strides = [1, 1]} : vector<2592x128xf32> to vector<8x128xf32>
    %637 = arith.maximumf %629, %636 : vector<8x128xf32>
    %638 = vector.extract_strided_slice %2 {offsets = [2504, 0], sizes = [8, 128], strides = [1, 1]} : vector<2592x128xf32> to vector<8x128xf32>
    %639 = arith.maximumf %631, %638 : vector<8x128xf32>
    %640 = vector.extract_strided_slice %2 {offsets = [2512, 0], sizes = [8, 128], strides = [1, 1]} : vector<2592x128xf32> to vector<8x128xf32>
    %641 = arith.maximumf %633, %640 : vector<8x128xf32>
    %642 = vector.extract_strided_slice %2 {offsets = [2520, 0], sizes = [8, 128], strides = [1, 1]} : vector<2592x128xf32> to vector<8x128xf32>
    %643 = arith.maximumf %635, %642 : vector<8x128xf32>
    %644 = vector.extract_strided_slice %2 {offsets = [2528, 0], sizes = [8, 128], strides = [1, 1]} : vector<2592x128xf32> to vector<8x128xf32>
    %645 = arith.maximumf %637, %644 : vector<8x128xf32>
    %646 = vector.extract_strided_slice %2 {offsets = [2536, 0], sizes = [8, 128], strides = [1, 1]} : vector<2592x128xf32> to vector<8x128xf32>
    %647 = arith.maximumf %639, %646 : vector<8x128xf32>
    %648 = vector.extract_strided_slice %2 {offsets = [2544, 0], sizes = [8, 128], strides = [1, 1]} : vector<2592x128xf32> to vector<8x128xf32>
    %649 = arith.maximumf %641, %648 : vector<8x128xf32>
    %650 = vector.extract_strided_slice %2 {offsets = [2552, 0], sizes = [8, 128], strides = [1, 1]} : vector<2592x128xf32> to vector<8x128xf32>
    %651 = arith.maximumf %643, %650 : vector<8x128xf32>
    %652 = vector.extract_strided_slice %2 {offsets = [2560, 0], sizes = [8, 128], strides = [1, 1]} : vector<2592x128xf32> to vector<8x128xf32>
    %653 = arith.maximumf %645, %652 : vector<8x128xf32>
    %654 = vector.extract_strided_slice %2 {offsets = [2568, 0], sizes = [8, 128], strides = [1, 1]} : vector<2592x128xf32> to vector<8x128xf32>
    %655 = arith.maximumf %647, %654 : vector<8x128xf32>
    %656 = vector.extract_strided_slice %2 {offsets = [2576, 0], sizes = [8, 128], strides = [1, 1]} : vector<2592x128xf32> to vector<8x128xf32>
    %657 = arith.maximumf %649, %656 : vector<8x128xf32>
    %658 = vector.extract_strided_slice %2 {offsets = [2584, 0], sizes = [8, 128], strides = [1, 1]} : vector<2592x128xf32> to vector<8x128xf32>
    %659 = arith.maximumf %651, %658 : vector<8x128xf32>
    %660 = arith.maximumf %659, %653 : vector<8x128xf32>
    %661 = arith.maximumf %655, %657 : vector<8x128xf32>
    %662 = arith.maximumf %660, %661 : vector<8x128xf32>
    %663 = vector.broadcast %3 : vector<1x128xf32> to vector<8x128xf32>
    %664 = arith.addf %662, %663 : vector<8x128xf32>
    %cst_12 = arith.constant 0.000000e+00 : f32
    %665 = vector.broadcast %cst_12 : f32 to vector<8x128xf32>
    %666 = arith.maximumf %664, %665 : vector<8x128xf32>
    %c24 = arith.constant 24 : index
    %c0_13 = arith.constant 0 : index
    %667 = vector.load %arg4[%c24, %c0_13] : memref<32x128xf32, #tpu.memory_space<vmem>>, vector<8x128xf32>
    tpu.vector_store %arg4[%c24, %c0_13], %666 {strides = array<i32>} : memref<32x128xf32, #tpu.memory_space<vmem>>, vector<8x128xf32>,
    return
  }
  func.func @transform_0(%arg0: i32) -> (i32, i32) {
    %c0_i32 = arith.constant 0 : i32
    %c0_i32_0 = arith.constant 0 : i32
    return %arg0, %c0_i32 : i32, i32
  }
  func.func @transform_1(%arg0: i32) -> (i32, i32) {
    %c0_i32 = arith.constant 0 : i32
    %c0_i32_0 = arith.constant 0 : i32
    %c0_i32_1 = arith.constant 0 : i32
    return %c0_i32, %c0_i32_0 : i32, i32
  }
  func.func @transform_2(%arg0: i32) -> (i32, i32) {
    %c0_i32 = arith.constant 0 : i32
    %c0_i32_0 = arith.constant 0 : i32
    %c0_i32_1 = arith.constant 0 : i32
    return %c0_i32, %c0_i32_0 : i32, i32
  }
  func.func @transform_3(%arg0: i32) -> (i32, i32) {
    %c0_i32 = arith.constant 0 : i32
    %c0_i32_0 = arith.constant 0 : i32
    return %arg0, %c0_i32 : i32, i32
  }
}

module attributes {stable_mosaic.version = 11 : i64} {
  func.func @_conv_relu_kernel(%arg0: i32, %arg1: memref<16x128xbf16, #tpu.memory_space<vmem>>, %arg2: memref<128x128xbf16, #tpu.memory_space<vmem>>, %arg3: memref<1x128xf32, #tpu.memory_space<vmem>>, %arg4: memref<16x128xf32, #tpu.memory_space<vmem>>) attributes {dimension_semantics = [#tpu.dimension_semantics<arbitrary>], iteration_bounds = array<i64: 1>, scalar_prefetch = 0 : i64, scratch_operands = 0 : i64, tpu.core_type = #tpu.core_type<tc>, window_params = [{pipeline_mode = #tpu.pipeline_mode<synchronous>, transform_indices = @transform_0, window_bounds = array<i64: 16, 128>}, {pipeline_mode = #tpu.pipeline_mode<synchronous>, transform_indices = @transform_1, window_bounds = array<i64: 128, 128>}, {pipeline_mode = #tpu.pipeline_mode<synchronous>, transform_indices = @transform_2, window_bounds = array<i64: 1, 128>}, {pipeline_mode = #tpu.pipeline_mode<synchronous>, transform_indices = @transform_3, window_bounds = array<i64: 16, 128>}]} {
    %c0 = arith.constant 0 : index
    %c0_0 = arith.constant 0 : index
    %0 = vector.load %arg1[%c0, %c0_0] : memref<16x128xbf16, #tpu.memory_space<vmem>>, vector<16x128xbf16>
    %c0_1 = arith.constant 0 : index
    %c0_2 = arith.constant 0 : index
    %1 = vector.load %arg2[%c0_1, %c0_2] : memref<128x128xbf16, #tpu.memory_space<vmem>>, vector<128x128xbf16>
    %cst = arith.constant dense<0.000000e+00> : vector<16x128xf32>
    %2 = tpu.matmul %0, %1, %cst {dimension_numbers = #tpu.dot_dimension_numbers<[1], [0], [0], [1], [0, 0, 1, 1], [], []>} : vector<16x128xbf16>, vector<128x128xbf16>, vector<16x128xf32> -> vector<16x128xf32>
    %c0_3 = arith.constant 0 : index
    %c0_4 = arith.constant 0 : index
    %3 = vector.load %arg3[%c0_3, %c0_4] : memref<1x128xf32, #tpu.memory_space<vmem>>, vector<1x128xf32>
    %4 = vector.broadcast %3 : vector<1x128xf32> to vector<16x128xf32>
    %5 = arith.addf %2, %4 : vector<16x128xf32>
    %cst_5 = arith.constant 0.000000e+00 : f32
    %6 = vector.broadcast %cst_5 : f32 to vector<16x128xf32>
    %7 = arith.maximumf %5, %6 : vector<16x128xf32>
    %c0_6 = arith.constant 0 : index
    %c0_7 = arith.constant 0 : index
    %8 = vector.load %arg4[%c0_6, %c0_7] : memref<16x128xf32, #tpu.memory_space<vmem>>, vector<16x128xf32>
    tpu.vector_store %arg4[%c0_6, %c0_7], %7 {strides = array<i32>} : memref<16x128xf32, #tpu.memory_space<vmem>>, vector<16x128xf32>,
    return
  }
  func.func @transform_0(%arg0: i32) -> (i32, i32) {
    %c0_i32 = arith.constant 0 : i32
    %c0_i32_0 = arith.constant 0 : i32
    %c0_i32_1 = arith.constant 0 : i32
    return %c0_i32, %c0_i32_0 : i32, i32
  }
  func.func @transform_1(%arg0: i32) -> (i32, i32) {
    %c0_i32 = arith.constant 0 : i32
    %c0_i32_0 = arith.constant 0 : i32
    %c0_i32_1 = arith.constant 0 : i32
    return %c0_i32, %c0_i32_0 : i32, i32
  }
  func.func @transform_2(%arg0: i32) -> (i32, i32) {
    %c0_i32 = arith.constant 0 : i32
    %c0_i32_0 = arith.constant 0 : i32
    %c0_i32_1 = arith.constant 0 : i32
    return %c0_i32, %c0_i32_0 : i32, i32
  }
  func.func @transform_3(%arg0: i32) -> (i32, i32) {
    %c0_i32 = arith.constant 0 : i32
    %c0_i32_0 = arith.constant 0 : i32
    %c0_i32_1 = arith.constant 0 : i32
    return %c0_i32, %c0_i32_0 : i32, i32
  }
}

</mosaic_0001>

<bundles_post_ra>
// kernel: model_tanh_forward.3
= control target key start
LH: loop header
LB: loop body
LE: loop exit
PB: predicated region body
PF: predicated region fallthrough
CT: control target
= control target key end

     0   :  { %v233_v1 = vmov 0.0   ;;  %vm234_vm0 = vmmov 0   ;;  %s300_s0 = inlined_call_operand.vmem [shape: bf16[16,128], index: 0, kind: input, shape index: {}]   ;;  %s301_s1 = inlined_call_operand.vmem [shape: bf16[128,128], index: 1, kind: input, shape index: {}]   ;;  %s302_s2 = inlined_call_operand.vmem [shape: f32[1,128], index: 2, kind: input, shape index: {}]   ;;  %s303_s3 = inlined_call_operand.hbm [shape: f32[16,128], index: 3, kind: output, shape index: {}]  }
   0x1   :  { %v200_v0 = vld [vmem:[%s301_s1] sm:$0xff]   ;;  %175 = vmatprep.subr.bf16.mxu0 %v233_v1  ;;  %v201_v2 = vld [vmem:[%s301_s1 + $0x8] sm:$0xff]   ;;  %191 = vmatprep.mubr.msk.bf16.mxu0 %vm234_vm0, %v233_v1  ;;  %v202_v3 = vld [vmem:[%s301_s1 + $0x10] sm:$0xff]  }
   0x2   :  { %176 = vmatpush3.bf16.msra.mxu0 %v200_v0 }
   0x3   :  { %177 = vmatprep.subr.bf16.mxu0 %v233_v1 }
   0x6   :  { %178 = vmatpush3.bf16.msra.mxu0 %v201_v2 }
   0x7   :  { %179 = vmatprep.subr.bf16.mxu0 %v233_v1 }
   0x8   :  { %8 = vsyncpa [#allocation3], 0  ;;  %v203_v4 = vld [vmem:[%s301_s1 + $0x18] sm:$0xff]   ;;  %v204_v5 = vld [vmem:[%s301_s1 + $0x20] sm:$0xff]   ;;  %s235_s5 = smov [#allocation2]  }
   0x9   :  { %v205_v6 = vld [vmem:[%s301_s1 + $0x28] sm:$0xff]   ;;  %v206_v7 = vld [vmem:[%s301_s1 + $0x30] sm:$0xff]   ;;  %v207_v8 = vld [vmem:[%s301_s1 + $0x38] sm:$0xff]   ;;  %s145_s6 = sshll.u32 %s235_s5, 4  ;;  %s146_s6 = int_to_ptr.vmem [resolvable:$true] %s145_s6 }
   0xa   :  { %180 = vmatpush3.bf16.msra.mxu0 %v202_v3  ;;  %v208_v9 = vld [vmem:[%s300_s0] sm:$0xff]   ;;  %s209_s0 = scalar_lea.vmem %s146_s6, 256  ;;  %p214_p1 = scmp.lt.s32.totalorder %s146_s6, %s146_s6 }
   0xb   :  { %181 = vmatprep.subr.bf16.mxu0 %v233_v1  ;;  %v156_v10 = vld [vmem:[%s302_s2] ss:$0 sm:$0xff]  ;;  %p210_p0 = scmp.ne.s32.totalorder %s146_s6, %s209_s0  ;;  %p215_p2 = scmp.lt.s32.totalorder %s209_s0, %s209_s0 }
   0xd   :  { %p216_p3 = por %p215_p2, %p214_p1 }
   0xe   :  { %182 = vmatpush3.bf16.msra.mxu0 %v203_v4 }
   0xf   :  { %183 = vmatprep.subr.bf16.mxu0 %v233_v1  ;;  %p217_p4 = pnand %p216_p3, %p210_p0 }
  0x12   :  { %184 = vmatpush3.bf16.msra.mxu0 %v204_v5 }
  0x13   :  { %185 = vmatprep.subr.bf16.mxu0 %v233_v1 }
  0x16   :  { %186 = vmatpush3.bf16.msra.mxu0 %v205_v6 }
  0x17   :  { %187 = vmatprep.subr.bf16.mxu0 %v233_v1 }
  0x1a   :  { %188 = vmatpush3.bf16.msra.mxu0 %v206_v7 }
  0x1b   :  { %189 = vmatprep.subr.bf16.mxu0 %v233_v1 }
  0x1e   :  { %190 = vmatpush3.bf16.msra.mxu0 %v207_v8 }
  0x21   :  { %192 = vmatmul.mubr.bf16.vlgmr.msra.gmra.mrb[0].mxu0 %v208_v9 }
  0xf4   :  { %v129_v11 = vpop.f32.mrb[0].mxu0 }
  0xf5   :  { %v130_v12 = vadd.f32 %v156_v10, %v129_v11  ;;  %v193_v13 = vpop.f32.mrb[1].mxu0 }
  0xf6   :  { %v132_v14 = vpop.f32.mrb[2].mxu0 }
  0xf7   :  { %v136_v15 = vmax.f32 %v130_v12, 0.0  ;;  %v133_v16 = vadd.f32 %v156_v10, %v132_v14  ;;  %v194_v17 = vpop.f32.mrb[3].mxu0 }
  0xf9   :  { %138 = vst [vmem:[#allocation2] sm:$0xff] %v136_v15  ;;  %v137_v18 = vmax.f32 %v133_v16, 0.0 }
  0xfb   :  { %139 = vst [vmem:[#allocation2 + $0x8] sm:$0xff] %v137_v18 }
  0xfc   :  { %220 = shalt.err (!%p217_p4)
}
  0xfd   :  { %s221_s7 = scalar_lea.hbm %s303_s3, 256 }
  0xfe   :  { %p222_p5 = scmp.ne.s32.totalorder %s303_s3, %s221_s7  ;;  %p225_p6 = scmp.lt.u32.totalorder %s221_s7, %s303_s3 }
 0x100   :  { %p227_p7 = pnand %p225_p6, %p222_p5 }
 0x102   :  { %230 = shalt.err (!%p227_p7)
}
 0x103   :  { %s236_s12 = smov 128   ;;  %s237_s13 = smov 8  }
 0x104   :  { %151 = dma.vmem_to_hbm [thread:$0]  %s146_s6, 256, %s303_s3, [#allocation3], %s236_s12, %s236_s12, %s237_s13  }
 0x105   :  { %231 = dma.done.wait [#allocation3], 256  }
 0x106   :  { %232 = vsyncadd [#allocation3], 4294967040 }
 0x107   :  { %155 = vsyncpa [#allocation3], 1 }

// kernel: model_tanh_forward.2
= control target key start
LH: loop header
LB: loop body
LE: loop exit
PB: predicated region body
PF: predicated region fallthrough
CT: control target
= control target key end

     0   :  { %s4900_s12 = smov 0   ;;  %s5648_s0 = inlined_call_operand.vmem [shape: bf16[5184,256], index: 0, kind: input, shape index: {}]   ;;  %s5649_s1 = inlined_call_operand.vmem [shape: bf16[256,128], index: 1, kind: input, shape index: {}]   ;;  %s5650_s2 = inlined_call_operand.vmem [shape: f32[1,128], index: 2, kind: input, shape index: {}]   ;;  %s5651_s3 = inlined_call_operand.vmem [shape: f32[64,128], index: 3, kind: output, shape index: {}]  }
   0x1 LB: > { %s3974_s13 = sadd.s32 4294967295, %s4877_s12   ;;  %p3978_p0 = scmp.ge.s32.totalorder %s4877_s12, 1  ;;  %s4877_s12 = sphi %s4900_s12, %s13_s12  }
   0x2   : > { %p139_p1 = scmp.lt.s32.totalorder %s4877_s12, 3 }
   0x4   : > { %p140_p2 = pnand %p3978_p0, %p139_p1 }
   0x5   : > { %v4368_v0 = vld [vmem:[%s5649_s1] sm:$0xff] (!%p140_p2)   ;;  %v4879_v1 = vmov (!%p140_p2), 0   ;;  %s164_s16 = smul.u32 (!%p140_p2), 324, %s3974_s13  ;;  %v4369_v2 = vld [vmem:[%s5649_s1 + $0x8] sm:$0xff] (!%p140_p2)   ;;  %v4370_v3 = vld [vmem:[%s5649_s1 + $0x10] sm:$0xff] (!%p140_p2)   ;;  %s3981_s26 = sshll.u32 (!%p140_p2), %s3974_s13, 2 }
   0x6   : > { %143 = sbr.rel (%p140_p2) target bundleno = 935 (0x3a7), region = 32  ;;  %2250 = vmatprep.subr.bf16.mxu0 (!%p140_p2), %v4879_v1  ;;  %4327 = vmatprep.subr.bf16.mxu1 (!%p140_p2), %v4879_v1  ;;  %v4371_v4 = vld [vmem:[%s5649_s1 + $0x18] sm:$0xff] (!%p140_p2)   ;;  %v4372_v5 = vld [vmem:[%s5649_s1 + $0x20] sm:$0xff] (!%p140_p2)   ;;  %v4373_v7 = vld [vmem:[%s5649_s1 + $0x28] sm:$0xff] (!%p140_p2)   ;;  %p172_p4 = scmp.lt.s32.totalorder (!%p140_p2), %s3981_s26, 7 }
   0x7   : > { %2251 = vmatpush1.bf16.msra.mxu0 (!%p140_p2), %v4368_v0  ;;  %4343 = vmatpush1.bf16.msra.mxu1 (!%p140_p2), %v4368_v0  ;;  %p165_p3 = scmp.lt.s32.totalorder (!%p140_p2), %s164_s16, 647  ;;  %v4374_v9 = vld [vmem:[%s5649_s1 + $0x30] sm:$0xff] (!%p140_p2)   ;;  %v4375_v10 = vld [vmem:[%s5649_s1 + $0x38] sm:$0xff] (!%p140_p2)   ;;  %v4376_v11 = vld [vmem:[%s5649_s1 + $0x40] sm:$0xff] (!%p140_p2)  }
   0x8   : > { %2252 = vmatprep.subr.bf16.mxu0 (!%p140_p2), %v4879_v1  ;;  %4328 = vmatprep.subr.bf16.mxu1 (!%p140_p2), %v4879_v1  ;;  %v4377_v12 = vld [vmem:[%s5649_s1 + $0x48] sm:$0xff] (!%p140_p2)   ;;  %v4378_v13 = vld [vmem:[%s5649_s1 + $0x50] sm:$0xff] (!%p140_p2)   ;;  %v4379_v14 = vld [vmem:[%s5649_s1 + $0x58] sm:$0xff] (!%p140_p2)  }
   0x9   : > { %v4380_v15 = vld [vmem:[%s5649_s1 + $0x60] sm:$0xff] (!%p140_p2)   ;;  %v4381_v16 = vld [vmem:[%s5649_s1 + $0x68] sm:$0xff] (!%p140_p2)   ;;  %v4382_v17 = vld [vmem:[%s5649_s1 + $0x70] sm:$0xff] (!%p140_p2)  }
   0xa   : > { %v4383_v18 = vld [vmem:[%s5649_s1 + $0x78] sm:$0xff] (!%p140_p2)  }
   0xb   : > { %2253 = vmatpush1.bf16.msra.mxu0 (!%p140_p2), %v4369_v2  ;;  %4344 = vmatpush1.bf16.msra.mxu1 (!%p140_p2), %v4369_v2 }
   0xc   : > { %2254 = vmatprep.subr.bf16.mxu0 (!%p140_p2), %v4879_v1  ;;  %4329 = vmatprep.subr.bf16.mxu1 (!%p140_p2), %v4879_v1 }
   0xd   : > { %s5653_s16 = smov (!%p165_p3, %s164_s16), 647  ;;  %s5655_s26 = smov (!%p172_p4, %s3981_s26), 7 }
   0xe   : > { %s4326_s23 = sshll.u32 %s5653_s16, 3  ;;  %s3982_s29 = sshll.u32 %s5655_s26, 3 }
   0xf   : > { %2255 = vmatpush1.bf16.msra.mxu0 %v4370_v3  ;;  %4345 = vmatpush1.bf16.msra.mxu1 %v4370_v3  ;;  %s4936_s28 = scalar_lea.vmem %s5648_s0, %s4326_s23  ;;  %s5515_s5 = scalar_lea.vmem %s5651_s3, %s3982_s29 }
  0x10   : > { %2256 = vmatprep.subr.bf16.mxu0 %v4879_v1  ;;  %4330 = vmatprep.subr.bf16.mxu1 %v4879_v1  ;;  %v4386_v6 = vld [vmem:[%s4936_s28 + $0x4] ss:$8 sps:$4 sm:$0xff]   ;;  %v4389_v8 = vld [vmem:[%s4936_s28 + $0x514] ss:$8 sps:$4 sm:$0xff]   ;;  %v4384_v19 = vld [vmem:[%s4936_s28] ss:$8 sps:$4 sm:$0xff]  }
  0x11   : > { %2282 = vmatprep.mubr.bf16.mxu0 %v4386_v6  ;;  %2930 = vmatprep.mubr.bf16.mxu1 %v4389_v8  ;;  %v4387_v20 = vld [vmem:[%s4936_s28 + $0x510] ss:$8 sps:$4 sm:$0xff]   ;;  %v4390_v21 = vld [vmem:[%s4936_s28 + $0x14] ss:$8 sps:$4 sm:$0xff]   ;;  %v4392_v22 = vld [vmem:[%s4936_s28 + $0x524] ss:$8 sps:$4 sm:$0xff]  }
  0x12   : > { %v4394_v23 = vld [vmem:[%s4936_s28 + $0x10] ss:$8 sps:$4 sm:$0xff]   ;;  %v4395_v24 = vld [vmem:[%s4936_s28 + $0x520] ss:$8 sps:$4 sm:$0xff]   ;;  %v4396_v25 = vld [vmem:[%s4936_s28 + $0x24] ss:$8 sps:$4 sm:$0xff]  }
  0x13   : > { %2257 = vmatpush1.bf16.msra.mxu0 %v4371_v4  ;;  %4346 = vmatpush1.bf16.msra.mxu1 %v4371_v4  ;;  %v4398_v26 = vld [vmem:[%s4936_s28 + $0x534] ss:$8 sps:$4 sm:$0xff]   ;;  %v4400_v27 = vld [vmem:[%s4936_s28 + $0x20] ss:$8 sps:$4 sm:$0xff]   ;;  %v4401_v28 = vld [vmem:[%s4936_s28 + $0x530] ss:$8 sps:$4 sm:$0xff]  }
  0x14   : > { %2258 = vmatprep.subr.bf16.mxu0 %v4879_v1  ;;  %4331 = vmatprep.subr.bf16.mxu1 %v4879_v1  ;;  %v4402_v29 = vld [vmem:[%s4936_s28 + $0x34] ss:$8 sps:$4 sm:$0xff]   ;;  %v4404_v30 = vld [vmem:[%s4936_s28 + $0x544] ss:$8 sps:$4 sm:$0xff]   ;;  %v4406_v31 = vld [vmem:[%s4936_s28 + $0x30] ss:$8 sps:$4 sm:$0xff]  }
  0x15   : > { %v4407_v32 = vld [vmem:[%s4936_s28 + $0x540] ss:$8 sps:$4 sm:$0xff]   ;;  %v4408_v33 = vld [vmem:[%s4936_s28 + $0x44] ss:$8 sps:$4 sm:$0xff]   ;;  %v4410_v34 = vld [vmem:[%s4936_s28 + $0x554] ss:$8 sps:$4 sm:$0xff]  }
  0x16   : > { %v4412_v35 = vld [vmem:[%s4936_s28 + $0x40] ss:$8 sps:$4 sm:$0xff]   ;;  %v4413_v36 = vld [vmem:[%s4936_s28 + $0x550] ss:$8 sps:$4 sm:$0xff]   ;;  %v4414_v37 = vld [vmem:[%s4936_s28 + $0x54] ss:$8 sps:$4 sm:$0xff]  }
  0x17   : > { %2259 = vmatpush1.bf16.msra.mxu0 %v4372_v5  ;;  %4347 = vmatpush1.bf16.msra.mxu1 %v4372_v5  ;;  %v4416_v38 = vld [vmem:[%s4936_s28 + $0x564] ss:$8 sps:$4 sm:$0xff]   ;;  %v4418_v39 = vld [vmem:[%s4936_s28 + $0x50] ss:$8 sps:$4 sm:$0xff]   ;;  %v4419_v40 = vld [vmem:[%s4936_s28 + $0x560] ss:$8 sps:$4 sm:$0xff]  }
  0x18   : > { %2260 = vmatprep.subr.bf16.mxu0 %v4879_v1  ;;  %4332 = vmatprep.subr.bf16.mxu1 %v4879_v1  ;;  %v4420_v41 = vld [vmem:[%s4936_s28 + $0x64] ss:$8 sps:$4 sm:$0xff]   ;;  %v4422_v42 = vld [vmem:[%s4936_s28 + $0x574] ss:$8 sps:$4 sm:$0xff]   ;;  %v4424_v43 = vld [vmem:[%s4936_s28 + $0x60] ss:$8 sps:$4 sm:$0xff]  }
  0x19   : > { %v4425_v44 = vld [vmem:[%s4936_s28 + $0x570] ss:$8 sps:$4 sm:$0xff]   ;;  %v4426_v45 = vld [vmem:[%s4936_s28 + $0x74] ss:$8 sps:$4 sm:$0xff]   ;;  %v4428_v46 = vld [vmem:[%s4936_s28 + $0x584] ss:$8 sps:$4 sm:$0xff]  }
  0x1a   : > { %v4430_v47 = vld [vmem:[%s4936_s28 + $0x70] ss:$8 sps:$4 sm:$0xff]   ;;  %v4431_v48 = vld [vmem:[%s4936_s28 + $0x580] ss:$8 sps:$4 sm:$0xff]   ;;  %v4432_v49 = vld [vmem:[%s4936_s28 + $0x84] ss:$8 sps:$4 sm:$0xff]  }
  0x1b   : > { %2261 = vmatpush1.bf16.msra.mxu0 %v4373_v7  ;;  %4348 = vmatpush1.bf16.msra.mxu1 %v4373_v7  ;;  %v4434_v50 = vld [vmem:[%s4936_s28 + $0x594] ss:$8 sps:$4 sm:$0xff]   ;;  %v4436_v51 = vld [vmem:[%s4936_s28 + $0x80] ss:$8 sps:$4 sm:$0xff]   ;;  %v4437_v52 = vld [vmem:[%s4936_s28 + $0x590] ss:$8 sps:$4 sm:$0xff]  }
  0x1c   : > { %2262 = vmatprep.subr.bf16.mxu0 %v4879_v1  ;;  %4333 = vmatprep.subr.bf16.mxu1 %v4879_v1  ;;  %v4438_v53 = vld [vmem:[%s4936_s28 + $0x94] ss:$8 sps:$4 sm:$0xff]   ;;  %v4440_v54 = vld [vmem:[%s4936_s28 + $0x5a4] ss:$8 sps:$4 sm:$0xff]   ;;  %v4442_v55 = vld [vmem:[%s4936_s28 + $0x90] ss:$8 sps:$4 sm:$0xff]  }
  0x1d   : > { %v4443_v56 = vld [vmem:[%s4936_s28 + $0x5a0] ss:$8 sps:$4 sm:$0xff]   ;;  %v4444_v57 = vld [vmem:[%s4936_s28 + $0xa4] ss:$8 sps:$4 sm:$0xff]   ;;  %v4446_v58 = vld [vmem:[%s4936_s28 + $0x5b4] ss:$8 sps:$4 sm:$0xff]  }
  0x1e   : > { %v4448_v59 = vld [vmem:[%s4936_s28 + $0xa0] ss:$8 sps:$4 sm:$0xff]   ;;  %v4449_v60 = vld [vmem:[%s4936_s28 + $0x5b0] ss:$8 sps:$4 sm:$0xff]   ;;  %v4450_v61 = vld [vmem:[%s4936_s28 + $0xb4] ss:$8 sps:$4 sm:$0xff]  }
  0x1f   : > { %2263 = vmatpush1.bf16.msra.mxu0 %v4374_v9  ;;  %4349 = vmatpush1.bf16.msra.mxu1 %v4374_v9  ;;  %v4452_v62 = vld [vmem:[%s4936_s28 + $0x5c4] ss:$8 sps:$4 sm:$0xff]   ;;  %v4454_v63 = vld [vmem:[%s4936_s28 + $0xb0] ss:$8 sps:$4 sm:$0xff]   ;;  %v4455_v0 = vld [vmem:[%s4936_s28 + $0x5c0] ss:$8 sps:$4 sm:$0xff]  }
  0x20   : > { %2264 = vmatprep.subr.bf16.mxu0 %v4879_v1  ;;  %4334 = vmatprep.subr.bf16.mxu1 %v4879_v1  ;;  %v4458_v2 = vld [vmem:[%s4936_s28 + $0x5d4] ss:$8 sps:$4 sm:$0xff]   ;;  %v4460_v3 = vld [vmem:[%s4936_s28 + $0xc0] ss:$8 sps:$4 sm:$0xff]   ;;  %v4461_v4 = vld [vmem:[%s4936_s28 + $0x5d0] ss:$8 sps:$4 sm:$0xff]  }
  0x21   : > { %v4462_v5 = vld [vmem:[%s4936_s28 + $0xd4] ss:$8 sps:$4 sm:$0xff]   ;;  %v4464_v6 = vld [vmem:[%s4936_s28 + $0x5e4] ss:$8 sps:$4 sm:$0xff]   ;;  %v4466_v7 = vld [vmem:[%s4936_s28 + $0xd0] ss:$8 sps:$4 sm:$0xff]  }
  0x22   : > { %v4467_v8 = vld [vmem:[%s4936_s28 + $0x5e0] ss:$8 sps:$4 sm:$0xff]   ;;  %v4468_v9 = vld [vmem:[%s4936_s28 + $0xe4] ss:$8 sps:$4 sm:$0xff]  }
  0x23   : > { %2265 = vmatpush1.bf16.msra.mxu0 %v4375_v10  ;;  %4350 = vmatpush1.bf16.msra.mxu1 %v4375_v10  ;;  %v4470_v10 = vld [vmem:[%s4936_s28 + $0x5f4] ss:$8 sps:$4 sm:$0xff]  }
  0x24   : > { %2266 = vmatprep.subr.bf16.mxu0 %v4879_v1  ;;  %4335 = vmatprep.subr.bf16.mxu1 %v4879_v1 }
  0x27   : > { %2267 = vmatpush1.bf16.msra.mxu0 %v4376_v11  ;;  %4351 = vmatpush1.bf16.msra.mxu1 %v4376_v11  ;;  %v4472_v11 = vld [vmem:[%s4936_s28 + $0xe0] ss:$8 sps:$4 sm:$0xff]  }
  0x28   : > { %2268 = vmatprep.subr.bf16.mxu0 %v4879_v1  ;;  %4336 = vmatprep.subr.bf16.mxu1 %v4879_v1 }
  0x2b   : > { %2269 = vmatpush1.bf16.msra.mxu0 %v4377_v12  ;;  %4352 = vmatpush1.bf16.msra.mxu1 %v4377_v12  ;;  %v4473_v12 = vld [vmem:[%s4936_s28 + $0x5f0] ss:$8 sps:$4 sm:$0xff]  }
  0x2c   : > { %2270 = vmatprep.subr.bf16.mxu0 %v4879_v1  ;;  %4337 = vmatprep.subr.bf16.mxu1 %v4879_v1 }
  0x2f   : > { %2271 = vmatpush1.bf16.msra.mxu0 %v4378_v13  ;;  %4353 = vmatpush1.bf16.msra.mxu1 %v4378_v13  ;;  %v4474_v13 = vld [vmem:[%s4936_s28 + $0xf4] ss:$8 sps:$4 sm:$0xff]  }
  0x30   : > { %2272 = vmatprep.subr.bf16.mxu0 %v4879_v1  ;;  %4338 = vmatprep.subr.bf16.mxu1 %v4879_v1 }
  0x33   : > { %2273 = vmatpush1.bf16.msra.mxu0 %v4379_v14  ;;  %4354 = vmatpush1.bf16.msra.mxu1 %v4379_v14  ;;  %v4476_v14 = vld [vmem:[%s4936_s28 + $0x604] ss:$8 sps:$4 sm:$0xff]  }
  0x34   : > { %2274 = vmatprep.subr.bf16.mxu0 %v4879_v1  ;;  %4339 = vmatprep.subr.bf16.mxu1 %v4879_v1 }
  0x37   : > { %2275 = vmatpush1.bf16.msra.mxu0 %v4380_v15  ;;  %4355 = vmatpush1.bf16.msra.mxu1 %v4380_v15  ;;  %v4478_v15 = vld [vmem:[%s4936_s28 + $0xf0] ss:$8 sps:$4 sm:$0xff]  }
  0x38   : > { %2276 = vmatprep.subr.bf16.mxu0 %v4879_v1  ;;  %4340 = vmatprep.subr.bf16.mxu1 %v4879_v1 }
  0x3b   : > { %2277 = vmatpush1.bf16.msra.mxu0 %v4381_v16  ;;  %4356 = vmatpush1.bf16.msra.mxu1 %v4381_v16  ;;  %v4479_v16 = vld [vmem:[%s4936_s28 + $0x600] ss:$8 sps:$4 sm:$0xff]  }
  0x3c   : > { %2278 = vmatprep.subr.bf16.mxu0 %v4879_v1  ;;  %4341 = vmatprep.subr.bf16.mxu1 %v4879_v1 }
  0x3f   : > { %2279 = vmatpush1.bf16.msra.mxu0 %v4382_v17  ;;  %4357 = vmatpush1.bf16.msra.mxu1 %v4382_v17  ;;  %v4480_v17 = vld [vmem:[%s4936_s28 + $0x104] ss:$8 sps:$4 sm:$0xff]  }
  0x40   : > { %2280 = vmatprep.subr.bf16.mxu0 %v4879_v1  ;;  %4342 = vmatprep.subr.bf16.mxu1 %v4879_v1  ;;  %v4456_v1 = vld [vmem:[%s4936_s28 + $0xc4] ss:$8 sps:$4 sm:$0xff]  }
  0x43   : > { %2281 = vmatpush1.bf16.msra.mxu0 %v4383_v18  ;;  %4358 = vmatpush1.bf16.msra.mxu1 %v4383_v18  ;;  %v4482_v18 = vld [vmem:[%s4936_s28 + $0x614] ss:$8 sps:$4 sm:$0xff]  }
  0x46   : > { %2283 = vmatmul.mubr.bf16.vlgmr.msra.gmra.mrb[0].mxu0 %v4384_v19  ;;  %2931 = vmatmul.mubr.bf16.vlgmr.msra.gmra.mrb[0].mxu1 %v4387_v20  ;;  %v4484_v19 = vld [vmem:[%s4936_s28 + $0x100] ss:$8 sps:$4 sm:$0xff]   ;;  %v4485_v20 = vld [vmem:[%s4936_s28 + $0x610] ss:$8 sps:$4 sm:$0xff]  }
  0x47   : > { %2290 = vmatprep.mubr.bf16.mxu0 %v4390_v21  ;;  %2938 = vmatprep.mubr.bf16.mxu1 %v4392_v22  ;;  %v4486_v21 = vld [vmem:[%s4936_s28 + $0x114] ss:$8 sps:$4 sm:$0xff]   ;;  %v4488_v22 = vld [vmem:[%s4936_s28 + $0x624] ss:$8 sps:$4 sm:$0xff]  }
  0x4e   : > { %2291 = vmatmul.mubr.bf16.gmra.mrb[4].mxu0 %v4394_v23  ;;  %2939 = vmatmul.mubr.bf16.gmra.mrb[4].mxu1 %v4395_v24  ;;  %v4490_v23 = vld [vmem:[%s4936_s28 + $0x110] ss:$8 sps:$4 sm:$0xff]   ;;  %v4491_v24 = vld [vmem:[%s4936_s28 + $0x620] ss:$8 sps:$4 sm:$0xff]  }
  0x4f   : > { %2298 = vmatprep.mubr.bf16.mxu0 %v4396_v25  ;;  %2946 = vmatprep.mubr.bf16.mxu1 %v4398_v26  ;;  %v4492_v25 = vld [vmem:[%s4936_s28 + $0x124] ss:$8 sps:$4 sm:$0xff]   ;;  %v4494_v26 = vld [vmem:[%s4936_s28 + $0x634] ss:$8 sps:$4 sm:$0xff]  }
  0x56   : > { %2299 = vmatmul.mubr.bf16.gmra.mrb[8].mxu0 %v4400_v27  ;;  %2947 = vmatmul.mubr.bf16.gmra.mrb[8].mxu1 %v4401_v28  ;;  %v4496_v27 = vld [vmem:[%s4936_s28 + $0x120] ss:$8 sps:$4 sm:$0xff]   ;;  %v4497_v28 = vld [vmem:[%s4936_s28 + $0x630] ss:$8 sps:$4 sm:$0xff]  }
  0x57   : > { %2306 = vmatprep.mubr.bf16.mxu0 %v4402_v29  ;;  %2954 = vmatprep.mubr.bf16.mxu1 %v4404_v30  ;;  %v4498_v29 = vld [vmem:[%s4936_s28 + $0x134] ss:$8 sps:$4 sm:$0xff]   ;;  %v4500_v30 = vld [vmem:[%s4936_s28 + $0x644] ss:$8 sps:$4 sm:$0xff]  }
  0x5e   : > { %2307 = vmatmul.mubr.bf16.gmra.mrb[12].mxu0 %v4406_v31  ;;  %2955 = vmatmul.mubr.bf16.gmra.mrb[12].mxu1 %v4407_v32  ;;  %v4502_v31 = vld [vmem:[%s4936_s28 + $0x130] ss:$8 sps:$4 sm:$0xff]   ;;  %v4503_v32 = vld [vmem:[%s4936_s28 + $0x640] ss:$8 sps:$4 sm:$0xff]  }
  0x5f   : > { %2314 = vmatprep.mubr.bf16.mxu0 %v4408_v33  ;;  %2962 = vmatprep.mubr.bf16.mxu1 %v4410_v34  ;;  %v4504_v33 = vld [vmem:[%s4936_s28 + $0x144] ss:$8 sps:$4 sm:$0xff]   ;;  %v4506_v34 = vld [vmem:[%s4936_s28 + $0x654] ss:$8 sps:$4 sm:$0xff]  }
  0x66   : > { %2315 = vmatmul.mubr.bf16.gmra.mrb[16].mxu0 %v4412_v35  ;;  %2963 = vmatmul.mubr.bf16.gmra.mrb[16].mxu1 %v4413_v36  ;;  %v4508_v35 = vld [vmem:[%s4936_s28 + $0x140] ss:$8 sps:$4 sm:$0xff]   ;;  %v4509_v36 = vld [vmem:[%s4936_s28 + $0x650] ss:$8 sps:$4 sm:$0xff]  }
  0x67   : > { %2322 = vmatprep.mubr.bf16.mxu0 %v4414_v37  ;;  %2970 = vmatprep.mubr.bf16.mxu1 %v4416_v38  ;;  %v4510_v37 = vld [vmem:[%s4936_s28 + $0x154] ss:$8 sps:$4 sm:$0xff]   ;;  %v4512_v38 = vld [vmem:[%s4936_s28 + $0x664] ss:$8 sps:$4 sm:$0xff]  }
  0x6e   : > { %2323 = vmatmul.mubr.bf16.gmra.mrb[20].mxu0 %v4418_v39  ;;  %2971 = vmatmul.mubr.bf16.gmra.mrb[20].mxu1 %v4419_v40  ;;  %v4514_v39 = vld [vmem:[%s4936_s28 + $0x150] ss:$8 sps:$4 sm:$0xff]   ;;  %v4515_v40 = vld [vmem:[%s4936_s28 + $0x660] ss:$8 sps:$4 sm:$0xff]  }
  0x6f   : > { %2330 = vmatprep.mubr.bf16.mxu0 %v4420_v41  ;;  %2978 = vmatprep.mubr.bf16.mxu1 %v4422_v42  ;;  %v4516_v41 = vld [vmem:[%s4936_s28 + $0x164] ss:$8 sps:$4 sm:$0xff]   ;;  %v4518_v42 = vld [vmem:[%s4936_s28 + $0x674] ss:$8 sps:$4 sm:$0xff]  }
  0x76   : > { %2331 = vmatmul.mubr.bf16.gmra.mrb[24].mxu0 %v4424_v43  ;;  %2979 = vmatmul.mubr.bf16.gmra.mrb[24].mxu1 %v4425_v44  ;;  %v4520_v43 = vld [vmem:[%s4936_s28 + $0x160] ss:$8 sps:$4 sm:$0xff]   ;;  %v4521_v44 = vld [vmem:[%s4936_s28 + $0x670] ss:$8 sps:$4 sm:$0xff]  }
  0x77   : > { %2338 = vmatprep.mubr.bf16.mxu0 %v4426_v45  ;;  %2986 = vmatprep.mubr.bf16.mxu1 %v4428_v46  ;;  %v4522_v45 = vld [vmem:[%s4936_s28 + $0x174] ss:$8 sps:$4 sm:$0xff]   ;;  %v4524_v46 = vld [vmem:[%s4936_s28 + $0x684] ss:$8 sps:$4 sm:$0xff]  }
  0x7e   : > { %2339 = vmatmul.mubr.bf16.gmra.mrb[28].mxu0 %v4430_v47  ;;  %2987 = vmatmul.mubr.bf16.gmra.mrb[28].mxu1 %v4431_v48  ;;  %v4526_v47 = vld [vmem:[%s4936_s28 + $0x170] ss:$8 sps:$4 sm:$0xff]   ;;  %v4527_v48 = vld [vmem:[%s4936_s28 + $0x680] ss:$8 sps:$4 sm:$0xff]  }
  0x7f   : > { %2346 = vmatprep.mubr.bf16.mxu0 %v4432_v49  ;;  %2994 = vmatprep.mubr.bf16.mxu1 %v4434_v50  ;;  %v4528_v49 = vld [vmem:[%s4936_s28 + $0x184] ss:$8 sps:$4 sm:$0xff]   ;;  %v4530_v50 = vld [vmem:[%s4936_s28 + $0x694] ss:$8 sps:$4 sm:$0xff]  }
  0x86   : > { %2347 = vmatmul.mubr.bf16.gmra.mrb[32].mxu0 %v4436_v51  ;;  %2995 = vmatmul.mubr.bf16.gmra.mrb[32].mxu1 %v4437_v52  ;;  %v4532_v51 = vld [vmem:[%s4936_s28 + $0x180] ss:$8 sps:$4 sm:$0xff]   ;;  %v4533_v52 = vld [vmem:[%s4936_s28 + $0x690] ss:$8 sps:$4 sm:$0xff]  }
  0x87   : > { %2354 = vmatprep.mubr.bf16.mxu0 %v4438_v53  ;;  %3002 = vmatprep.mubr.bf16.mxu1 %v4440_v54  ;;  %v4534_v53 = vld [vmem:[%s4936_s28 + $0x194] ss:$8 sps:$4 sm:$0xff]   ;;  %v4536_v54 = vld [vmem:[%s4936_s28 + $0x6a4] ss:$8 sps:$4 sm:$0xff]  }
  0x8e   : > { %2355 = vmatmul.mubr.bf16.gmra.mrb[36].mxu0 %v4442_v55  ;;  %3003 = vmatmul.mubr.bf16.gmra.mrb[36].mxu1 %v4443_v56  ;;  %v4538_v55 = vld [vmem:[%s4936_s28 + $0x190] ss:$8 sps:$4 sm:$0xff]   ;;  %v4539_v56 = vld [vmem:[%s4936_s28 + $0x6a0] ss:$8 sps:$4 sm:$0xff]  }
  0x8f   : > { %2362 = vmatprep.mubr.bf16.mxu0 %v4444_v57  ;;  %3010 = vmatprep.mubr.bf16.mxu1 %v4446_v58  ;;  %v4540_v57 = vld [vmem:[%s4936_s28 + $0x1a4] ss:$8 sps:$4 sm:$0xff]   ;;  %v4542_v58 = vld [vmem:[%s4936_s28 + $0x6b4] ss:$8 sps:$4 sm:$0xff]  }
  0x96   : > { %2363 = vmatmul.mubr.bf16.gmra.mrb[40].mxu0 %v4448_v59  ;;  %3011 = vmatmul.mubr.bf16.gmra.mrb[40].mxu1 %v4449_v60  ;;  %v4544_v59 = vld [vmem:[%s4936_s28 + $0x1a0] ss:$8 sps:$4 sm:$0xff]   ;;  %v4545_v60 = vld [vmem:[%s4936_s28 + $0x6b0] ss:$8 sps:$4 sm:$0xff]  }
  0x97   : > { %2370 = vmatprep.mubr.bf16.mxu0 %v4450_v61  ;;  %3018 = vmatprep.mubr.bf16.mxu1 %v4452_v62  ;;  %v4546_v61 = vld [vmem:[%s4936_s28 + $0x1b4] ss:$8 sps:$4 sm:$0xff]   ;;  %v4548_v62 = vld [vmem:[%s4936_s28 + $0x6c4] ss:$8 sps:$4 sm:$0xff]  }
  0x9e   : > { %2371 = vmatmul.mubr.bf16.gmra.mrb[44].mxu0 %v4454_v63  ;;  %3019 = vmatmul.mubr.bf16.gmra.mrb[44].mxu1 %v4455_v0 }
  0x9f   : > { %2378 = vmatprep.mubr.bf16.mxu0 %v4456_v1  ;;  %3026 = vmatprep.mubr.bf16.mxu1 %v4458_v2 }
  0xa6   : > { %2379 = vmatmul.mubr.bf16.gmra.mrb[48].mxu0 %v4460_v3  ;;  %3027 = vmatmul.mubr.bf16.gmra.mrb[48].mxu1 %v4461_v4  ;;  %v4550_v3 = vld [vmem:[%s4936_s28 + $0x1b0] ss:$8 sps:$4 sm:$0xff]   ;;  %v4551_v4 = vld [vmem:[%s4936_s28 + $0x6c0] ss:$8 sps:$4 sm:$0xff]  }
  0xa7   : > { %2386 = vmatprep.mubr.bf16.mxu0 %v4462_v5  ;;  %3034 = vmatprep.mubr.bf16.mxu1 %v4464_v6 }
  0xae   : > { %2387 = vmatmul.mubr.bf16.gmra.mrb[52].mxu0 %v4466_v7  ;;  %3035 = vmatmul.mubr.bf16.gmra.mrb[52].mxu1 %v4467_v8  ;;  %v4552_v7 = vld [vmem:[%s4936_s28 + $0x1c4] ss:$8 sps:$4 sm:$0xff]   ;;  %v4554_v8 = vld [vmem:[%s4936_s28 + $0x6d4] ss:$8 sps:$4 sm:$0xff]  }
  0xaf   : > { %2394 = vmatprep.mubr.bf16.mxu0 %v4468_v9  ;;  %3042 = vmatprep.mubr.bf16.mxu1 %v4470_v10 }
  0xb6   : > { %2395 = vmatmul.mubr.bf16.gmra.mrb[56].mxu0 %v4472_v11  ;;  %3043 = vmatmul.mubr.bf16.gmra.mrb[56].mxu1 %v4473_v12 }
  0xb7   : > { %2402 = vmatprep.mubr.bf16.mxu0 %v4474_v13  ;;  %3050 = vmatprep.mubr.bf16.mxu1 %v4476_v14 }
  0xbe   : > { %2403 = vmatmul.mubr.bf16.gmra.mrb[60].mxu0 %v4478_v15  ;;  %3051 = vmatmul.mubr.bf16.gmra.mrb[60].mxu1 %v4479_v16  ;;  %v4556_v15 = vld [vmem:[%s4936_s28 + $0x1c0] ss:$8 sps:$4 sm:$0xff]   ;;  %v4557_v16 = vld [vmem:[%s4936_s28 + $0x6d0] ss:$8 sps:$4 sm:$0xff]  }
  0xbf   : > { %2410 = vmatprep.mubr.bf16.mxu0 %v4480_v17  ;;  %3058 = vmatprep.mubr.bf16.mxu1 %v4482_v18 }
  0xc6   : > { %2411 = vmatmul.mubr.bf16.gmra.mrb[64].mxu0 %v4484_v19  ;;  %3059 = vmatmul.mubr.bf16.gmra.mrb[64].mxu1 %v4485_v20  ;;  %v4558_v19 = vld [vmem:[%s4936_s28 + $0x1d4] ss:$8 sps:$4 sm:$0xff]   ;;  %v4560_v20 = vld [vmem:[%s4936_s28 + $0x6e4] ss:$8 sps:$4 sm:$0xff]  }
  0xc7   : > { %2418 = vmatprep.mubr.bf16.mxu0 %v4486_v21  ;;  %3066 = vmatprep.mubr.bf16.mxu1 %v4488_v22 }
  0xce   : > { %2419 = vmatmul.mubr.bf16.gmra.mrb[68].mxu0 %v4490_v23  ;;  %3067 = vmatmul.mubr.bf16.gmra.mrb[68].mxu1 %v4491_v24 }
  0xcf   : > { %2426 = vmatprep.mubr.bf16.mxu0 %v4492_v25  ;;  %3074 = vmatprep.mubr.bf16.mxu1 %v4494_v26 }
  0xd6   : > { %2427 = vmatmul.mubr.bf16.gmra.mrb[72].mxu0 %v4496_v27  ;;  %3075 = vmatmul.mubr.bf16.gmra.mrb[72].mxu1 %v4497_v28 }
  0xd7   : > { %2434 = vmatprep.mubr.bf16.mxu0 %v4498_v29  ;;  %3082 = vmatprep.mubr.bf16.mxu1 %v4500_v30  ;;  %v4562_v29 = vld [vmem:[%s4936_s28 + $0x1d0] ss:$8 sps:$4 sm:$0xff]   ;;  %v4563_v30 = vld [vmem:[%s4936_s28 + $0x6e0] ss:$8 sps:$4 sm:$0xff]  }
  0xde   : > { %2435 = vmatmul.mubr.bf16.gmra.mrb[76].mxu0 %v4502_v31  ;;  %3083 = vmatmul.mubr.bf16.gmra.mrb[76].mxu1 %v4503_v32 }
  0xdf   : > { %2442 = vmatprep.mubr.bf16.mxu0 %v4504_v33  ;;  %3090 = vmatprep.mubr.bf16.mxu1 %v4506_v34  ;;  %v4564_v33 = vld [vmem:[%s4936_s28 + $0x1e4] ss:$8 sps:$4 sm:$0xff]   ;;  %v4566_v34 = vld [vmem:[%s4936_s28 + $0x6f4] ss:$8 sps:$4 sm:$0xff]  }
  0xe6   : > { %2443 = vmatmul.mubr.bf16.gmra.mrb[80].mxu0 %v4508_v35  ;;  %3091 = vmatmul.mubr.bf16.gmra.mrb[80].mxu1 %v4509_v36 }
  0xe7   : > { %2450 = vmatprep.mubr.bf16.mxu0 %v4510_v37  ;;  %3098 = vmatprep.mubr.bf16.mxu1 %v4512_v38 }
  0xee   : > { %2451 = vmatmul.mubr.bf16.gmra.mrb[84].mxu0 %v4514_v39  ;;  %3099 = vmatmul.mubr.bf16.gmra.mrb[84].mxu1 %v4515_v40 }
  0xef   : > { %2458 = vmatprep.mubr.bf16.mxu0 %v4516_v41  ;;  %3106 = vmatprep.mubr.bf16.mxu1 %v4518_v42 }
  0xf6   : > { %2459 = vmatmul.mubr.bf16.gmra.mrb[88].mxu0 %v4520_v43  ;;  %3107 = vmatmul.mubr.bf16.gmra.mrb[88].mxu1 %v4521_v44 }
  0xf7   : > { %2466 = vmatprep.mubr.bf16.mxu0 %v4522_v45  ;;  %3114 = vmatprep.mubr.bf16.mxu1 %v4524_v46  ;;  %v4568_v45 = vld [vmem:[%s4936_s28 + $0x1e0] ss:$8 sps:$4 sm:$0xff]   ;;  %v4569_v46 = vld [vmem:[%s4936_s28 + $0x6f0] ss:$8 sps:$4 sm:$0xff]  }
  0xfe   : > { %2467 = vmatmul.mubr.bf16.gmra.mrb[92].mxu0 %v4526_v47  ;;  %3115 = vmatmul.mubr.bf16.gmra.mrb[92].mxu1 %v4527_v48 }
  0xff   : > { %2474 = vmatprep.mubr.bf16.mxu0 %v4528_v49  ;;  %3122 = vmatprep.mubr.bf16.mxu1 %v4530_v50  ;;  %v4570_v49 = vld [vmem:[%s4936_s28 + $0x1f4] ss:$8 sps:$4 sm:$0xff]   ;;  %v4572_v50 = vld [vmem:[%s4936_s28 + $0x704] ss:$8 sps:$4 sm:$0xff]  }
 0x106   : > { %2475 = vmatmul.mubr.bf16.gmra.mrb[96].mxu0 %v4532_v51  ;;  %3123 = vmatmul.mubr.bf16.gmra.mrb[96].mxu1 %v4533_v52 }
 0x107   : > { %2482 = vmatprep.mubr.bf16.mxu0 %v4534_v53  ;;  %3130 = vmatprep.mubr.bf16.mxu1 %v4536_v54 }
 0x10e   : > { %2483 = vmatmul.mubr.bf16.gmra.mrb[100].mxu0 %v4538_v55  ;;  %3131 = vmatmul.mubr.bf16.gmra.mrb[100].mxu1 %v4539_v56 }
 0x10f   : > { %2490 = vmatprep.mubr.bf16.mxu0 %v4540_v57  ;;  %3138 = vmatprep.mubr.bf16.mxu1 %v4542_v58 }
 0x116   : > { %2491 = vmatmul.mubr.bf16.gmra.mrb[104].mxu0 %v4544_v59  ;;  %3139 = vmatmul.mubr.bf16.gmra.mrb[104].mxu1 %v4545_v60 }
 0x117   : > { %2498 = vmatprep.mubr.bf16.mxu0 %v4546_v61  ;;  %3146 = vmatprep.mubr.bf16.mxu1 %v4548_v62  ;;  %v4574_v61 = vld [vmem:[%s4936_s28 + $0x1f0] ss:$8 sps:$4 sm:$0xff]   ;;  %v4575_v62 = vld [vmem:[%s4936_s28 + $0x700] ss:$8 sps:$4 sm:$0xff]  }
 0x119   : > { %v5105_v63 = vpop.f32.mrb[0].mxu0  ;;  %v5107_v0 = vpop.f32.mrb[0].mxu1 }
 0x11a   : > { %v2286_v1 = vpop.f32.mrb[1].mxu0  ;;  %v2934_v2 = vpop.f32.mrb[1].mxu1 }
 0x11b   : > { %v5111_v5 = vpop.f32.mrb[2].mxu0  ;;  %v5113_v6 = vpop.f32.mrb[2].mxu1  ;;  %v4576_v1 = vld [vmem:[%s4936_s28 + $0x204] ss:$8 sps:$4 sm:$0xff]   ;;  %v4578_v2 = vld [vmem:[%s4936_s28 + $0x714] ss:$8 sps:$4 sm:$0xff]  }
 0x11c   : > { %v2289_v9 = vpop.f32.mrb[3].mxu0  ;;  %v2937_v10 = vpop.f32.mrb[3].mxu1 }
 0x11e   : > { %2499 = vmatmul.mubr.bf16.gmra.mrb[108].mxu0 %v4550_v3  ;;  %3147 = vmatmul.mubr.bf16.gmra.mrb[108].mxu1 %v4551_v4 }
 0x11f   : > { %2506 = vmatprep.mubr.bf16.mxu0 %v4552_v7  ;;  %3154 = vmatprep.mubr.bf16.mxu1 %v4554_v8 }
 0x121   : > { %v5117_v11 = vpop.f32.mrb[4].mxu0  ;;  %v5119_v12 = vpop.f32.mrb[4].mxu1 }
 0x122   : > { %v2294_v13 = vpop.f32.mrb[5].mxu0  ;;  %v2942_v14 = vpop.f32.mrb[5].mxu1 }
 0x123   : > { %v5123_v17 = vpop.f32.mrb[6].mxu0  ;;  %v5125_v18 = vpop.f32.mrb[6].mxu1  ;;  %v4580_v13 = vld [vmem:[%s4936_s28 + $0x200] ss:$8 sps:$4 sm:$0xff]   ;;  %v4581_v14 = vld [vmem:[%s4936_s28 + $0x710] ss:$8 sps:$4 sm:$0xff]  }
 0x124   : > { %v2297_v21 = vpop.f32.mrb[7].mxu0  ;;  %v2945_v22 = vpop.f32.mrb[7].mxu1 }
 0x126   : > { %2507 = vmatmul.mubr.bf16.gmra.mrb[112].mxu0 %v4556_v15  ;;  %3155 = vmatmul.mubr.bf16.gmra.mrb[112].mxu1 %v4557_v16 }
 0x127   : > { %2514 = vmatprep.mubr.bf16.mxu0 %v4558_v19  ;;  %3162 = vmatprep.mubr.bf16.mxu1 %v4560_v20 }
 0x129   : > { %v2300_v23 = vpop.f32.mrb[8].mxu0  ;;  %v2948_v24 = vpop.f32.mrb[8].mxu1 }
 0x12a   : > { %v3580_v25 = vmax.f32 %v5105_v63, %v2300_v23  ;;  %v3752_v26 = vmax.f32 %v5107_v0, %v2948_v24  ;;  %v2302_v27 = vpop.f32.mrb[9].mxu0  ;;  %v2950_v28 = vpop.f32.mrb[9].mxu1 }
 0x12b   : > { %v2303_v31 = vpop.f32.mrb[10].mxu0  ;;  %v2951_v32 = vpop.f32.mrb[10].mxu1 }
 0x12c   : > { %v3581_v35 = vmax.f32 %v5111_v5, %v2303_v31  ;;  %v3753_v36 = vmax.f32 %v5113_v6, %v2951_v32  ;;  %v2305_v37 = vpop.f32.mrb[11].mxu0  ;;  %v2953_v38 = vpop.f32.mrb[11].mxu1 }
 0x12e   : > { %2515 = vmatmul.mubr.bf16.gmra.mrb[116].mxu0 %v4562_v29  ;;  %3163 = vmatmul.mubr.bf16.gmra.mrb[116].mxu1 %v4563_v30  ;;  %v4586_v29 = vld [vmem:[%s4936_s28 + $0x210] ss:$8 sps:$4 sm:$0xff]   ;;  %v4587_v30 = vld [vmem:[%s4936_s28 + $0x720] ss:$8 sps:$4 sm:$0xff]  }
 0x12f   : > { %2522 = vmatprep.mubr.bf16.mxu0 %v4564_v33  ;;  %3170 = vmatprep.mubr.bf16.mxu1 %v4566_v34  ;;  %v4588_v33 = vld [vmem:[%s4936_s28 + $0x224] ss:$8 sps:$4 sm:$0xff]   ;;  %v4590_v34 = vld [vmem:[%s4936_s28 + $0x734] ss:$8 sps:$4 sm:$0xff]  }
 0x131   : > { %v2308_v39 = vpop.f32.mrb[12].mxu0  ;;  %v2956_v40 = vpop.f32.mrb[12].mxu1 }
 0x132   : > { %v3582_v41 = vmax.f32 %v5117_v11, %v2308_v39  ;;  %v3754_v42 = vmax.f32 %v5119_v12, %v2956_v40  ;;  %v2310_v43 = vpop.f32.mrb[13].mxu0  ;;  %v2958_v44 = vpop.f32.mrb[13].mxu1 }
 0x133   : > { %v2311_v47 = vpop.f32.mrb[14].mxu0  ;;  %v2959_v48 = vpop.f32.mrb[14].mxu1 }
 0x134   : > { %v3583_v51 = vmax.f32 %v5123_v17, %v2311_v47  ;;  %v3755_v52 = vmax.f32 %v5125_v18, %v2959_v48  ;;  %v2313_v53 = vpop.f32.mrb[15].mxu0  ;;  %v2961_v54 = vpop.f32.mrb[15].mxu1  ;;  %v4582_v17 = vld [vmem:[%s4936_s28 + $0x214] ss:$8 sps:$4 sm:$0xff]   ;;  %v4584_v18 = vld [vmem:[%s4936_s28 + $0x724] ss:$8 sps:$4 sm:$0xff]  }
 0x136   : > { %2523 = vmatmul.mubr.bf16.gmra.mrb[120].mxu0 %v4568_v45  ;;  %3171 = vmatmul.mubr.bf16.gmra.mrb[120].mxu1 %v4569_v46  ;;  %v4592_v45 = vld [vmem:[%s4936_s28 + $0x220] ss:$8 sps:$4 sm:$0xff]   ;;  %v4593_v46 = vld [vmem:[%s4936_s28 + $0x730] ss:$8 sps:$4 sm:$0xff]  }
 0x137   : > { %2530 = vmatprep.mubr.bf16.mxu0 %v4570_v49  ;;  %3178 = vmatprep.mubr.bf16.mxu1 %v4572_v50  ;;  %v4594_v49 = vld [vmem:[%s4936_s28 + $0x234] ss:$8 sps:$4 sm:$0xff]   ;;  %v4596_v50 = vld [vmem:[%s4936_s28 + $0x744] ss:$8 sps:$4 sm:$0xff]  }
 0x139   : > { %v2316_v55 = vpop.f32.mrb[16].mxu0  ;;  %v2964_v56 = vpop.f32.mrb[16].mxu1 }
 0x13a   : > { %v5145_v57 = vmax.f32 %v3580_v25, %v2316_v55  ;;  %v5147_v58 = vmax.f32 %v3752_v26, %v2964_v56  ;;  %v2318_v59 = vpop.f32.mrb[17].mxu0  ;;  %v2966_v60 = vpop.f32.mrb[17].mxu1 }
 0x13b   : > { %v2319_v63 = vpop.f32.mrb[18].mxu0  ;;  %v2967_v0 = vpop.f32.mrb[18].mxu1 }
 0x13c   : > { %v5153_v3 = vmax.f32 %v3581_v35, %v2319_v63  ;;  %v5155_v4 = vmax.f32 %v3753_v36, %v2967_v0  ;;  %v2321_v5 = vpop.f32.mrb[19].mxu0  ;;  %v2969_v6 = vpop.f32.mrb[19].mxu1 }
 0x13e   : > { %2531 = vmatmul.mubr.bf16.gmra.mrb[124].mxu0 %v4574_v61  ;;  %3179 = vmatmul.mubr.bf16.gmra.mrb[124].mxu1 %v4575_v62  ;;  %v4598_v61 = vld [vmem:[%s4936_s28 + $0x230] ss:$8 sps:$4 sm:$0xff]   ;;  %v4599_v62 = vld [vmem:[%s4936_s28 + $0x740] ss:$8 sps:$4 sm:$0xff]  }
 0x13f   : > { %2538 = vmatprep.mubr.bf16.mxu0 %v4576_v1  ;;  %3186 = vmatprep.mubr.bf16.mxu1 %v4578_v2  ;;  %v4600_v1 = vld [vmem:[%s4936_s28 + $0x244] ss:$8 sps:$4 sm:$0xff]   ;;  %v4602_v2 = vld [vmem:[%s4936_s28 + $0x754] ss:$8 sps:$4 sm:$0xff]  }
 0x141   : > { %v2324_v7 = vpop.f32.mrb[20].mxu0  ;;  %v2972_v8 = vpop.f32.mrb[20].mxu1 }
 0x142   : > { %v5157_v9 = vmax.f32 %v3582_v41, %v2324_v7  ;;  %v5159_v10 = vmax.f32 %v3754_v42, %v2972_v8  ;;  %v2326_v11 = vpop.f32.mrb[21].mxu0  ;;  %v2974_v12 = vpop.f32.mrb[21].mxu1 }
 0x143   : > { %v2327_v15 = vpop.f32.mrb[22].mxu0  ;;  %v2975_v16 = vpop.f32.mrb[22].mxu1 }
 0x144   : > { %v5165_v19 = vmax.f32 %v3583_v51, %v2327_v15  ;;  %v5167_v20 = vmax.f32 %v3755_v52, %v2975_v16  ;;  %v2329_v21 = vpop.f32.mrb[23].mxu0  ;;  %v2977_v22 = vpop.f32.mrb[23].mxu1 }
 0x146   : > { %2539 = vmatmul.mubr.bf16.gmra.mrb[128].mxu0 %v4580_v13  ;;  %3187 = vmatmul.mubr.bf16.gmra.mrb[128].mxu1 %v4581_v14  ;;  %v4604_v13 = vld [vmem:[%s4936_s28 + $0x240] ss:$8 sps:$4 sm:$0xff]   ;;  %v4605_v14 = vld [vmem:[%s4936_s28 + $0x750] ss:$8 sps:$4 sm:$0xff]  }
 0x147   : > { %2546 = vmatprep.mubr.bf16.mxu0 %v4582_v17  ;;  %3194 = vmatprep.mubr.bf16.mxu1 %v4584_v18  ;;  %v4606_v17 = vld [vmem:[%s4936_s28 + $0x254] ss:$8 sps:$4 sm:$0xff]   ;;  %v4608_v18 = vld [vmem:[%s4936_s28 + $0x764] ss:$8 sps:$4 sm:$0xff]  }
 0x149   : > { %v2332_v23 = vpop.f32.mrb[24].mxu0  ;;  %v2980_v24 = vpop.f32.mrb[24].mxu1 }
 0x14a   : > { %v3588_v25 = vmax.f32 %v5145_v57, %v2332_v23  ;;  %v3760_v26 = vmax.f32 %v5147_v58, %v2980_v24  ;;  %v2334_v27 = vpop.f32.mrb[25].mxu0  ;;  %v2982_v28 = vpop.f32.mrb[25].mxu1 }
 0x14b   : > { %v2335_v31 = vpop.f32.mrb[26].mxu0  ;;  %v2983_v32 = vpop.f32.mrb[26].mxu1 }
 0x14c   : > { %v3589_v35 = vmax.f32 %v5153_v3, %v2335_v31  ;;  %v3761_v36 = vmax.f32 %v5155_v4, %v2983_v32  ;;  %v2337_v37 = vpop.f32.mrb[27].mxu0  ;;  %v2985_v38 = vpop.f32.mrb[27].mxu1 }
 0x14e   : > { %2547 = vmatmul.mubr.bf16.gmra.mrb[132].mxu0 %v4586_v29  ;;  %3195 = vmatmul.mubr.bf16.gmra.mrb[132].mxu1 %v4587_v30  ;;  %v4610_v29 = vld [vmem:[%s4936_s28 + $0x250] ss:$8 sps:$4 sm:$0xff]   ;;  %v4611_v30 = vld [vmem:[%s4936_s28 + $0x760] ss:$8 sps:$4 sm:$0xff]  }
 0x14f   : > { %2554 = vmatprep.mubr.bf16.mxu0 %v4588_v33  ;;  %3202 = vmatprep.mubr.bf16.mxu1 %v4590_v34  ;;  %v4612_v33 = vld [vmem:[%s4936_s28 + $0x264] ss:$8 sps:$4 sm:$0xff]   ;;  %v4614_v34 = vld [vmem:[%s4936_s28 + $0x774] ss:$8 sps:$4 sm:$0xff]  }
 0x151   : > { %v2340_v39 = vpop.f32.mrb[28].mxu0  ;;  %v2988_v40 = vpop.f32.mrb[28].mxu1 }
 0x152   : > { %v3590_v41 = vmax.f32 %v5157_v9, %v2340_v39  ;;  %v3762_v42 = vmax.f32 %v5159_v10, %v2988_v40  ;;  %v2342_v43 = vpop.f32.mrb[29].mxu0  ;;  %v2990_v44 = vpop.f32.mrb[29].mxu1 }
 0x153   : > { %v2343_v47 = vpop.f32.mrb[30].mxu0  ;;  %v2991_v48 = vpop.f32.mrb[30].mxu1 }
 0x154   : > { %v3591_v51 = vmax.f32 %v5165_v19, %v2343_v47  ;;  %v3763_v52 = vmax.f32 %v5167_v20, %v2991_v48  ;;  %v2345_v53 = vpop.f32.mrb[31].mxu0  ;;  %v2993_v54 = vpop.f32.mrb[31].mxu1 }
 0x156   : > { %2555 = vmatmul.mubr.bf16.gmra.mrb[136].mxu0 %v4592_v45  ;;  %3203 = vmatmul.mubr.bf16.gmra.mrb[136].mxu1 %v4593_v46  ;;  %v4616_v45 = vld [vmem:[%s4936_s28 + $0x260] ss:$8 sps:$4 sm:$0xff]   ;;  %v4617_v46 = vld [vmem:[%s4936_s28 + $0x770] ss:$8 sps:$4 sm:$0xff]  }
 0x157   : > { %2562 = vmatprep.mubr.bf16.mxu0 %v4594_v49  ;;  %3210 = vmatprep.mubr.bf16.mxu1 %v4596_v50  ;;  %v4618_v49 = vld [vmem:[%s4936_s28 + $0x274] ss:$8 sps:$4 sm:$0xff]   ;;  %v4620_v50 = vld [vmem:[%s4936_s28 + $0x784] ss:$8 sps:$4 sm:$0xff]  }
 0x159   : > { %v2348_v55 = vpop.f32.mrb[32].mxu0  ;;  %v2996_v56 = vpop.f32.mrb[32].mxu1 }
 0x15a   : > { %v5185_v57 = vmax.f32 %v3588_v25, %v2348_v55  ;;  %v5187_v58 = vmax.f32 %v3760_v26, %v2996_v56  ;;  %v2350_v59 = vpop.f32.mrb[33].mxu0  ;;  %v2998_v60 = vpop.f32.mrb[33].mxu1 }
 0x15b   : > { %v2351_v63 = vpop.f32.mrb[34].mxu0  ;;  %v2999_v0 = vpop.f32.mrb[34].mxu1 }
 0x15c   : > { %v5193_v3 = vmax.f32 %v3589_v35, %v2351_v63  ;;  %v5195_v4 = vmax.f32 %v3761_v36, %v2999_v0  ;;  %v2353_v5 = vpop.f32.mrb[35].mxu0  ;;  %v3001_v6 = vpop.f32.mrb[35].mxu1 }
 0x15e   : > { %2563 = vmatmul.mubr.bf16.gmra.mrb[140].mxu0 %v4598_v61  ;;  %3211 = vmatmul.mubr.bf16.gmra.mrb[140].mxu1 %v4599_v62  ;;  %v4622_v61 = vld [vmem:[%s4936_s28 + $0x270] ss:$8 sps:$4 sm:$0xff]   ;;  %v4623_v62 = vld [vmem:[%s4936_s28 + $0x780] ss:$8 sps:$4 sm:$0xff]  }
 0x15f   : > { %2570 = vmatprep.mubr.bf16.mxu0 %v4600_v1  ;;  %3218 = vmatprep.mubr.bf16.mxu1 %v4602_v2  ;;  %v4624_v1 = vld [vmem:[%s4936_s28 + $0x284] ss:$8 sps:$4 sm:$0xff]   ;;  %v4626_v2 = vld [vmem:[%s4936_s28 + $0x794] ss:$8 sps:$4 sm:$0xff]  }
 0x161   : > { %v2356_v7 = vpop.f32.mrb[36].mxu0  ;;  %v3004_v8 = vpop.f32.mrb[36].mxu1 }
 0x162   : > { %v5197_v9 = vmax.f32 %v3590_v41, %v2356_v7  ;;  %v5199_v10 = vmax.f32 %v3762_v42, %v3004_v8  ;;  %v2358_v11 = vpop.f32.mrb[37].mxu0  ;;  %v3006_v12 = vpop.f32.mrb[37].mxu1 }
 0x163   : > { %v2359_v15 = vpop.f32.mrb[38].mxu0  ;;  %v3007_v16 = vpop.f32.mrb[38].mxu1 }
 0x164   : > { %v5205_v19 = vmax.f32 %v3591_v51, %v2359_v15  ;;  %v5207_v20 = vmax.f32 %v3763_v52, %v3007_v16  ;;  %v2361_v21 = vpop.f32.mrb[39].mxu0  ;;  %v3009_v22 = vpop.f32.mrb[39].mxu1 }
 0x166   : > { %2571 = vmatmul.mubr.bf16.gmra.mrb[144].mxu0 %v4604_v13  ;;  %3219 = vmatmul.mubr.bf16.gmra.mrb[144].mxu1 %v4605_v14  ;;  %v4628_v13 = vld [vmem:[%s4936_s28 + $0x280] ss:$8 sps:$4 sm:$0xff]   ;;  %v4629_v14 = vld [vmem:[%s4936_s28 + $0x790] ss:$8 sps:$4 sm:$0xff]  }
 0x167   : > { %2578 = vmatprep.mubr.bf16.mxu0 %v4606_v17  ;;  %3226 = vmatprep.mubr.bf16.mxu1 %v4608_v18  ;;  %v4630_v17 = vld [vmem:[%s4936_s28 + $0x294] ss:$8 sps:$4 sm:$0xff]   ;;  %v4632_v18 = vld [vmem:[%s4936_s28 + $0x7a4] ss:$8 sps:$4 sm:$0xff]  }
 0x169   : > { %v2364_v23 = vpop.f32.mrb[40].mxu0  ;;  %v3012_v24 = vpop.f32.mrb[40].mxu1 }
 0x16a   : > { %v3596_v25 = vmax.f32 %v5185_v57, %v2364_v23  ;;  %v3768_v26 = vmax.f32 %v5187_v58, %v3012_v24  ;;  %v2366_v27 = vpop.f32.mrb[41].mxu0  ;;  %v3014_v28 = vpop.f32.mrb[41].mxu1 }
 0x16b   : > { %v2367_v31 = vpop.f32.mrb[42].mxu0  ;;  %v3015_v32 = vpop.f32.mrb[42].mxu1 }
 0x16c   : > { %v3597_v35 = vmax.f32 %v5193_v3, %v2367_v31  ;;  %v3769_v36 = vmax.f32 %v5195_v4, %v3015_v32  ;;  %v2369_v37 = vpop.f32.mrb[43].mxu0  ;;  %v3017_v38 = vpop.f32.mrb[43].mxu1 }
 0x16e   : > { %2579 = vmatmul.mubr.bf16.gmra.mrb[148].mxu0 %v4610_v29  ;;  %3227 = vmatmul.mubr.bf16.gmra.mrb[148].mxu1 %v4611_v30  ;;  %v4634_v29 = vld [vmem:[%s4936_s28 + $0x290] ss:$8 sps:$4 sm:$0xff]   ;;  %v4635_v30 = vld [vmem:[%s4936_s28 + $0x7a0] ss:$8 sps:$4 sm:$0xff]  }
 0x16f   : > { %2586 = vmatprep.mubr.bf16.mxu0 %v4612_v33  ;;  %3234 = vmatprep.mubr.bf16.mxu1 %v4614_v34  ;;  %v4636_v33 = vld [vmem:[%s4936_s28 + $0x2a4] ss:$8 sps:$4 sm:$0xff]   ;;  %v4638_v34 = vld [vmem:[%s4936_s28 + $0x7b4] ss:$8 sps:$4 sm:$0xff]  }
 0x171   : > { %v2372_v39 = vpop.f32.mrb[44].mxu0  ;;  %v3020_v40 = vpop.f32.mrb[44].mxu1 }
 0x172   : > { %v3598_v41 = vmax.f32 %v5197_v9, %v2372_v39  ;;  %v3770_v42 = vmax.f32 %v5199_v10, %v3020_v40  ;;  %v2374_v43 = vpop.f32.mrb[45].mxu0  ;;  %v3022_v44 = vpop.f32.mrb[45].mxu1 }
 0x173   : > { %v2375_v47 = vpop.f32.mrb[46].mxu0  ;;  %v3023_v48 = vpop.f32.mrb[46].mxu1  ;;  %v4640_v43 = vld [vmem:[%s4936_s28 + $0x2a0] ss:$8 sps:$4 sm:$0xff]   ;;  %v4641_v44 = vld [vmem:[%s4936_s28 + $0x7b0] ss:$8 sps:$4 sm:$0xff]  }
 0x174   : > { %v3599_v51 = vmax.f32 %v5205_v19, %v2375_v47  ;;  %v3771_v52 = vmax.f32 %v5207_v20, %v3023_v48  ;;  %v2377_v53 = vpop.f32.mrb[47].mxu0  ;;  %v3025_v54 = vpop.f32.mrb[47].mxu1 }
 0x176   : > { %2587 = vmatmul.mubr.bf16.gmra.mrb[152].mxu0 %v4616_v45  ;;  %3235 = vmatmul.mubr.bf16.gmra.mrb[152].mxu1 %v4617_v46 }
 0x177   : > { %2594 = vmatprep.mubr.bf16.mxu0 %v4618_v49  ;;  %3242 = vmatprep.mubr.bf16.mxu1 %v4620_v50  ;;  %v4642_v49 = vld [vmem:[%s4936_s28 + $0x2b4] ss:$8 sps:$4 sm:$0xff]   ;;  %v4644_v50 = vld [vmem:[%s4936_s28 + $0x7c4] ss:$8 sps:$4 sm:$0xff]  }
 0x179   : > { %v2380_v55 = vpop.f32.mrb[48].mxu0  ;;  %v3028_v56 = vpop.f32.mrb[48].mxu1 }
 0x17a   : > { %v5225_v57 = vmax.f32 %v3596_v25, %v2380_v55  ;;  %v5227_v58 = vmax.f32 %v3768_v26, %v3028_v56  ;;  %v2382_v59 = vpop.f32.mrb[49].mxu0  ;;  %v3030_v60 = vpop.f32.mrb[49].mxu1 }
 0x17b   : > { %v2383_v63 = vpop.f32.mrb[50].mxu0  ;;  %v3031_v0 = vpop.f32.mrb[50].mxu1  ;;  %v4646_v59 = vld [vmem:[%s4936_s28 + $0x2b0] ss:$8 sps:$4 sm:$0xff]   ;;  %v4647_v60 = vld [vmem:[%s4936_s28 + $0x7c0] ss:$8 sps:$4 sm:$0xff]  }
 0x17c   : > { %v5233_v3 = vmax.f32 %v3597_v35, %v2383_v63  ;;  %v5235_v4 = vmax.f32 %v3769_v36, %v3031_v0  ;;  %v2385_v5 = vpop.f32.mrb[51].mxu0  ;;  %v3033_v6 = vpop.f32.mrb[51].mxu1 }
 0x17e   : > { %2595 = vmatmul.mubr.bf16.gmra.mrb[156].mxu0 %v4622_v61  ;;  %3243 = vmatmul.mubr.bf16.gmra.mrb[156].mxu1 %v4623_v62 }
 0x17f   : > { %2602 = vmatprep.mubr.bf16.mxu0 %v4624_v1  ;;  %3250 = vmatprep.mubr.bf16.mxu1 %v4626_v2  ;;  %v4648_v1 = vld [vmem:[%s4936_s28 + $0x2c4] ss:$8 sps:$4 sm:$0xff]   ;;  %v4650_v2 = vld [vmem:[%s4936_s28 + $0x7d4] ss:$8 sps:$4 sm:$0xff]  }
 0x181   : > { %v2388_v7 = vpop.f32.mrb[52].mxu0  ;;  %v3036_v8 = vpop.f32.mrb[52].mxu1 }
 0x182   : > { %v5237_v9 = vmax.f32 %v3598_v41, %v2388_v7  ;;  %v5239_v10 = vmax.f32 %v3770_v42, %v3036_v8  ;;  %v2390_v11 = vpop.f32.mrb[53].mxu0  ;;  %v3038_v12 = vpop.f32.mrb[53].mxu1 }
 0x183   : > { %v2391_v15 = vpop.f32.mrb[54].mxu0  ;;  %v3039_v16 = vpop.f32.mrb[54].mxu1 }
 0x184   : > { %v5245_v19 = vmax.f32 %v3599_v51, %v2391_v15  ;;  %v5247_v20 = vmax.f32 %v3771_v52, %v3039_v16  ;;  %v2393_v21 = vpop.f32.mrb[55].mxu0  ;;  %v3041_v22 = vpop.f32.mrb[55].mxu1 }
 0x186   : > { %2603 = vmatmul.mubr.bf16.gmra.mrb[160].mxu0 %v4628_v13  ;;  %3251 = vmatmul.mubr.bf16.gmra.mrb[160].mxu1 %v4629_v14  ;;  %v4652_v13 = vld [vmem:[%s4936_s28 + $0x2c0] ss:$8 sps:$4 sm:$0xff]   ;;  %v4653_v14 = vld [vmem:[%s4936_s28 + $0x7d0] ss:$8 sps:$4 sm:$0xff]  }
 0x187   : > { %2610 = vmatprep.mubr.bf16.mxu0 %v4630_v17  ;;  %3258 = vmatprep.mubr.bf16.mxu1 %v4632_v18  ;;  %v4654_v17 = vld [vmem:[%s4936_s28 + $0x2d4] ss:$8 sps:$4 sm:$0xff]   ;;  %v4656_v18 = vld [vmem:[%s4936_s28 + $0x7e4] ss:$8 sps:$4 sm:$0xff]  }
 0x189   : > { %v2396_v23 = vpop.f32.mrb[56].mxu0  ;;  %v3044_v24 = vpop.f32.mrb[56].mxu1 }
 0x18a   : > { %v3604_v25 = vmax.f32 %v5225_v57, %v2396_v23  ;;  %v3776_v26 = vmax.f32 %v5227_v58, %v3044_v24  ;;  %v2398_v27 = vpop.f32.mrb[57].mxu0  ;;  %v3046_v28 = vpop.f32.mrb[57].mxu1 }
 0x18b   : > { %v2399_v31 = vpop.f32.mrb[58].mxu0  ;;  %v3047_v32 = vpop.f32.mrb[58].mxu1 }
 0x18c   : > { %v3605_v35 = vmax.f32 %v5233_v3, %v2399_v31  ;;  %v3777_v36 = vmax.f32 %v5235_v4, %v3047_v32  ;;  %v2401_v37 = vpop.f32.mrb[59].mxu0  ;;  %v3049_v38 = vpop.f32.mrb[59].mxu1 }
 0x18e   : > { %2611 = vmatmul.mubr.bf16.gmra.mrb[164].mxu0 %v4634_v29  ;;  %3259 = vmatmul.mubr.bf16.gmra.mrb[164].mxu1 %v4635_v30  ;;  %v4658_v29 = vld [vmem:[%s4936_s28 + $0x2d0] ss:$8 sps:$4 sm:$0xff]   ;;  %v4659_v30 = vld [vmem:[%s4936_s28 + $0x7e0] ss:$8 sps:$4 sm:$0xff]  }
 0x18f   : > { %2618 = vmatprep.mubr.bf16.mxu0 %v4636_v33  ;;  %3266 = vmatprep.mubr.bf16.mxu1 %v4638_v34  ;;  %v4660_v33 = vld [vmem:[%s4936_s28 + $0x2e4] ss:$8 sps:$4 sm:$0xff]   ;;  %v4662_v34 = vld [vmem:[%s4936_s28 + $0x7f4] ss:$8 sps:$4 sm:$0xff]  }
 0x191   : > { %v2404_v39 = vpop.f32.mrb[60].mxu0  ;;  %v3052_v40 = vpop.f32.mrb[60].mxu1 }
 0x192   : > { %v2406_v41 = vpop.f32.mrb[61].mxu0  ;;  %v3054_v42 = vpop.f32.mrb[61].mxu1  ;;  %v3606_v45 = vmax.f32 %v5237_v9, %v2404_v39  ;;  %v3778_v46 = vmax.f32 %v5239_v10, %v3052_v40 }
 0x193   : > { %v2407_v47 = vpop.f32.mrb[62].mxu0  ;;  %v3055_v48 = vpop.f32.mrb[62].mxu1 }
 0x194   : > { %v2409_v51 = vpop.f32.mrb[63].mxu0  ;;  %v3057_v52 = vpop.f32.mrb[63].mxu1  ;;  %v3607_v53 = vmax.f32 %v5245_v19, %v2407_v47  ;;  %v3779_v54 = vmax.f32 %v5247_v20, %v3055_v48 }
 0x196   : > { %2619 = vmatmul.mubr.bf16.gmra.mrb[168].mxu0 %v4640_v43  ;;  %3267 = vmatmul.mubr.bf16.gmra.mrb[168].mxu1 %v4641_v44 }
 0x197   : > { %2626 = vmatprep.mubr.bf16.mxu0 %v4642_v49  ;;  %3274 = vmatprep.mubr.bf16.mxu1 %v4644_v50  ;;  %v4666_v49 = vld [vmem:[%s4936_s28 + $0x2f4] ss:$8 sps:$4 sm:$0xff]   ;;  %v4668_v50 = vld [vmem:[%s4936_s28 + $0x804] ss:$8 sps:$4 sm:$0xff]  }
 0x199   : > { %v2412_v55 = vpop.f32.mrb[64].mxu0  ;;  %v3060_v56 = vpop.f32.mrb[64].mxu1 }
 0x19a   : > { %v2414_v57 = vpop.f32.mrb[65].mxu0  ;;  %v3062_v58 = vpop.f32.mrb[65].mxu1  ;;  %v5267_v61 = vmax.f32 %v3604_v25, %v2412_v55  ;;  %v5269_v62 = vmax.f32 %v3776_v26, %v3060_v56 }
 0x19b   : > { %v2415_v63 = vpop.f32.mrb[66].mxu0  ;;  %v3063_v0 = vpop.f32.mrb[66].mxu1 }
 0x19c   : > { %v2417_v3 = vpop.f32.mrb[67].mxu0  ;;  %v3065_v4 = vpop.f32.mrb[67].mxu1  ;;  %v5273_v5 = vmax.f32 %v3605_v35, %v2415_v63  ;;  %v5275_v6 = vmax.f32 %v3777_v36, %v3063_v0 }
 0x19e   : > { %2627 = vmatmul.mubr.bf16.gmra.mrb[172].mxu0 %v4646_v59  ;;  %3275 = vmatmul.mubr.bf16.gmra.mrb[172].mxu1 %v4647_v60 }
 0x19f   : > { %2634 = vmatprep.mubr.bf16.mxu0 %v4648_v1  ;;  %3282 = vmatprep.mubr.bf16.mxu1 %v4650_v2  ;;  %v4672_v1 = vld [vmem:[%s4936_s28 + $0x304] ss:$8 sps:$4 sm:$0xff]   ;;  %v4674_v2 = vld [vmem:[%s4936_s28 + $0x814] ss:$8 sps:$4 sm:$0xff]  }
 0x1a1   : > { %v2420_v7 = vpop.f32.mrb[68].mxu0  ;;  %v3068_v8 = vpop.f32.mrb[68].mxu1 }
 0x1a2   : > { %v5277_v9 = vmax.f32 %v3606_v45, %v2420_v7  ;;  %v5279_v10 = vmax.f32 %v3778_v46, %v3068_v8  ;;  %v2422_v11 = vpop.f32.mrb[69].mxu0  ;;  %v3070_v12 = vpop.f32.mrb[69].mxu1  ;;  %v4664_v45 = vld [vmem:[%s4936_s28 + $0x2e0] ss:$8 sps:$4 sm:$0xff]   ;;  %v4665_v46 = vld [vmem:[%s4936_s28 + $0x7f0] ss:$8 sps:$4 sm:$0xff]  }
 0x1a3   : > { %v2423_v15 = vpop.f32.mrb[70].mxu0  ;;  %v3071_v16 = vpop.f32.mrb[70].mxu1 }
 0x1a4   : > { %v5285_v19 = vmax.f32 %v3607_v53, %v2423_v15  ;;  %v5287_v20 = vmax.f32 %v3779_v54, %v3071_v16  ;;  %v2425_v21 = vpop.f32.mrb[71].mxu0  ;;  %v3073_v22 = vpop.f32.mrb[71].mxu1 }
 0x1a6   : > { %2635 = vmatmul.mubr.bf16.gmra.mrb[176].mxu0 %v4652_v13  ;;  %3283 = vmatmul.mubr.bf16.gmra.mrb[176].mxu1 %v4653_v14  ;;  %v4676_v13 = vld [vmem:[%s4936_s28 + $0x300] ss:$8 sps:$4 sm:$0xff]   ;;  %v4677_v14 = vld [vmem:[%s4936_s28 + $0x810] ss:$8 sps:$4 sm:$0xff]  }
 0x1a7   : > { %2642 = vmatprep.mubr.bf16.mxu0 %v4654_v17  ;;  %3290 = vmatprep.mubr.bf16.mxu1 %v4656_v18  ;;  %v4678_v17 = vld [vmem:[%s4936_s28 + $0x314] ss:$8 sps:$4 sm:$0xff]   ;;  %v4680_v18 = vld [vmem:[%s4936_s28 + $0x824] ss:$8 sps:$4 sm:$0xff]  }
 0x1a9   : > { %v2428_v23 = vpop.f32.mrb[72].mxu0  ;;  %v3076_v24 = vpop.f32.mrb[72].mxu1 }
 0x1aa   : > { %v3612_v25 = vmax.f32 %v5267_v61, %v2428_v23  ;;  %v3784_v26 = vmax.f32 %v5269_v62, %v3076_v24  ;;  %v2430_v27 = vpop.f32.mrb[73].mxu0  ;;  %v3078_v28 = vpop.f32.mrb[73].mxu1  ;;  %v4670_v61 = vld [vmem:[%s4936_s28 + $0x2f0] ss:$8 sps:$4 sm:$0xff]   ;;  %v4671_v62 = vld [vmem:[%s4936_s28 + $0x800] ss:$8 sps:$4 sm:$0xff]  }
 0x1ab   : > { %v2431_v31 = vpop.f32.mrb[74].mxu0  ;;  %v3079_v32 = vpop.f32.mrb[74].mxu1 }
 0x1ac   : > { %v3613_v35 = vmax.f32 %v5273_v5, %v2431_v31  ;;  %v3785_v36 = vmax.f32 %v5275_v6, %v3079_v32  ;;  %v2433_v37 = vpop.f32.mrb[75].mxu0  ;;  %v3081_v38 = vpop.f32.mrb[75].mxu1 }
 0x1ae   : > { %2643 = vmatmul.mubr.bf16.gmra.mrb[180].mxu0 %v4658_v29  ;;  %3291 = vmatmul.mubr.bf16.gmra.mrb[180].mxu1 %v4659_v30  ;;  %v4682_v29 = vld [vmem:[%s4936_s28 + $0x310] ss:$8 sps:$4 sm:$0xff]   ;;  %v4683_v30 = vld [vmem:[%s4936_s28 + $0x820] ss:$8 sps:$4 sm:$0xff]  }
 0x1af   : > { %2650 = vmatprep.mubr.bf16.mxu0 %v4660_v33  ;;  %3298 = vmatprep.mubr.bf16.mxu1 %v4662_v34  ;;  %v4684_v33 = vld [vmem:[%s4936_s28 + $0x324] ss:$8 sps:$4 sm:$0xff]   ;;  %v4686_v34 = vld [vmem:[%s4936_s28 + $0x834] ss:$8 sps:$4 sm:$0xff]  }
 0x1b1   : > { %v2436_v39 = vpop.f32.mrb[76].mxu0  ;;  %v3084_v40 = vpop.f32.mrb[76].mxu1 }
 0x1b2   : > { %v3614_v41 = vmax.f32 %v5277_v9, %v2436_v39  ;;  %v3786_v42 = vmax.f32 %v5279_v10, %v3084_v40  ;;  %v2438_v43 = vpop.f32.mrb[77].mxu0  ;;  %v3086_v44 = vpop.f32.mrb[77].mxu1 }
 0x1b3   : > { %v2439_v47 = vpop.f32.mrb[78].mxu0  ;;  %v3087_v48 = vpop.f32.mrb[78].mxu1 }
 0x1b4   : > { %v3615_v51 = vmax.f32 %v5285_v19, %v2439_v47  ;;  %v3787_v52 = vmax.f32 %v5287_v20, %v3087_v48  ;;  %v2441_v53 = vpop.f32.mrb[79].mxu0  ;;  %v3089_v54 = vpop.f32.mrb[79].mxu1 }
 0x1b6   : > { %2651 = vmatmul.mubr.bf16.gmra.mrb[184].mxu0 %v4664_v45  ;;  %3299 = vmatmul.mubr.bf16.gmra.mrb[184].mxu1 %v4665_v46  ;;  %v4688_v45 = vld [vmem:[%s4936_s28 + $0x320] ss:$8 sps:$4 sm:$0xff]   ;;  %v4689_v46 = vld [vmem:[%s4936_s28 + $0x830] ss:$8 sps:$4 sm:$0xff]  }
 0x1b7   : > { %2658 = vmatprep.mubr.bf16.mxu0 %v4666_v49  ;;  %3306 = vmatprep.mubr.bf16.mxu1 %v4668_v50  ;;  %v4690_v49 = vld [vmem:[%s4936_s28 + $0x334] ss:$8 sps:$4 sm:$0xff]   ;;  %v4692_v50 = vld [vmem:[%s4936_s28 + $0x844] ss:$8 sps:$4 sm:$0xff]  }
 0x1b9   : > { %v2444_v55 = vpop.f32.mrb[80].mxu0  ;;  %v3092_v56 = vpop.f32.mrb[80].mxu1 }
 0x1ba   : > { %v5305_v57 = vmax.f32 %v3612_v25, %v2444_v55  ;;  %v5307_v58 = vmax.f32 %v3784_v26, %v3092_v56  ;;  %v2446_v59 = vpop.f32.mrb[81].mxu0  ;;  %v3094_v60 = vpop.f32.mrb[81].mxu1 }
 0x1bb   : > { %v2447_v63 = vpop.f32.mrb[82].mxu0  ;;  %v3095_v0 = vpop.f32.mrb[82].mxu1 }
 0x1bc   : > { %v5313_v3 = vmax.f32 %v3613_v35, %v2447_v63  ;;  %v5315_v4 = vmax.f32 %v3785_v36, %v3095_v0  ;;  %v2449_v5 = vpop.f32.mrb[83].mxu0  ;;  %v3097_v6 = vpop.f32.mrb[83].mxu1 }
 0x1be   : > { %2659 = vmatmul.mubr.bf16.gmra.mrb[188].mxu0 %v4670_v61  ;;  %3307 = vmatmul.mubr.bf16.gmra.mrb[188].mxu1 %v4671_v62  ;;  %v4694_v61 = vld [vmem:[%s4936_s28 + $0x330] ss:$8 sps:$4 sm:$0xff]   ;;  %v4695_v62 = vld [vmem:[%s4936_s28 + $0x840] ss:$8 sps:$4 sm:$0xff]  }
 0x1bf   : > { %2666 = vmatprep.mubr.bf16.mxu0 %v4672_v1  ;;  %3314 = vmatprep.mubr.bf16.mxu1 %v4674_v2  ;;  %v4696_v1 = vld [vmem:[%s4936_s28 + $0x344] ss:$8 sps:$4 sm:$0xff]   ;;  %v4698_v2 = vld [vmem:[%s4936_s28 + $0x854] ss:$8 sps:$4 sm:$0xff]  }
 0x1c1   : > { %v2452_v7 = vpop.f32.mrb[84].mxu0  ;;  %v3100_v8 = vpop.f32.mrb[84].mxu1 }
 0x1c2   : > { %v5317_v9 = vmax.f32 %v3614_v41, %v2452_v7  ;;  %v5319_v10 = vmax.f32 %v3786_v42, %v3100_v8  ;;  %v2454_v11 = vpop.f32.mrb[85].mxu0  ;;  %v3102_v12 = vpop.f32.mrb[85].mxu1 }
 0x1c3   : > { %v2455_v15 = vpop.f32.mrb[86].mxu0  ;;  %v3103_v16 = vpop.f32.mrb[86].mxu1 }
 0x1c4   : > { %v5325_v19 = vmax.f32 %v3615_v51, %v2455_v15  ;;  %v5327_v20 = vmax.f32 %v3787_v52, %v3103_v16  ;;  %v2457_v21 = vpop.f32.mrb[87].mxu0  ;;  %v3105_v22 = vpop.f32.mrb[87].mxu1 }
 0x1c6   : > { %2667 = vmatmul.mubr.bf16.gmra.mrb[192].mxu0 %v4676_v13  ;;  %3315 = vmatmul.mubr.bf16.gmra.mrb[192].mxu1 %v4677_v14  ;;  %v4700_v13 = vld [vmem:[%s4936_s28 + $0x340] ss:$8 sps:$4 sm:$0xff]   ;;  %v4701_v14 = vld [vmem:[%s4936_s28 + $0x850] ss:$8 sps:$4 sm:$0xff]  }
 0x1c7   : > { %2674 = vmatprep.mubr.bf16.mxu0 %v4678_v17  ;;  %3322 = vmatprep.mubr.bf16.mxu1 %v4680_v18  ;;  %v4702_v17 = vld [vmem:[%s4936_s28 + $0x354] ss:$8 sps:$4 sm:$0xff]   ;;  %v4704_v18 = vld [vmem:[%s4936_s28 + $0x864] ss:$8 sps:$4 sm:$0xff]  }
 0x1c9   : > { %v2460_v23 = vpop.f32.mrb[88].mxu0  ;;  %v3108_v24 = vpop.f32.mrb[88].mxu1 }
 0x1ca   : > { %v3620_v25 = vmax.f32 %v5305_v57, %v2460_v23  ;;  %v3792_v26 = vmax.f32 %v5307_v58, %v3108_v24  ;;  %v2462_v27 = vpop.f32.mrb[89].mxu0  ;;  %v3110_v28 = vpop.f32.mrb[89].mxu1 }
 0x1cb   : > { %v2463_v31 = vpop.f32.mrb[90].mxu0  ;;  %v3111_v32 = vpop.f32.mrb[90].mxu1 }
 0x1cc   : > { %v3621_v35 = vmax.f32 %v5313_v3, %v2463_v31  ;;  %v3793_v36 = vmax.f32 %v5315_v4, %v3111_v32  ;;  %v2465_v37 = vpop.f32.mrb[91].mxu0  ;;  %v3113_v38 = vpop.f32.mrb[91].mxu1 }
 0x1ce   : > { %2675 = vmatmul.mubr.bf16.gmra.mrb[196].mxu0 %v4682_v29  ;;  %3323 = vmatmul.mubr.bf16.gmra.mrb[196].mxu1 %v4683_v30  ;;  %v4706_v29 = vld [vmem:[%s4936_s28 + $0x350] ss:$8 sps:$4 sm:$0xff]   ;;  %v4707_v30 = vld [vmem:[%s4936_s28 + $0x860] ss:$8 sps:$4 sm:$0xff]  }
 0x1cf   : > { %2682 = vmatprep.mubr.bf16.mxu0 %v4684_v33  ;;  %3330 = vmatprep.mubr.bf16.mxu1 %v4686_v34  ;;  %v4708_v33 = vld [vmem:[%s4936_s28 + $0x364] ss:$8 sps:$4 sm:$0xff]   ;;  %v4710_v34 = vld [vmem:[%s4936_s28 + $0x874] ss:$8 sps:$4 sm:$0xff]  }
 0x1d1   : > { %v2468_v39 = vpop.f32.mrb[92].mxu0  ;;  %v3116_v40 = vpop.f32.mrb[92].mxu1 }
 0x1d2   : > { %v3622_v41 = vmax.f32 %v5317_v9, %v2468_v39  ;;  %v3794_v42 = vmax.f32 %v5319_v10, %v3116_v40  ;;  %v2470_v43 = vpop.f32.mrb[93].mxu0  ;;  %v3118_v44 = vpop.f32.mrb[93].mxu1 }
 0x1d3   : > { %v2471_v47 = vpop.f32.mrb[94].mxu0  ;;  %v3119_v48 = vpop.f32.mrb[94].mxu1 }
 0x1d4   : > { %v3623_v51 = vmax.f32 %v5325_v19, %v2471_v47  ;;  %v3795_v52 = vmax.f32 %v5327_v20, %v3119_v48  ;;  %v2473_v53 = vpop.f32.mrb[95].mxu0  ;;  %v3121_v54 = vpop.f32.mrb[95].mxu1 }
 0x1d6   : > { %2683 = vmatmul.mubr.bf16.gmra.mrb[200].mxu0 %v4688_v45  ;;  %3331 = vmatmul.mubr.bf16.gmra.mrb[200].mxu1 %v4689_v46  ;;  %v4712_v45 = vld [vmem:[%s4936_s28 + $0x360] ss:$8 sps:$4 sm:$0xff]   ;;  %v4713_v46 = vld [vmem:[%s4936_s28 + $0x870] ss:$8 sps:$4 sm:$0xff]  }
 0x1d7   : > { %2690 = vmatprep.mubr.bf16.mxu0 %v4690_v49  ;;  %3338 = vmatprep.mubr.bf16.mxu1 %v4692_v50  ;;  %v4714_v49 = vld [vmem:[%s4936_s28 + $0x374] ss:$8 sps:$4 sm:$0xff]   ;;  %v4716_v50 = vld [vmem:[%s4936_s28 + $0x884] ss:$8 sps:$4 sm:$0xff]  }
 0x1d9   : > { %v2476_v55 = vpop.f32.mrb[96].mxu0  ;;  %v3124_v56 = vpop.f32.mrb[96].mxu1 }
 0x1da   : > { %v5345_v57 = vmax.f32 %v3620_v25, %v2476_v55  ;;  %v5347_v58 = vmax.f32 %v3792_v26, %v3124_v56  ;;  %v2478_v59 = vpop.f32.mrb[97].mxu0  ;;  %v3126_v60 = vpop.f32.mrb[97].mxu1 }
 0x1db   : > { %v2479_v63 = vpop.f32.mrb[98].mxu0  ;;  %v3127_v0 = vpop.f32.mrb[98].mxu1 }
 0x1dc   : > { %v5353_v3 = vmax.f32 %v3621_v35, %v2479_v63  ;;  %v5355_v4 = vmax.f32 %v3793_v36, %v3127_v0  ;;  %v2481_v5 = vpop.f32.mrb[99].mxu0  ;;  %v3129_v6 = vpop.f32.mrb[99].mxu1 }
 0x1de   : > { %2691 = vmatmul.mubr.bf16.gmra.mrb[204].mxu0 %v4694_v61  ;;  %3339 = vmatmul.mubr.bf16.gmra.mrb[204].mxu1 %v4695_v62  ;;  %v4718_v61 = vld [vmem:[%s4936_s28 + $0x370] ss:$8 sps:$4 sm:$0xff]   ;;  %v4719_v62 = vld [vmem:[%s4936_s28 + $0x880] ss:$8 sps:$4 sm:$0xff]  }
 0x1df   : > { %2698 = vmatprep.mubr.bf16.mxu0 %v4696_v1  ;;  %3346 = vmatprep.mubr.bf16.mxu1 %v4698_v2  ;;  %v4720_v1 = vld [vmem:[%s4936_s28 + $0x384] ss:$8 sps:$4 sm:$0xff]   ;;  %v4722_v2 = vld [vmem:[%s4936_s28 + $0x894] ss:$8 sps:$4 sm:$0xff]  }
 0x1e1   : > { %v2484_v7 = vpop.f32.mrb[100].mxu0  ;;  %v3132_v8 = vpop.f32.mrb[100].mxu1 }
 0x1e2   : > { %v5357_v9 = vmax.f32 %v3622_v41, %v2484_v7  ;;  %v5359_v10 = vmax.f32 %v3794_v42, %v3132_v8  ;;  %v2486_v11 = vpop.f32.mrb[101].mxu0  ;;  %v3134_v12 = vpop.f32.mrb[101].mxu1 }
 0x1e3   : > { %v2487_v15 = vpop.f32.mrb[102].mxu0  ;;  %v3135_v16 = vpop.f32.mrb[102].mxu1 }
 0x1e4   : > { %v5365_v19 = vmax.f32 %v3623_v51, %v2487_v15  ;;  %v5367_v20 = vmax.f32 %v3795_v52, %v3135_v16  ;;  %v2489_v21 = vpop.f32.mrb[103].mxu0  ;;  %v3137_v22 = vpop.f32.mrb[103].mxu1 }
 0x1e6   : > { %2699 = vmatmul.mubr.bf16.gmra.mrb[208].mxu0 %v4700_v13  ;;  %3347 = vmatmul.mubr.bf16.gmra.mrb[208].mxu1 %v4701_v14  ;;  %v4724_v13 = vld [vmem:[%s4936_s28 + $0x380] ss:$8 sps:$4 sm:$0xff]   ;;  %v4725_v14 = vld [vmem:[%s4936_s28 + $0x890] ss:$8 sps:$4 sm:$0xff]  }
 0x1e7   : > { %2706 = vmatprep.mubr.bf16.mxu0 %v4702_v17  ;;  %3354 = vmatprep.mubr.bf16.mxu1 %v4704_v18  ;;  %v4726_v17 = vld [vmem:[%s4936_s28 + $0x394] ss:$8 sps:$4 sm:$0xff]   ;;  %v4728_v18 = vld [vmem:[%s4936_s28 + $0x8a4] ss:$8 sps:$4 sm:$0xff]  }
 0x1e9   : > { %v2492_v23 = vpop.f32.mrb[104].mxu0  ;;  %v3140_v24 = vpop.f32.mrb[104].mxu1 }
 0x1ea   : > { %v3628_v25 = vmax.f32 %v5345_v57, %v2492_v23  ;;  %v3800_v26 = vmax.f32 %v5347_v58, %v3140_v24  ;;  %v2494_v27 = vpop.f32.mrb[105].mxu0  ;;  %v3142_v28 = vpop.f32.mrb[105].mxu1 }
 0x1eb   : > { %v2495_v31 = vpop.f32.mrb[106].mxu0  ;;  %v3143_v32 = vpop.f32.mrb[106].mxu1 }
 0x1ec   : > { %v3629_v35 = vmax.f32 %v5353_v3, %v2495_v31  ;;  %v3801_v36 = vmax.f32 %v5355_v4, %v3143_v32  ;;  %v2497_v37 = vpop.f32.mrb[107].mxu0  ;;  %v3145_v38 = vpop.f32.mrb[107].mxu1 }
 0x1ee   : > { %2707 = vmatmul.mubr.bf16.gmra.mrb[212].mxu0 %v4706_v29  ;;  %3355 = vmatmul.mubr.bf16.gmra.mrb[212].mxu1 %v4707_v30  ;;  %v4730_v29 = vld [vmem:[%s4936_s28 + $0x390] ss:$8 sps:$4 sm:$0xff]   ;;  %v4731_v30 = vld [vmem:[%s4936_s28 + $0x8a0] ss:$8 sps:$4 sm:$0xff]  }
 0x1ef   : > { %2714 = vmatprep.mubr.bf16.mxu0 %v4708_v33  ;;  %3362 = vmatprep.mubr.bf16.mxu1 %v4710_v34  ;;  %v4732_v33 = vld [vmem:[%s4936_s28 + $0x3a4] ss:$8 sps:$4 sm:$0xff]   ;;  %v4734_v34 = vld [vmem:[%s4936_s28 + $0x8b4] ss:$8 sps:$4 sm:$0xff]  }
 0x1f1   : > { %v2500_v39 = vpop.f32.mrb[108].mxu0  ;;  %v3148_v40 = vpop.f32.mrb[108].mxu1 }
 0x1f2   : > { %v3630_v41 = vmax.f32 %v5357_v9, %v2500_v39  ;;  %v3802_v42 = vmax.f32 %v5359_v10, %v3148_v40  ;;  %v2502_v43 = vpop.f32.mrb[109].mxu0  ;;  %v3150_v44 = vpop.f32.mrb[109].mxu1 }
 0x1f3   : > { %v2503_v47 = vpop.f32.mrb[110].mxu0  ;;  %v3151_v48 = vpop.f32.mrb[110].mxu1 }
 0x1f4   : > { %v3631_v51 = vmax.f32 %v5365_v19, %v2503_v47  ;;  %v3803_v52 = vmax.f32 %v5367_v20, %v3151_v48  ;;  %v2505_v53 = vpop.f32.mrb[111].mxu0  ;;  %v3153_v54 = vpop.f32.mrb[111].mxu1 }
 0x1f6   : > { %2715 = vmatmul.mubr.bf16.gmra.mrb[216].mxu0 %v4712_v45  ;;  %3363 = vmatmul.mubr.bf16.gmra.mrb[216].mxu1 %v4713_v46  ;;  %v4736_v45 = vld [vmem:[%s4936_s28 + $0x3a0] ss:$8 sps:$4 sm:$0xff]   ;;  %v4737_v46 = vld [vmem:[%s4936_s28 + $0x8b0] ss:$8 sps:$4 sm:$0xff]  }
 0x1f7   : > { %2722 = vmatprep.mubr.bf16.mxu0 %v4714_v49  ;;  %3370 = vmatprep.mubr.bf16.mxu1 %v4716_v50  ;;  %v4738_v49 = vld [vmem:[%s4936_s28 + $0x3b4] ss:$8 sps:$4 sm:$0xff]   ;;  %v4740_v50 = vld [vmem:[%s4936_s28 + $0x8c4] ss:$8 sps:$4 sm:$0xff]  }
 0x1f9   : > { %v2508_v55 = vpop.f32.mrb[112].mxu0  ;;  %v3156_v56 = vpop.f32.mrb[112].mxu1 }
 0x1fa   : > { %v5385_v57 = vmax.f32 %v3628_v25, %v2508_v55  ;;  %v5387_v58 = vmax.f32 %v3800_v26, %v3156_v56  ;;  %v2510_v59 = vpop.f32.mrb[113].mxu0  ;;  %v3158_v60 = vpop.f32.mrb[113].mxu1 }
 0x1fb   : > { %v2511_v63 = vpop.f32.mrb[114].mxu0  ;;  %v3159_v0 = vpop.f32.mrb[114].mxu1 }
 0x1fc   : > { %v5393_v3 = vmax.f32 %v3629_v35, %v2511_v63  ;;  %v5395_v4 = vmax.f32 %v3801_v36, %v3159_v0  ;;  %v2513_v5 = vpop.f32.mrb[115].mxu0  ;;  %v3161_v6 = vpop.f32.mrb[115].mxu1 }
 0x1fe   : > { %2723 = vmatmul.mubr.bf16.gmra.mrb[220].mxu0 %v4718_v61  ;;  %3371 = vmatmul.mubr.bf16.gmra.mrb[220].mxu1 %v4719_v62  ;;  %v4742_v61 = vld [vmem:[%s4936_s28 + $0x3b0] ss:$8 sps:$4 sm:$0xff]   ;;  %v4743_v62 = vld [vmem:[%s4936_s28 + $0x8c0] ss:$8 sps:$4 sm:$0xff]  }
 0x1ff   : > { %2730 = vmatprep.mubr.bf16.mxu0 %v4720_v1  ;;  %3378 = vmatprep.mubr.bf16.mxu1 %v4722_v2  ;;  %v4744_v1 = vld [vmem:[%s4936_s28 + $0x3c4] ss:$8 sps:$4 sm:$0xff]   ;;  %v4746_v2 = vld [vmem:[%s4936_s28 + $0x8d4] ss:$8 sps:$4 sm:$0xff]  }
 0x201   : > { %v2516_v7 = vpop.f32.mrb[116].mxu0  ;;  %v3164_v8 = vpop.f32.mrb[116].mxu1 }
 0x202   : > { %v5397_v9 = vmax.f32 %v3630_v41, %v2516_v7  ;;  %v5399_v10 = vmax.f32 %v3802_v42, %v3164_v8  ;;  %v2518_v11 = vpop.f32.mrb[117].mxu0  ;;  %v3166_v12 = vpop.f32.mrb[117].mxu1 }
 0x203   : > { %v2519_v15 = vpop.f32.mrb[118].mxu0  ;;  %v3167_v16 = vpop.f32.mrb[118].mxu1 }
 0x204   : > { %v5405_v19 = vmax.f32 %v3631_v51, %v2519_v15  ;;  %v5407_v20 = vmax.f32 %v3803_v52, %v3167_v16  ;;  %v2521_v21 = vpop.f32.mrb[119].mxu0  ;;  %v3169_v22 = vpop.f32.mrb[119].mxu1 }
 0x206   : > { %2731 = vmatmul.mubr.bf16.gmra.mrb[224].mxu0 %v4724_v13  ;;  %3379 = vmatmul.mubr.bf16.gmra.mrb[224].mxu1 %v4725_v14  ;;  %v4748_v13 = vld [vmem:[%s4936_s28 + $0x3c0] ss:$8 sps:$4 sm:$0xff]   ;;  %v4749_v14 = vld [vmem:[%s4936_s28 + $0x8d0] ss:$8 sps:$4 sm:$0xff]  }
 0x207   : > { %2738 = vmatprep.mubr.bf16.mxu0 %v4726_v17  ;;  %3386 = vmatprep.mubr.bf16.mxu1 %v4728_v18  ;;  %v4750_v17 = vld [vmem:[%s4936_s28 + $0x3d4] ss:$8 sps:$4 sm:$0xff]   ;;  %v4752_v18 = vld [vmem:[%s4936_s28 + $0x8e4] ss:$8 sps:$4 sm:$0xff]  }
 0x209   : > { %v2524_v23 = vpop.f32.mrb[120].mxu0  ;;  %v3172_v24 = vpop.f32.mrb[120].mxu1 }
 0x20a   : > { %v3636_v25 = vmax.f32 %v5385_v57, %v2524_v23  ;;  %v3808_v26 = vmax.f32 %v5387_v58, %v3172_v24  ;;  %v2526_v27 = vpop.f32.mrb[121].mxu0  ;;  %v3174_v28 = vpop.f32.mrb[121].mxu1 }
 0x20b   : > { %v2527_v31 = vpop.f32.mrb[122].mxu0  ;;  %v3175_v32 = vpop.f32.mrb[122].mxu1 }
 0x20c   : > { %v3637_v35 = vmax.f32 %v5393_v3, %v2527_v31  ;;  %v3809_v36 = vmax.f32 %v5395_v4, %v3175_v32  ;;  %v2529_v37 = vpop.f32.mrb[123].mxu0  ;;  %v3177_v38 = vpop.f32.mrb[123].mxu1 }
 0x20e   : > { %2739 = vmatmul.mubr.bf16.gmra.mrb[228].mxu0 %v4730_v29  ;;  %3387 = vmatmul.mubr.bf16.gmra.mrb[228].mxu1 %v4731_v30  ;;  %v4754_v29 = vld [vmem:[%s4936_s28 + $0x3d0] ss:$8 sps:$4 sm:$0xff]   ;;  %v4755_v30 = vld [vmem:[%s4936_s28 + $0x8e0] ss:$8 sps:$4 sm:$0xff]  }
 0x20f   : > { %2746 = vmatprep.mubr.bf16.mxu0 %v4732_v33  ;;  %3394 = vmatprep.mubr.bf16.mxu1 %v4734_v34  ;;  %v4756_v33 = vld [vmem:[%s4936_s28 + $0x3e4] ss:$8 sps:$4 sm:$0xff]   ;;  %v4758_v34 = vld [vmem:[%s4936_s28 + $0x8f4] ss:$8 sps:$4 sm:$0xff]  }
 0x211   : > { %v2532_v39 = vpop.f32.mrb[124].mxu0  ;;  %v3180_v40 = vpop.f32.mrb[124].mxu1 }
 0x212   : > { %v3638_v41 = vmax.f32 %v5397_v9, %v2532_v39  ;;  %v3810_v42 = vmax.f32 %v5399_v10, %v3180_v40  ;;  %v2534_v43 = vpop.f32.mrb[125].mxu0  ;;  %v3182_v44 = vpop.f32.mrb[125].mxu1 }
 0x213   : > { %v2535_v47 = vpop.f32.mrb[126].mxu0  ;;  %v3183_v48 = vpop.f32.mrb[126].mxu1 }
 0x214   : > { %v3639_v51 = vmax.f32 %v5405_v19, %v2535_v47  ;;  %v3811_v52 = vmax.f32 %v5407_v20, %v3183_v48  ;;  %v2537_v53 = vpop.f32.mrb[127].mxu0  ;;  %v3185_v54 = vpop.f32.mrb[127].mxu1 }
 0x216   : > { %2747 = vmatmul.mubr.bf16.gmra.mrb[232].mxu0 %v4736_v45  ;;  %3395 = vmatmul.mubr.bf16.gmra.mrb[232].mxu1 %v4737_v46  ;;  %v4760_v45 = vld [vmem:[%s4936_s28 + $0x3e0] ss:$8 sps:$4 sm:$0xff]   ;;  %v4761_v46 = vld [vmem:[%s4936_s28 + $0x8f0] ss:$8 sps:$4 sm:$0xff]  }
 0x217   : > { %2754 = vmatprep.mubr.bf16.mxu0 %v4738_v49  ;;  %3402 = vmatprep.mubr.bf16.mxu1 %v4740_v50  ;;  %v4762_v49 = vld [vmem:[%s4936_s28 + $0x3f4] ss:$8 sps:$4 sm:$0xff]   ;;  %v4764_v50 = vld [vmem:[%s4936_s28 + $0x904] ss:$8 sps:$4 sm:$0xff]  }
 0x219   : > { %v2540_v55 = vpop.f32.mrb[128].mxu0  ;;  %v3188_v56 = vpop.f32.mrb[128].mxu1 }
 0x21a   : > { %v5425_v57 = vmax.f32 %v3636_v25, %v2540_v55  ;;  %v5427_v58 = vmax.f32 %v3808_v26, %v3188_v56  ;;  %v2542_v59 = vpop.f32.mrb[129].mxu0  ;;  %v3190_v60 = vpop.f32.mrb[129].mxu1 }
 0x21b   : > { %v2543_v63 = vpop.f32.mrb[130].mxu0  ;;  %v3191_v0 = vpop.f32.mrb[130].mxu1 }
 0x21c   : > { %v5433_v3 = vmax.f32 %v3637_v35, %v2543_v63  ;;  %v5435_v4 = vmax.f32 %v3809_v36, %v3191_v0  ;;  %v2545_v5 = vpop.f32.mrb[131].mxu0  ;;  %v3193_v6 = vpop.f32.mrb[131].mxu1 }
 0x21e   : > { %2755 = vmatmul.mubr.bf16.gmra.mrb[236].mxu0 %v4742_v61  ;;  %3403 = vmatmul.mubr.bf16.gmra.mrb[236].mxu1 %v4743_v62  ;;  %v4766_v61 = vld [vmem:[%s4936_s28 + $0x3f0] ss:$8 sps:$4 sm:$0xff]   ;;  %v4767_v62 = vld [vmem:[%s4936_s28 + $0x900] ss:$8 sps:$4 sm:$0xff]  }
 0x21f   : > { %2762 = vmatprep.mubr.bf16.mxu0 %v4744_v1  ;;  %3410 = vmatprep.mubr.bf16.mxu1 %v4746_v2  ;;  %v4770_v1 = vld [vmem:[%s4936_s28 + $0x404] ss:$8 sps:$4 sm:$0xff]   ;;  %v4773_v2 = vld [vmem:[%s4936_s28 + $0x914] ss:$8 sps:$4 sm:$0xff]  }
 0x221   : > { %v2548_v7 = vpop.f32.mrb[132].mxu0  ;;  %v3196_v8 = vpop.f32.mrb[132].mxu1 }
 0x222   : > { %v5437_v9 = vmax.f32 %v3638_v41, %v2548_v7  ;;  %v5439_v10 = vmax.f32 %v3810_v42, %v3196_v8  ;;  %v2550_v11 = vpop.f32.mrb[133].mxu0  ;;  %v3198_v12 = vpop.f32.mrb[133].mxu1 }
 0x223   : > { %v2551_v15 = vpop.f32.mrb[134].mxu0  ;;  %v3199_v16 = vpop.f32.mrb[134].mxu1 }
 0x224   : > { %v5445_v19 = vmax.f32 %v3639_v51, %v2551_v15  ;;  %v5447_v20 = vmax.f32 %v3811_v52, %v3199_v16  ;;  %v2553_v21 = vpop.f32.mrb[135].mxu0  ;;  %v3201_v22 = vpop.f32.mrb[135].mxu1 }
 0x226   : > { %2763 = vmatmul.mubr.bf16.gmra.mrb[240].mxu0 %v4748_v13  ;;  %3411 = vmatmul.mubr.bf16.gmra.mrb[240].mxu1 %v4749_v14  ;;  %v4768_v13 = vld [vmem:[%s4936_s28 + $0x400] ss:$8 sps:$4 sm:$0xff]   ;;  %v4771_v14 = vld [vmem:[%s4936_s28 + $0x910] ss:$8 sps:$4 sm:$0xff]  }
 0x227   : > { %2770 = vmatprep.mubr.bf16.mxu0 %v4750_v17  ;;  %3418 = vmatprep.mubr.bf16.mxu1 %v4752_v18  ;;  %v4776_v17 = vld [vmem:[%s4936_s28 + $0x414] ss:$8 sps:$4 sm:$0xff]   ;;  %v4779_v18 = vld [vmem:[%s4936_s28 + $0x924] ss:$8 sps:$4 sm:$0xff]  }
 0x229   : > { %v2556_v23 = vpop.f32.mrb[136].mxu0  ;;  %v3204_v24 = vpop.f32.mrb[136].mxu1 }
 0x22a   : > { %v3644_v25 = vmax.f32 %v5425_v57, %v2556_v23  ;;  %v3816_v26 = vmax.f32 %v5427_v58, %v3204_v24  ;;  %v2558_v27 = vpop.f32.mrb[137].mxu0  ;;  %v3206_v28 = vpop.f32.mrb[137].mxu1 }
 0x22b   : > { %v2559_v31 = vpop.f32.mrb[138].mxu0  ;;  %v3207_v32 = vpop.f32.mrb[138].mxu1 }
 0x22c   : > { %v3645_v35 = vmax.f32 %v5433_v3, %v2559_v31  ;;  %v3817_v36 = vmax.f32 %v5435_v4, %v3207_v32  ;;  %v2561_v37 = vpop.f32.mrb[139].mxu0  ;;  %v3209_v38 = vpop.f32.mrb[139].mxu1 }
 0x22e   : > { %2771 = vmatmul.mubr.bf16.gmra.mrb[244].mxu0 %v4754_v29  ;;  %3419 = vmatmul.mubr.bf16.gmra.mrb[244].mxu1 %v4755_v30  ;;  %v4774_v29 = vld [vmem:[%s4936_s28 + $0x410] ss:$8 sps:$4 sm:$0xff]   ;;  %v4777_v30 = vld [vmem:[%s4936_s28 + $0x920] ss:$8 sps:$4 sm:$0xff]  }
 0x22f   : > { %2778 = vmatprep.mubr.bf16.mxu0 %v4756_v33  ;;  %3426 = vmatprep.mubr.bf16.mxu1 %v4758_v34  ;;  %v4782_v33 = vld [vmem:[%s4936_s28 + $0x424] ss:$8 sps:$4 sm:$0xff]   ;;  %v4785_v34 = vld [vmem:[%s4936_s28 + $0x934] ss:$8 sps:$4 sm:$0xff]  }
 0x231   : > { %v2564_v39 = vpop.f32.mrb[140].mxu0  ;;  %v3212_v40 = vpop.f32.mrb[140].mxu1 }
 0x232   : > { %v3646_v41 = vmax.f32 %v5437_v9, %v2564_v39  ;;  %v3818_v42 = vmax.f32 %v5439_v10, %v3212_v40  ;;  %v2566_v43 = vpop.f32.mrb[141].mxu0  ;;  %v3214_v44 = vpop.f32.mrb[141].mxu1 }
 0x233   : > { %v2567_v47 = vpop.f32.mrb[142].mxu0  ;;  %v3215_v48 = vpop.f32.mrb[142].mxu1 }
 0x234   : > { %v3647_v51 = vmax.f32 %v5445_v19, %v2567_v47  ;;  %v3819_v52 = vmax.f32 %v5447_v20, %v3215_v48  ;;  %v2569_v53 = vpop.f32.mrb[143].mxu0  ;;  %v3217_v54 = vpop.f32.mrb[143].mxu1 }
 0x236   : > { %2779 = vmatmul.mubr.bf16.gmra.mrb[248].mxu0 %v4760_v45  ;;  %3427 = vmatmul.mubr.bf16.gmra.mrb[248].mxu1 %v4761_v46  ;;  %v4783_v46 = vld [vmem:[%s4936_s28 + $0x930] ss:$8 sps:$4 sm:$0xff]  }
 0x237   : > { %2786 = vmatprep.mubr.bf16.mxu0 %v4762_v49  ;;  %3434 = vmatprep.mubr.bf16.mxu1 %v4764_v50  ;;  %v4788_v49 = vld [vmem:[%s4936_s28 + $0x434] ss:$8 sps:$4 sm:$0xff]   ;;  %v4791_v50 = vld [vmem:[%s4936_s28 + $0x944] ss:$8 sps:$4 sm:$0xff]  }
 0x239   : > { %v2572_v55 = vpop.f32.mrb[144].mxu0  ;;  %v3220_v56 = vpop.f32.mrb[144].mxu1 }
 0x23a   : > { %v5465_v57 = vmax.f32 %v3644_v25, %v2572_v55  ;;  %v5467_v58 = vmax.f32 %v3816_v26, %v3220_v56  ;;  %v2574_v59 = vpop.f32.mrb[145].mxu0  ;;  %v3222_v60 = vpop.f32.mrb[145].mxu1 }
 0x23b   : > { %v2575_v63 = vpop.f32.mrb[146].mxu0  ;;  %v3223_v0 = vpop.f32.mrb[146].mxu1 }
 0x23c   : > { %v5473_v3 = vmax.f32 %v3645_v35, %v2575_v63  ;;  %v5475_v4 = vmax.f32 %v3817_v36, %v3223_v0  ;;  %v2577_v5 = vpop.f32.mrb[147].mxu0  ;;  %v3225_v6 = vpop.f32.mrb[147].mxu1  ;;  %v4786_v63 = vld [vmem:[%s4936_s28 + $0x430] ss:$8 sps:$4 sm:$0xff]   ;;  %v4789_v0 = vld [vmem:[%s4936_s28 + $0x940] ss:$8 sps:$4 sm:$0xff]  }
 0x23e   : > { %2787 = vmatmul.mubr.bf16.gmra.mrb[252].mxu0 %v4766_v61  ;;  %3435 = vmatmul.mubr.bf16.gmra.mrb[252].mxu1 %v4767_v62 }
 0x23f   : > { %2794 = vmatprep.mubr.bf16.mxu0 %v4770_v1  ;;  %3442 = vmatprep.mubr.bf16.mxu1 %v4773_v2 }
 0x241   : > { %v2580_v7 = vpop.f32.mrb[148].mxu0  ;;  %v3228_v8 = vpop.f32.mrb[148].mxu1 }
 0x242   : > { %v3650_v9 = vmax.f32 %v3646_v41, %v2580_v7  ;;  %v3822_v10 = vmax.f32 %v3818_v42, %v3228_v8  ;;  %v2582_v11 = vpop.f32.mrb[149].mxu0  ;;  %v3230_v12 = vpop.f32.mrb[149].mxu1  ;;  %v4780_v41 = vld [vmem:[%s4936_s28 + $0x420] ss:$8 sps:$4 sm:$0xff]  }
 0x243   : > { %v2583_v15 = vpop.f32.mrb[150].mxu0  ;;  %v3231_v16 = vpop.f32.mrb[150].mxu1 }
 0x244   : > { %v3651_v19 = vmax.f32 %v3647_v51, %v2583_v15  ;;  %v3823_v20 = vmax.f32 %v3819_v52, %v3231_v16  ;;  %v2585_v21 = vpop.f32.mrb[151].mxu0  ;;  %v3233_v22 = vpop.f32.mrb[151].mxu1  ;;  %v4792_v15 = vld [vmem:[%s4936_s28 + $0x440] ss:$8 sps:$4 sm:$0xff]  }
 0x245   : > { %v4800_v22 = vld [vmem:[%s4936_s28 + $0x454] ss:$8 sps:$4 sm:$0xff]  }
 0x246   : > { %2795 = vmatmul.mubr.bf16.gmra.mrb[0].mxu0 %v4768_v13  ;;  %3443 = vmatmul.mubr.bf16.gmra.mrb[0].mxu1 %v4771_v14 }
 0x247   : > { %2802 = vmatprep.mubr.bf16.mxu0 %v4776_v17  ;;  %3450 = vmatprep.mubr.bf16.mxu1 %v4779_v18 }
 0x249   : > { %v2588_v23 = vpop.f32.mrb[152].mxu0  ;;  %v3236_v24 = vpop.f32.mrb[152].mxu1 }
 0x24a   : > { %v3652_v25 = vmax.f32 %v5465_v57, %v2588_v23  ;;  %v3824_v26 = vmax.f32 %v5467_v58, %v3236_v24  ;;  %v2590_v27 = vpop.f32.mrb[153].mxu0  ;;  %v3238_v28 = vpop.f32.mrb[153].mxu1  ;;  %v4803_v23 = vld [vmem:[%s4936_s28 + $0x964] ss:$8 sps:$4 sm:$0xff]  }
 0x24b   : > { %v2591_v31 = vpop.f32.mrb[154].mxu0  ;;  %v3239_v32 = vpop.f32.mrb[154].mxu1 }
 0x24c   : > { %v3653_v35 = vmax.f32 %v5473_v3, %v2591_v31  ;;  %v3825_v36 = vmax.f32 %v5475_v4, %v3239_v32  ;;  %v2593_v37 = vpop.f32.mrb[155].mxu0  ;;  %v3241_v38 = vpop.f32.mrb[155].mxu1  ;;  %v4794_v3 = vld [vmem:[%s4936_s28 + $0x444] ss:$8 sps:$4 sm:$0xff]   ;;  %v4797_v4 = vld [vmem:[%s4936_s28 + $0x954] ss:$8 sps:$4 sm:$0xff]  }
 0x24d   : > { %v4801_v31 = vld [vmem:[%s4936_s28 + $0x960] ss:$8 sps:$4 sm:$0xff]  }
 0x24e   : > { %2803 = vmatmul.mubr.bf16.gmra.mrb[4].mxu0 %v4774_v29  ;;  %3451 = vmatmul.mubr.bf16.gmra.mrb[4].mxu1 %v4777_v30  ;;  %v4798_v30 = vld [vmem:[%s4936_s28 + $0x450] ss:$8 sps:$4 sm:$0xff]  }
 0x24f   : > { %2810 = vmatprep.mubr.bf16.mxu0 %v4782_v33  ;;  %3458 = vmatprep.mubr.bf16.mxu1 %v4785_v34  ;;  %v4806_v34 = vld [vmem:[%s4936_s28 + $0x464] ss:$8 sps:$4 sm:$0xff]  }
 0x251   : > { %v2596_v39 = vpop.f32.mrb[156].mxu0  ;;  %v3244_v40 = vpop.f32.mrb[156].mxu1 }
 0x252   : > { %v3654_v42 = vmax.f32 %v3650_v9, %v2596_v39  ;;  %v3826_v43 = vmax.f32 %v3822_v10, %v3244_v40  ;;  %v2598_v44 = vpop.f32.mrb[157].mxu0  ;;  %v3246_v45 = vpop.f32.mrb[157].mxu1  ;;  %v4323_v9 = vld [vmem:[%s5650_s2] ss:$0 sm:$0xff] }
 0x253   : > { %v2599_v47 = vpop.f32.mrb[158].mxu0  ;;  %v3247_v48 = vpop.f32.mrb[158].mxu1 }
 0x254   : > { %v3655_v51 = vmax.f32 %v3651_v19, %v2599_v47  ;;  %v3827_v52 = vmax.f32 %v3823_v20, %v3247_v48  ;;  %v2601_v53 = vpop.f32.mrb[159].mxu0  ;;  %v3249_v54 = vpop.f32.mrb[159].mxu1  ;;  %v4795_v19 = vld [vmem:[%s4936_s28 + $0x950] ss:$8 sps:$4 sm:$0xff]  }
 0x255   : > { %v4807_v47 = vld [vmem:[%s4936_s28 + $0x970] ss:$8 sps:$4 sm:$0xff]  }
 0x256   : > { %v3658_v55 = vmax.f32 %v3654_v42, %v3655_v51  ;;  %v5495_v56 = vmax.f32 %v3826_v43, %v3827_v52  ;;  %2811 = vmatmul.mubr.bf16.gmra.mrb[8].mxu0 %v4780_v41  ;;  %3459 = vmatmul.mubr.bf16.gmra.mrb[8].mxu1 %v4783_v46  ;;  %v4804_v46 = vld [vmem:[%s4936_s28 + $0x460] ss:$8 sps:$4 sm:$0xff]   ;;  %v4815_v51 = vld [vmem:[%s4936_s28 + $0x984] ss:$8 sps:$4 sm:$0xff]  }
 0x257   : > { %2818 = vmatprep.mubr.bf16.mxu0 %v4788_v49  ;;  %3466 = vmatprep.mubr.bf16.mxu1 %v4791_v50  ;;  %v4812_v50 = vld [vmem:[%s4936_s28 + $0x474] ss:$8 sps:$4 sm:$0xff]  }
 0x259   : > { %v2604_v57 = vpop.f32.mrb[160].mxu0  ;;  %v3252_v58 = vpop.f32.mrb[160].mxu1 }
 0x25a   : > { %v3656_v59 = vmax.f32 %v3652_v25, %v2604_v57  ;;  %v3828_v60 = vmax.f32 %v3824_v26, %v3252_v58  ;;  %v2606_v61 = vpop.f32.mrb[161].mxu0  ;;  %v3254_v62 = vpop.f32.mrb[161].mxu1 }
 0x25b   : > { %v5499_v1 = vpop.f32.mrb[162].mxu0  ;;  %v5501_v2 = vpop.f32.mrb[162].mxu1 }
 0x25c   : > { %v3657_v5 = vmax.f32 %v3656_v59, %v3653_v35  ;;  %v5505_v6 = vmax.f32 %v3828_v60, %v3825_v36  ;;  %v2609_v7 = vpop.f32.mrb[163].mxu0  ;;  %v3257_v8 = vpop.f32.mrb[163].mxu1  ;;  %v4809_v35 = vld [vmem:[%s4936_s28 + $0x974] ss:$8 sps:$4 sm:$0xff]  }
 0x25e   : > { %v3659_v10 = vmax.f32 %v3657_v5, %v3658_v55  ;;  %v3831_v11 = vmax.f32 %v5505_v6, %v5495_v56  ;;  %2819 = vmatmul.mubr.bf16.gmra.mrb[12].mxu0 %v4786_v63  ;;  %3467 = vmatmul.mubr.bf16.gmra.mrb[12].mxu1 %v4789_v0  ;;  %v4810_v63 = vld [vmem:[%s4936_s28 + $0x470] ss:$8 sps:$4 sm:$0xff]   ;;  %v4813_v0 = vld [vmem:[%s4936_s28 + $0x980] ss:$8 sps:$4 sm:$0xff]  }
 0x25f   : > { %2826 = vmatprep.mubr.bf16.mxu0 %v4794_v3  ;;  %3474 = vmatprep.mubr.bf16.mxu1 %v4797_v4  ;;  %v4818_v3 = vld [vmem:[%s4936_s28 + $0x484] ss:$8 sps:$4 sm:$0xff]   ;;  %v4821_v4 = vld [vmem:[%s4936_s28 + $0x994] ss:$8 sps:$4 sm:$0xff]  }
 0x260   : > { %v3666_v12 = vadd.f32 %v4323_v9, %v3659_v10 }
 0x261   : > { %v5517_v13 = vpop.f32.mrb[164].mxu0  ;;  %v5519_v14 = vpop.f32.mrb[164].mxu1 }
 0x262   : > { %v3667_v16 = vmax.f32 %v3666_v12, 0.0  ;;  %v2614_v17 = vpop.f32.mrb[165].mxu0  ;;  %v3262_v18 = vpop.f32.mrb[165].mxu1 }
 0x263   : > { %v5523_v20 = vpop.f32.mrb[166].mxu0  ;;  %v5525_v21 = vpop.f32.mrb[166].mxu1  ;;  %v4816_v17 = vld [vmem:[%s4936_s28 + $0x480] ss:$8 sps:$4 sm:$0xff]   ;;  %v4819_v18 = vld [vmem:[%s4936_s28 + $0x990] ss:$8 sps:$4 sm:$0xff]  }
 0x264   : > { %3668 = vst [vmem:[%s5515_s5] sm:$0xff] %v3667_v16  ;;  %v2617_v24 = vpop.f32.mrb[167].mxu0  ;;  %v3265_v25 = vpop.f32.mrb[167].mxu1 }
 0x266   : > { %2827 = vmatmul.mubr.bf16.gmra.mrb[16].mxu0 %v4792_v15  ;;  %3475 = vmatmul.mubr.bf16.gmra.mrb[16].mxu1 %v4795_v19 }
 0x267   : > { %2834 = vmatprep.mubr.bf16.mxu0 %v4800_v22  ;;  %3482 = vmatprep.mubr.bf16.mxu1 %v4803_v23  ;;  %v4827_v22 = vld [vmem:[%s4936_s28 + $0x9a4] ss:$8 sps:$4 sm:$0xff]  }
 0x269   : > { %v5530_v26 = vpop.f32.mrb[168].mxu0  ;;  %v5532_v27 = vpop.f32.mrb[168].mxu1 }
 0x26a   : > { %v2622_v28 = vpop.f32.mrb[169].mxu0  ;;  %v3270_v29 = vpop.f32.mrb[169].mxu1 }
 0x26b   : > { %v2623_v32 = vpop.f32.mrb[170].mxu0  ;;  %v3271_v33 = vpop.f32.mrb[170].mxu1 }
 0x26c   : > { %v3669_v36 = vmax.f32 %v5499_v1, %v2623_v32  ;;  %v3835_v37 = vmax.f32 %v5501_v2, %v3271_v33  ;;  %v2625_v38 = vpop.f32.mrb[171].mxu0  ;;  %v3273_v39 = vpop.f32.mrb[171].mxu1  ;;  %v4822_v33 = vld [vmem:[%s4936_s28 + $0x490] ss:$8 sps:$4 sm:$0xff]  }
 0x26d   : > { %v4833_v38 = vld [vmem:[%s4936_s28 + $0x9b4] ss:$8 sps:$4 sm:$0xff]  }
 0x26e   : > { %2835 = vmatmul.mubr.bf16.gmra.mrb[20].mxu0 %v4798_v30  ;;  %3483 = vmatmul.mubr.bf16.gmra.mrb[20].mxu1 %v4801_v31 }
 0x26f   : > { %2842 = vmatprep.mubr.bf16.mxu0 %v4806_v34  ;;  %3490 = vmatprep.mubr.bf16.mxu1 %v4809_v35  ;;  %v4825_v34 = vld [vmem:[%s4936_s28 + $0x9a0] ss:$8 sps:$4 sm:$0xff]  }
 0x271   : > { %v2628_v40 = vpop.f32.mrb[172].mxu0  ;;  %v3276_v41 = vpop.f32.mrb[172].mxu1 }
 0x272   : > { %v3670_v42 = vmax.f32 %v5517_v13, %v2628_v40  ;;  %v3836_v43 = vmax.f32 %v5519_v14, %v3276_v41  ;;  %v2630_v44 = vpop.f32.mrb[173].mxu0  ;;  %v3278_v45 = vpop.f32.mrb[173].mxu1 }
 0x273   : > { %v2631_v48 = vpop.f32.mrb[174].mxu0  ;;  %v3279_v49 = vpop.f32.mrb[174].mxu1 }
 0x274   : > { %v3671_v52 = vmax.f32 %v5523_v20, %v2631_v48  ;;  %v3837_v53 = vmax.f32 %v5525_v21, %v3279_v49  ;;  %v2633_v54 = vpop.f32.mrb[175].mxu0  ;;  %v3281_v55 = vpop.f32.mrb[175].mxu1  ;;  %v4824_v21 = vld [vmem:[%s4936_s28 + $0x494] ss:$8 sps:$4 sm:$0xff]   ;;  %v4828_v49 = vld [vmem:[%s4936_s28 + $0x4a0] ss:$8 sps:$4 sm:$0xff]  }
 0x275   : > { %v4839_v54 = vld [vmem:[%s4936_s28 + $0x9c4] ss:$8 sps:$4 sm:$0xff]  }
 0x276   : > { %2843 = vmatmul.mubr.bf16.gmra.mrb[24].mxu0 %v4804_v46  ;;  %3491 = vmatmul.mubr.bf16.gmra.mrb[24].mxu1 %v4807_v47 }
 0x277   : > { %2850 = vmatprep.mubr.bf16.mxu0 %v4812_v50  ;;  %3498 = vmatprep.mubr.bf16.mxu1 %v4815_v51  ;;  %v4831_v50 = vld [vmem:[%s4936_s28 + $0x9b0] ss:$8 sps:$4 sm:$0xff]  }
 0x279   : > { %v2636_v57 = vpop.f32.mrb[176].mxu0  ;;  %v3284_v58 = vpop.f32.mrb[176].mxu1 }
 0x27a   : > { %v3672_v59 = vmax.f32 %v5530_v26, %v2636_v57  ;;  %v3838_v60 = vmax.f32 %v5532_v27, %v3284_v58  ;;  %v2638_v61 = vpop.f32.mrb[177].mxu0  ;;  %v3286_v62 = vpop.f32.mrb[177].mxu1 }
 0x27b   : > { %v2639_v1 = vpop.f32.mrb[178].mxu0  ;;  %v3287_v2 = vpop.f32.mrb[178].mxu1 }
 0x27c   : > { %v5554_v5 = vmax.f32 %v3669_v36, %v2639_v1  ;;  %v5556_v7 = vmax.f32 %v3835_v37, %v3287_v2  ;;  %v2641_v8 = vpop.f32.mrb[179].mxu0  ;;  %v3289_v9 = vpop.f32.mrb[179].mxu1  ;;  %v4830_v37 = vld [vmem:[%s4936_s28 + $0x4a4] ss:$8 sps:$4 sm:$0xff]   ;;  %v4834_v2 = vld [vmem:[%s4936_s28 + $0x4b0] ss:$8 sps:$4 sm:$0xff]  }
 0x27d   : > { %v4845_v8 = vld [vmem:[%s4936_s28 + $0x9d4] ss:$8 sps:$4 sm:$0xff]  }
 0x27e   : > { %2851 = vmatmul.mubr.bf16.gmra.mrb[28].mxu0 %v4810_v63  ;;  %3499 = vmatmul.mubr.bf16.gmra.mrb[28].mxu1 %v4813_v0 }
 0x27f   : > { %2858 = vmatprep.mubr.bf16.mxu0 %v4818_v3  ;;  %3506 = vmatprep.mubr.bf16.mxu1 %v4821_v4  ;;  %v4837_v3 = vld [vmem:[%s4936_s28 + $0x9c0] ss:$8 sps:$4 sm:$0xff]  }
 0x281   : > { %v2644_v10 = vpop.f32.mrb[180].mxu0  ;;  %v3292_v12 = vpop.f32.mrb[180].mxu1 }
 0x282   : > { %v5558_v13 = vmax.f32 %v3670_v42, %v2644_v10  ;;  %v5560_v14 = vmax.f32 %v3836_v43, %v3292_v12  ;;  %v2646_v15 = vpop.f32.mrb[181].mxu0  ;;  %v3294_v16 = vpop.f32.mrb[181].mxu1 }
 0x283   : > { %v2647_v19 = vpop.f32.mrb[182].mxu0  ;;  %v3295_v20 = vpop.f32.mrb[182].mxu1 }
 0x284   : > { %v5566_v23 = vmax.f32 %v3671_v52, %v2647_v19  ;;  %v5568_v24 = vmax.f32 %v3837_v53, %v3295_v20  ;;  %v2649_v25 = vpop.f32.mrb[183].mxu0  ;;  %v3297_v26 = vpop.f32.mrb[183].mxu1  ;;  %v4836_v53 = vld [vmem:[%s4936_s28 + $0x4b4] ss:$8 sps:$4 sm:$0xff]   ;;  %v4840_v20 = vld [vmem:[%s4936_s28 + $0x4c0] ss:$8 sps:$4 sm:$0xff]  }
 0x285   : > { %v4851_v25 = vld [vmem:[%s4936_s28 + $0x9e4] ss:$8 sps:$4 sm:$0xff]  }
 0x286   : > { %2859 = vmatmul.mubr.bf16.gmra.mrb[32].mxu0 %v4816_v17  ;;  %3507 = vmatmul.mubr.bf16.gmra.mrb[32].mxu1 %v4819_v18 }
 0x287   : > { %2866 = vmatprep.mubr.bf16.mxu0 %v4824_v21  ;;  %3514 = vmatprep.mubr.bf16.mxu1 %v4827_v22  ;;  %v4843_v21 = vld [vmem:[%s4936_s28 + $0x9d0] ss:$8 sps:$4 sm:$0xff]  }
 0x289   : > { %v2652_v27 = vpop.f32.mrb[184].mxu0  ;;  %v3300_v28 = vpop.f32.mrb[184].mxu1 }
 0x28a   : > { %v5570_v29 = vmax.f32 %v3672_v59, %v2652_v27  ;;  %v5572_v30 = vmax.f32 %v3838_v60, %v3300_v28  ;;  %v2654_v31 = vpop.f32.mrb[185].mxu0  ;;  %v3302_v32 = vpop.f32.mrb[185].mxu1 }
 0x28b   : > { %v2655_v35 = vpop.f32.mrb[186].mxu0  ;;  %v3303_v36 = vpop.f32.mrb[186].mxu1 }
 0x28c   : > { %v3677_v39 = vmax.f32 %v5554_v5, %v2655_v35  ;;  %v3843_v40 = vmax.f32 %v5556_v7, %v3303_v36  ;;  %v2657_v41 = vpop.f32.mrb[187].mxu0  ;;  %v3305_v42 = vpop.f32.mrb[187].mxu1  ;;  %v4842_v7 = vld [vmem:[%s4936_s28 + $0x4c4] ss:$8 sps:$4 sm:$0xff]   ;;  %v4846_v36 = vld [vmem:[%s4936_s28 + $0x4d0] ss:$8 sps:$4 sm:$0xff]  }
 0x28d   : > { %v4857_v41 = vld [vmem:[%s4936_s28 + $0x9f4] ss:$8 sps:$4 sm:$0xff]  }
 0x28e   : > { %2867 = vmatmul.mubr.bf16.gmra.mrb[36].mxu0 %v4822_v33  ;;  %3515 = vmatmul.mubr.bf16.gmra.mrb[36].mxu1 %v4825_v34 }
 0x28f   : > { %2874 = vmatprep.mubr.bf16.mxu0 %v4830_v37  ;;  %3522 = vmatprep.mubr.bf16.mxu1 %v4833_v38  ;;  %v4849_v37 = vld [vmem:[%s4936_s28 + $0x9e0] ss:$8 sps:$4 sm:$0xff]  }
 0x291   : > { %v2660_v43 = vpop.f32.mrb[188].mxu0  ;;  %v3308_v44 = vpop.f32.mrb[188].mxu1 }
 0x292   : > { %v3678_v45 = vmax.f32 %v5558_v13, %v2660_v43  ;;  %v3844_v46 = vmax.f32 %v5560_v14, %v3308_v44  ;;  %v2662_v47 = vpop.f32.mrb[189].mxu0  ;;  %v3310_v48 = vpop.f32.mrb[189].mxu1 }
 0x293   : > { %v2663_v51 = vpop.f32.mrb[190].mxu0  ;;  %v3311_v52 = vpop.f32.mrb[190].mxu1 }
 0x294   : > { %v3679_v55 = vmax.f32 %v5566_v23, %v2663_v51  ;;  %v3845_v57 = vmax.f32 %v5568_v24, %v3311_v52  ;;  %v2665_v58 = vpop.f32.mrb[191].mxu0  ;;  %v3313_v59 = vpop.f32.mrb[191].mxu1  ;;  %v4848_v24 = vld [vmem:[%s4936_s28 + $0x4d4] ss:$8 sps:$4 sm:$0xff]   ;;  %v4852_v52 = vld [vmem:[%s4936_s28 + $0x4e0] ss:$8 sps:$4 sm:$0xff]  }
 0x295   : > { %v4863_v58 = vld [vmem:[%s4936_s28 + $0xa04] ss:$8 sps:$4 sm:$0xff]  }
 0x296   : > { %2875 = vmatmul.mubr.bf16.gmra.mrb[40].mxu0 %v4828_v49  ;;  %3523 = vmatmul.mubr.bf16.gmra.mrb[40].mxu1 %v4831_v50 }
 0x297   : > { %2882 = vmatprep.mubr.bf16.mxu0 %v4836_v53  ;;  %3530 = vmatprep.mubr.bf16.mxu1 %v4839_v54  ;;  %v4855_v53 = vld [vmem:[%s4936_s28 + $0x9f0] ss:$8 sps:$4 sm:$0xff]  }
 0x299   : > { %v2668_v60 = vpop.f32.mrb[192].mxu0  ;;  %v3316_v61 = vpop.f32.mrb[192].mxu1 }
 0x29a   : > { %v3680_v62 = vmax.f32 %v5570_v29, %v2668_v60  ;;  %v3846_v63 = vmax.f32 %v5572_v30, %v3316_v61  ;;  %v2670_v0 = vpop.f32.mrb[193].mxu0  ;;  %v3318_v1 = vpop.f32.mrb[193].mxu1 }
 0x29b   : > { %v2671_v4 = vpop.f32.mrb[194].mxu0  ;;  %v3319_v5 = vpop.f32.mrb[194].mxu1 }
 0x29c   : > { %v5594_v9 = vmax.f32 %v3677_v39, %v2671_v4  ;;  %v5596_v10 = vmax.f32 %v3843_v40, %v3319_v5  ;;  %v2673_v12 = vpop.f32.mrb[195].mxu0  ;;  %v3321_v13 = vpop.f32.mrb[195].mxu1  ;;  %v4854_v40 = vld [vmem:[%s4936_s28 + $0x4e4] ss:$8 sps:$4 sm:$0xff]   ;;  %v4858_v5 = vld [vmem:[%s4936_s28 + $0x4f0] ss:$8 sps:$4 sm:$0xff]  }
 0x29d   : > { %v4869_v12 = vld [vmem:[%s4936_s28 + $0xa14] ss:$8 sps:$4 sm:$0xff]  }
 0x29e   : > { %2883 = vmatmul.mubr.bf16.gmra.mrb[44].mxu0 %v4834_v2  ;;  %3531 = vmatmul.mubr.bf16.gmra.mrb[44].mxu1 %v4837_v3 }
 0x29f   : > { %2890 = vmatprep.mubr.bf16.mxu0 %v4842_v7  ;;  %3538 = vmatprep.mubr.bf16.mxu1 %v4845_v8  ;;  %v4861_v7 = vld [vmem:[%s4936_s28 + $0xa00] ss:$8 sps:$4 sm:$0xff]  }
 0x2a1   : > { %v2676_v14 = vpop.f32.mrb[196].mxu0  ;;  %v3324_v15 = vpop.f32.mrb[196].mxu1 }
 0x2a2   : > { %v5598_v16 = vmax.f32 %v3678_v45, %v2676_v14  ;;  %v5600_v17 = vmax.f32 %v3844_v46, %v3324_v15  ;;  %v2678_v18 = vpop.f32.mrb[197].mxu0  ;;  %v3326_v19 = vpop.f32.mrb[197].mxu1 }
 0x2a3   : > { %v2679_v22 = vpop.f32.mrb[198].mxu0  ;;  %v3327_v23 = vpop.f32.mrb[198].mxu1 }
 0x2a4   : > { %v5606_v26 = vmax.f32 %v3679_v55, %v2679_v22  ;;  %v5608_v27 = vmax.f32 %v3845_v57, %v3327_v23  ;;  %v2681_v28 = vpop.f32.mrb[199].mxu0  ;;  %v3329_v29 = vpop.f32.mrb[199].mxu1  ;;  %v4860_v57 = vld [vmem:[%s4936_s28 + $0x4f4] ss:$8 sps:$4 sm:$0xff]   ;;  %v4864_v23 = vld [vmem:[%s4936_s28 + $0x500] ss:$8 sps:$4 sm:$0xff]  }
 0x2a6   : > { %2891 = vmatmul.mubr.bf16.gmra.mrb[48].mxu0 %v4840_v20  ;;  %3539 = vmatmul.mubr.bf16.gmra.mrb[48].mxu1 %v4843_v21 }
 0x2a7   : > { %2898 = vmatprep.mubr.bf16.mxu0 %v4848_v24  ;;  %3546 = vmatprep.mubr.bf16.mxu1 %v4851_v25  ;;  %v4867_v24 = vld [vmem:[%s4936_s28 + $0xa10] ss:$8 sps:$4 sm:$0xff]  }
 0x2a9   : > { %v2684_v30 = vpop.f32.mrb[200].mxu0  ;;  %v3332_v31 = vpop.f32.mrb[200].mxu1 }
 0x2aa   : > { %v5610_v32 = vmax.f32 %v3680_v62, %v2684_v30  ;;  %v5612_v33 = vmax.f32 %v3846_v63, %v3332_v31  ;;  %v2686_v34 = vpop.f32.mrb[201].mxu0  ;;  %v3334_v35 = vpop.f32.mrb[201].mxu1 }
 0x2ab   : > { %v2687_v38 = vpop.f32.mrb[202].mxu0  ;;  %v3335_v39 = vpop.f32.mrb[202].mxu1 }
 0x2ac   : > { %v3685_v42 = vmax.f32 %v5594_v9, %v2687_v38  ;;  %v3851_v43 = vmax.f32 %v5596_v10, %v3335_v39  ;;  %v2689_v44 = vpop.f32.mrb[203].mxu0  ;;  %v3337_v45 = vpop.f32.mrb[203].mxu1  ;;  %v4866_v10 = vld [vmem:[%s4936_s28 + $0x504] ss:$8 sps:$4 sm:$0xff]  }
 0x2ae   : > { %2899 = vmatmul.mubr.bf16.gmra.mrb[52].mxu0 %v4846_v36  ;;  %3547 = vmatmul.mubr.bf16.gmra.mrb[52].mxu1 %v4849_v37 }
 0x2af   : > { %2906 = vmatprep.mubr.bf16.mxu0 %v4854_v40  ;;  %3554 = vmatprep.mubr.bf16.mxu1 %v4857_v41 }
 0x2b1   : > { %v2692_v46 = vpop.f32.mrb[204].mxu0  ;;  %v3340_v47 = vpop.f32.mrb[204].mxu1 }
 0x2b2   : > { %v3686_v48 = vmax.f32 %v5598_v16, %v2692_v46  ;;  %v3852_v49 = vmax.f32 %v5600_v17, %v3340_v47  ;;  %v2694_v50 = vpop.f32.mrb[205].mxu0  ;;  %v3342_v51 = vpop.f32.mrb[205].mxu1 }
 0x2b3   : > { %v2695_v54 = vpop.f32.mrb[206].mxu0  ;;  %v3343_v55 = vpop.f32.mrb[206].mxu1 }
 0x2b4   : > { %v3687_v59 = vmax.f32 %v5606_v26, %v2695_v54  ;;  %v3853_v60 = vmax.f32 %v5608_v27, %v3343_v55  ;;  %v2697_v61 = vpop.f32.mrb[207].mxu0  ;;  %v3345_v62 = vpop.f32.mrb[207].mxu1 }
 0x2b6   : > { %2907 = vmatmul.mubr.bf16.gmra.mrb[56].mxu0 %v4852_v52  ;;  %3555 = vmatmul.mubr.bf16.gmra.mrb[56].mxu1 %v4855_v53 }
 0x2b7   : > { %2914 = vmatprep.mubr.bf16.mxu0 %v4860_v57  ;;  %3562 = vmatprep.mubr.bf16.mxu1 %v4863_v58 }
 0x2b9   : > { %v2700_v63 = vpop.f32.mrb[208].mxu0  ;;  %v3348_v0 = vpop.f32.mrb[208].mxu1 }
 0x2ba   : > { %v3688_v1 = vmax.f32 %v5610_v32, %v2700_v63  ;;  %v3854_v2 = vmax.f32 %v5612_v33, %v3348_v0  ;;  %v2702_v3 = vpop.f32.mrb[209].mxu0  ;;  %v3350_v4 = vpop.f32.mrb[209].mxu1 }
 0x2bb   : > { %v2703_v8 = vpop.f32.mrb[210].mxu0  ;;  %v3351_v9 = vpop.f32.mrb[210].mxu1 }
 0x2bc   : > { %v3689_v13 = vmax.f32 %v3685_v42, %v2703_v8  ;;  %v3855_v14 = vmax.f32 %v3851_v43, %v3351_v9  ;;  %v2705_v15 = vpop.f32.mrb[211].mxu0  ;;  %v3353_v16 = vpop.f32.mrb[211].mxu1 }
 0x2be   : > { %2915 = vmatmul.mubr.bf16.gmra.mrb[60].mxu0 %v4858_v5  ;;  %3563 = vmatmul.mubr.bf16.gmra.mrb[60].mxu1 %v4861_v7 }
 0x2bf   : > { %2922 = vmatprep.mubr.bf16.mxu0 %v4866_v10  ;;  %3570 = vmatprep.mubr.bf16.mxu1 %v4869_v12 }
 0x2c1   : > { %v2708_v17 = vpop.f32.mrb[212].mxu0  ;;  %v3356_v18 = vpop.f32.mrb[212].mxu1 }
 0x2c2   : > { %v3690_v19 = vmax.f32 %v3686_v48, %v2708_v17  ;;  %v3856_v20 = vmax.f32 %v3852_v49, %v3356_v18  ;;  %v2710_v21 = vpop.f32.mrb[213].mxu0  ;;  %v3358_v22 = vpop.f32.mrb[213].mxu1 }
 0x2c3   : > { %v2711_v25 = vpop.f32.mrb[214].mxu0  ;;  %v3359_v26 = vpop.f32.mrb[214].mxu1 }
 0x2c4   : > { %v3691_v27 = vmax.f32 %v3687_v59, %v2711_v25  ;;  %v3857_v28 = vmax.f32 %v3853_v60, %v3359_v26  ;;  %v2713_v29 = vpop.f32.mrb[215].mxu0  ;;  %v3361_v30 = vpop.f32.mrb[215].mxu1 }
 0x2c6   : > { %2923 = vmatmul.mubr.bf16.gmra.mrb[64].mxu0 %v4864_v23  ;;  %3571 = vmatmul.mubr.bf16.gmra.mrb[64].mxu1 %v4867_v24 }
 0x2c9   : > { %v2716_v31 = vpop.f32.mrb[216].mxu0  ;;  %v3364_v32 = vpop.f32.mrb[216].mxu1 }
 0x2ca   : > { %v3692_v33 = vmax.f32 %v3688_v1, %v2716_v31  ;;  %v3858_v34 = vmax.f32 %v3854_v2, %v3364_v32  ;;  %v2718_v35 = vpop.f32.mrb[217].mxu0  ;;  %v3366_v36 = vpop.f32.mrb[217].mxu1 }
 0x2cb   : > { %v2719_v37 = vpop.f32.mrb[218].mxu0  ;;  %v3367_v38 = vpop.f32.mrb[218].mxu1 }
 0x2cc   : > { %v3693_v39 = vmax.f32 %v3689_v13, %v2719_v37  ;;  %v3859_v40 = vmax.f32 %v3855_v14, %v3367_v38  ;;  %v2721_v41 = vpop.f32.mrb[219].mxu0  ;;  %v3369_v42 = vpop.f32.mrb[219].mxu1 }
 0x2d1   : > { %v2724_v43 = vpop.f32.mrb[220].mxu0  ;;  %v3372_v44 = vpop.f32.mrb[220].mxu1 }
 0x2d2   : > { %v3694_v45 = vmax.f32 %v3690_v19, %v2724_v43  ;;  %v3860_v46 = vmax.f32 %v3856_v20, %v3372_v44  ;;  %v2726_v47 = vpop.f32.mrb[221].mxu0  ;;  %v3374_v48 = vpop.f32.mrb[221].mxu1 }
 0x2d3   : > { %v2727_v49 = vpop.f32.mrb[222].mxu0  ;;  %v3375_v50 = vpop.f32.mrb[222].mxu1 }
 0x2d4   : > { %v3695_v51 = vmax.f32 %v3691_v27, %v2727_v49  ;;  %v3861_v52 = vmax.f32 %v3857_v28, %v3375_v50  ;;  %v2729_v53 = vpop.f32.mrb[223].mxu0  ;;  %v3377_v54 = vpop.f32.mrb[223].mxu1 }
 0x2d9   : > { %v2732_v55 = vpop.f32.mrb[224].mxu0  ;;  %v3380_v57 = vpop.f32.mrb[224].mxu1 }
 0x2da   : > { %v3696_v58 = vmax.f32 %v3692_v33, %v2732_v55  ;;  %v3862_v59 = vmax.f32 %v3858_v34, %v3380_v57  ;;  %v2734_v60 = vpop.f32.mrb[225].mxu0  ;;  %v3382_v61 = vpop.f32.mrb[225].mxu1 }
 0x2db   : > { %v2735_v62 = vpop.f32.mrb[226].mxu0  ;;  %v3383_v63 = vpop.f32.mrb[226].mxu1 }
 0x2dc   : > { %v3697_v0 = vmax.f32 %v3693_v39, %v2735_v62  ;;  %v3863_v1 = vmax.f32 %v3859_v40, %v3383_v63  ;;  %v2737_v2 = vpop.f32.mrb[227].mxu0  ;;  %v3385_v3 = vpop.f32.mrb[227].mxu1 }
 0x2e1   : > { %v2740_v4 = vpop.f32.mrb[228].mxu0  ;;  %v3388_v5 = vpop.f32.mrb[228].mxu1 }
 0x2e2   : > { %v3698_v7 = vmax.f32 %v3694_v45, %v2740_v4  ;;  %v3864_v8 = vmax.f32 %v3860_v46, %v3388_v5  ;;  %v2742_v9 = vpop.f32.mrb[229].mxu0  ;;  %v3390_v10 = vpop.f32.mrb[229].mxu1 }
 0x2e3   : > { %v2743_v12 = vpop.f32.mrb[230].mxu0  ;;  %v3391_v13 = vpop.f32.mrb[230].mxu1 }
 0x2e4   : > { %v3699_v14 = vmax.f32 %v3695_v51, %v2743_v12  ;;  %v3865_v15 = vmax.f32 %v3861_v52, %v3391_v13  ;;  %v2745_v16 = vpop.f32.mrb[231].mxu0  ;;  %v3393_v17 = vpop.f32.mrb[231].mxu1 }
 0x2e9   : > { %v2748_v18 = vpop.f32.mrb[232].mxu0  ;;  %v3396_v19 = vpop.f32.mrb[232].mxu1 }
 0x2ea   : > { %v3700_v20 = vmax.f32 %v3696_v58, %v2748_v18  ;;  %v3866_v21 = vmax.f32 %v3862_v59, %v3396_v19  ;;  %v2750_v22 = vpop.f32.mrb[233].mxu0  ;;  %v3398_v23 = vpop.f32.mrb[233].mxu1 }
 0x2eb   : > { %v2751_v24 = vpop.f32.mrb[234].mxu0  ;;  %v3399_v25 = vpop.f32.mrb[234].mxu1 }
 0x2ec   : > { %v3701_v26 = vmax.f32 %v3697_v0, %v2751_v24  ;;  %v3867_v27 = vmax.f32 %v3863_v1, %v3399_v25  ;;  %v2753_v28 = vpop.f32.mrb[235].mxu0  ;;  %v3401_v29 = vpop.f32.mrb[235].mxu1 }
 0x2f1   : > { %v2756_v30 = vpop.f32.mrb[236].mxu0  ;;  %v3404_v31 = vpop.f32.mrb[236].mxu1 }
 0x2f2   : > { %v3702_v32 = vmax.f32 %v3698_v7, %v2756_v30  ;;  %v3868_v33 = vmax.f32 %v3864_v8, %v3404_v31  ;;  %v2758_v34 = vpop.f32.mrb[237].mxu0  ;;  %v3406_v35 = vpop.f32.mrb[237].mxu1 }
 0x2f3   : > { %v2759_v36 = vpop.f32.mrb[238].mxu0  ;;  %v3407_v37 = vpop.f32.mrb[238].mxu1 }
 0x2f4   : > { %v3703_v38 = vmax.f32 %v3699_v14, %v2759_v36  ;;  %v3869_v39 = vmax.f32 %v3865_v15, %v3407_v37  ;;  %v2761_v40 = vpop.f32.mrb[239].mxu0  ;;  %v3409_v41 = vpop.f32.mrb[239].mxu1 }
 0x2f9   : > { %v2764_v42 = vpop.f32.mrb[240].mxu0  ;;  %v3412_v43 = vpop.f32.mrb[240].mxu1 }
 0x2fa   : > { %v3704_v44 = vmax.f32 %v3700_v20, %v2764_v42  ;;  %v3870_v45 = vmax.f32 %v3866_v21, %v3412_v43  ;;  %v2766_v46 = vpop.f32.mrb[241].mxu0  ;;  %v3414_v47 = vpop.f32.mrb[241].mxu1 }
 0x2fb   : > { %v2767_v48 = vpop.f32.mrb[242].mxu0  ;;  %v3415_v49 = vpop.f32.mrb[242].mxu1 }
 0x2fc   : > { %v3705_v50 = vmax.f32 %v3701_v26, %v2767_v48  ;;  %v3871_v51 = vmax.f32 %v3867_v27, %v3415_v49  ;;  %v2769_v52 = vpop.f32.mrb[243].mxu0  ;;  %v3417_v53 = vpop.f32.mrb[243].mxu1 }
 0x301   : > { %v2772_v54 = vpop.f32.mrb[244].mxu0  ;;  %v3420_v55 = vpop.f32.mrb[244].mxu1 }
 0x302   : > { %v3706_v57 = vmax.f32 %v3702_v32, %v2772_v54  ;;  %v3872_v58 = vmax.f32 %v3868_v33, %v3420_v55  ;;  %v2774_v59 = vpop.f32.mrb[245].mxu0  ;;  %v3422_v60 = vpop.f32.mrb[245].mxu1 }
 0x303   : > { %v2775_v61 = vpop.f32.mrb[246].mxu0  ;;  %v3423_v62 = vpop.f32.mrb[246].mxu1 }
 0x304   : > { %v3707_v63 = vmax.f32 %v3703_v38, %v2775_v61  ;;  %v3873_v0 = vmax.f32 %v3869_v39, %v3423_v62  ;;  %v2777_v1 = vpop.f32.mrb[247].mxu0  ;;  %v3425_v2 = vpop.f32.mrb[247].mxu1 }
 0x309   : > { %v2780_v3 = vpop.f32.mrb[248].mxu0  ;;  %v3428_v4 = vpop.f32.mrb[248].mxu1 }
 0x30a   : > { %v3708_v5 = vmax.f32 %v3704_v44, %v2780_v3  ;;  %v3874_v7 = vmax.f32 %v3870_v45, %v3428_v4  ;;  %v2782_v8 = vpop.f32.mrb[249].mxu0  ;;  %v3430_v9 = vpop.f32.mrb[249].mxu1 }
 0x30b   : > { %v2783_v10 = vpop.f32.mrb[250].mxu0  ;;  %v3431_v12 = vpop.f32.mrb[250].mxu1 }
 0x30c   : > { %v3709_v13 = vmax.f32 %v3705_v50, %v2783_v10  ;;  %v3875_v14 = vmax.f32 %v3871_v51, %v3431_v12  ;;  %v2785_v15 = vpop.f32.mrb[251].mxu0  ;;  %v3433_v16 = vpop.f32.mrb[251].mxu1 }
 0x311   : > { %v2788_v17 = vpop.f32.mrb[252].mxu0  ;;  %v3436_v18 = vpop.f32.mrb[252].mxu1 }
 0x312   : > { %v3710_v19 = vmax.f32 %v3706_v57, %v2788_v17  ;;  %v3876_v20 = vmax.f32 %v3872_v58, %v3436_v18  ;;  %v2790_v21 = vpop.f32.mrb[253].mxu0  ;;  %v3438_v22 = vpop.f32.mrb[253].mxu1 }
 0x313   : > { %v2791_v23 = vpop.f32.mrb[254].mxu0  ;;  %v3439_v24 = vpop.f32.mrb[254].mxu1 }
 0x314   : > { %v3711_v25 = vmax.f32 %v3707_v63, %v2791_v23  ;;  %v3877_v26 = vmax.f32 %v3873_v0, %v3439_v24  ;;  %v2793_v27 = vpop.f32.mrb[255].mxu0  ;;  %v3441_v28 = vpop.f32.mrb[255].mxu1 }
 0x319   : > { %v2796_v29 = vpop.f32.mrb[0].mxu0  ;;  %v3444_v30 = vpop.f32.mrb[0].mxu1 }
 0x31a   : > { %v3712_v31 = vmax.f32 %v3708_v5, %v2796_v29  ;;  %v3878_v32 = vmax.f32 %v3874_v7, %v3444_v30  ;;  %v2798_v33 = vpop.f32.mrb[1].mxu0  ;;  %v3446_v34 = vpop.f32.mrb[1].mxu1 }
 0x31b   : > { %v2799_v35 = vpop.f32.mrb[2].mxu0  ;;  %v3447_v36 = vpop.f32.mrb[2].mxu1 }
 0x31c   : > { %v3713_v37 = vmax.f32 %v3709_v13, %v2799_v35  ;;  %v3879_v38 = vmax.f32 %v3875_v14, %v3447_v36  ;;  %v2801_v39 = vpop.f32.mrb[3].mxu0  ;;  %v3449_v40 = vpop.f32.mrb[3].mxu1 }
 0x321   : > { %v2804_v41 = vpop.f32.mrb[4].mxu0  ;;  %v3452_v42 = vpop.f32.mrb[4].mxu1 }
 0x322   : > { %v3714_v43 = vmax.f32 %v3710_v19, %v2804_v41  ;;  %v3880_v44 = vmax.f32 %v3876_v20, %v3452_v42  ;;  %v2806_v45 = vpop.f32.mrb[5].mxu0  ;;  %v3454_v46 = vpop.f32.mrb[5].mxu1 }
 0x323   : > { %v2807_v47 = vpop.f32.mrb[6].mxu0  ;;  %v3455_v48 = vpop.f32.mrb[6].mxu1 }
 0x324   : > { %v3715_v49 = vmax.f32 %v3711_v25, %v2807_v47  ;;  %v3881_v50 = vmax.f32 %v3877_v26, %v3455_v48  ;;  %v2809_v51 = vpop.f32.mrb[7].mxu0  ;;  %v3457_v52 = vpop.f32.mrb[7].mxu1 }
 0x329   : > { %v2812_v53 = vpop.f32.mrb[8].mxu0  ;;  %v3460_v54 = vpop.f32.mrb[8].mxu1 }
 0x32a   : > { %v3716_v55 = vmax.f32 %v3712_v31, %v2812_v53  ;;  %v3882_v57 = vmax.f32 %v3878_v32, %v3460_v54  ;;  %v2814_v58 = vpop.f32.mrb[9].mxu0  ;;  %v3462_v59 = vpop.f32.mrb[9].mxu1 }
 0x32b   : > { %v2815_v60 = vpop.f32.mrb[10].mxu0  ;;  %v3463_v61 = vpop.f32.mrb[10].mxu1 }
 0x32c   : > { %v3717_v62 = vmax.f32 %v3713_v37, %v2815_v60  ;;  %v3883_v63 = vmax.f32 %v3879_v38, %v3463_v61  ;;  %v2817_v0 = vpop.f32.mrb[11].mxu0  ;;  %v3465_v1 = vpop.f32.mrb[11].mxu1 }
 0x331   : > { %v2820_v2 = vpop.f32.mrb[12].mxu0  ;;  %v3468_v3 = vpop.f32.mrb[12].mxu1 }
 0x332   : > { %v3718_v4 = vmax.f32 %v3714_v43, %v2820_v2  ;;  %v3884_v5 = vmax.f32 %v3880_v44, %v3468_v3  ;;  %v2822_v7 = vpop.f32.mrb[13].mxu0  ;;  %v3470_v8 = vpop.f32.mrb[13].mxu1 }
 0x333   : > { %v2823_v9 = vpop.f32.mrb[14].mxu0  ;;  %v3471_v10 = vpop.f32.mrb[14].mxu1 }
 0x334   : > { %v3719_v12 = vmax.f32 %v3715_v49, %v2823_v9  ;;  %v3885_v13 = vmax.f32 %v3881_v50, %v3471_v10  ;;  %v2825_v14 = vpop.f32.mrb[15].mxu0  ;;  %v3473_v15 = vpop.f32.mrb[15].mxu1 }
 0x339   : > { %v2828_v16 = vpop.f32.mrb[16].mxu0  ;;  %v3476_v17 = vpop.f32.mrb[16].mxu1 }
 0x33a   : > { %v3720_v18 = vmax.f32 %v3716_v55, %v2828_v16  ;;  %v3886_v19 = vmax.f32 %v3882_v57, %v3476_v17  ;;  %v2830_v20 = vpop.f32.mrb[17].mxu0  ;;  %v3478_v21 = vpop.f32.mrb[17].mxu1 }
 0x33b   : > { %v2831_v22 = vpop.f32.mrb[18].mxu0  ;;  %v3479_v23 = vpop.f32.mrb[18].mxu1 }
 0x33c   : > { %v3721_v24 = vmax.f32 %v3717_v62, %v2831_v22  ;;  %v3887_v25 = vmax.f32 %v3883_v63, %v3479_v23  ;;  %v2833_v26 = vpop.f32.mrb[19].mxu0  ;;  %v3481_v27 = vpop.f32.mrb[19].mxu1 }
 0x341   : > { %v2836_v28 = vpop.f32.mrb[20].mxu0  ;;  %v3484_v29 = vpop.f32.mrb[20].mxu1 }
 0x342   : > { %v3722_v30 = vmax.f32 %v3718_v4, %v2836_v28  ;;  %v3888_v31 = vmax.f32 %v3884_v5, %v3484_v29  ;;  %v2838_v32 = vpop.f32.mrb[21].mxu0  ;;  %v3486_v33 = vpop.f32.mrb[21].mxu1 }
 0x343   : > { %v2839_v34 = vpop.f32.mrb[22].mxu0  ;;  %v3487_v35 = vpop.f32.mrb[22].mxu1 }
 0x344   : > { %v3723_v36 = vmax.f32 %v3719_v12, %v2839_v34  ;;  %v3889_v37 = vmax.f32 %v3885_v13, %v3487_v35  ;;  %v2841_v38 = vpop.f32.mrb[23].mxu0  ;;  %v3489_v39 = vpop.f32.mrb[23].mxu1 }
 0x349   : > { %v2844_v40 = vpop.f32.mrb[24].mxu0  ;;  %v3492_v41 = vpop.f32.mrb[24].mxu1 }
 0x34a   : > { %v3724_v42 = vmax.f32 %v3720_v18, %v2844_v40  ;;  %v3890_v43 = vmax.f32 %v3886_v19, %v3492_v41  ;;  %v2846_v44 = vpop.f32.mrb[25].mxu0  ;;  %v3494_v45 = vpop.f32.mrb[25].mxu1 }
 0x34b   : > { %v2847_v46 = vpop.f32.mrb[26].mxu0  ;;  %v3495_v47 = vpop.f32.mrb[26].mxu1 }
 0x34c   : > { %v3725_v48 = vmax.f32 %v3721_v24, %v2847_v46  ;;  %v3891_v49 = vmax.f32 %v3887_v25, %v3495_v47  ;;  %v2849_v50 = vpop.f32.mrb[27].mxu0  ;;  %v3497_v51 = vpop.f32.mrb[27].mxu1 }
 0x351   : > { %v2852_v52 = vpop.f32.mrb[28].mxu0  ;;  %v3500_v53 = vpop.f32.mrb[28].mxu1 }
 0x352   : > { %v3726_v54 = vmax.f32 %v3722_v30, %v2852_v52  ;;  %v3892_v55 = vmax.f32 %v3888_v31, %v3500_v53  ;;  %v2854_v57 = vpop.f32.mrb[29].mxu0  ;;  %v3502_v58 = vpop.f32.mrb[29].mxu1 }
 0x353   : > { %v2855_v59 = vpop.f32.mrb[30].mxu0  ;;  %v3503_v60 = vpop.f32.mrb[30].mxu1 }
 0x354   : > { %v3727_v61 = vmax.f32 %v3723_v36, %v2855_v59  ;;  %v3893_v62 = vmax.f32 %v3889_v37, %v3503_v60  ;;  %v2857_v63 = vpop.f32.mrb[31].mxu0  ;;  %v3505_v0 = vpop.f32.mrb[31].mxu1 }
 0x359   : > { %v2860_v1 = vpop.f32.mrb[32].mxu0  ;;  %v3508_v2 = vpop.f32.mrb[32].mxu1 }
 0x35a   : > { %v3728_v3 = vmax.f32 %v3724_v42, %v2860_v1  ;;  %v3894_v4 = vmax.f32 %v3890_v43, %v3508_v2  ;;  %v2862_v5 = vpop.f32.mrb[33].mxu0  ;;  %v3510_v7 = vpop.f32.mrb[33].mxu1 }
 0x35b   : > { %v2863_v8 = vpop.f32.mrb[34].mxu0  ;;  %v3511_v9 = vpop.f32.mrb[34].mxu1 }
 0x35c   : > { %v3729_v10 = vmax.f32 %v3725_v48, %v2863_v8  ;;  %v3895_v12 = vmax.f32 %v3891_v49, %v3511_v9  ;;  %v2865_v13 = vpop.f32.mrb[35].mxu0  ;;  %v3513_v14 = vpop.f32.mrb[35].mxu1 }
 0x361   : > { %v2868_v15 = vpop.f32.mrb[36].mxu0  ;;  %v3516_v16 = vpop.f32.mrb[36].mxu1 }
 0x362   : > { %v3730_v17 = vmax.f32 %v3726_v54, %v2868_v15  ;;  %v3896_v18 = vmax.f32 %v3892_v55, %v3516_v16  ;;  %v2870_v19 = vpop.f32.mrb[37].mxu0  ;;  %v3518_v20 = vpop.f32.mrb[37].mxu1 }
 0x363   : > { %v2871_v21 = vpop.f32.mrb[38].mxu0  ;;  %v3519_v22 = vpop.f32.mrb[38].mxu1 }
 0x364   : > { %v3731_v23 = vmax.f32 %v3727_v61, %v2871_v21  ;;  %v3897_v24 = vmax.f32 %v3893_v62, %v3519_v22  ;;  %v2873_v25 = vpop.f32.mrb[39].mxu0  ;;  %v3521_v26 = vpop.f32.mrb[39].mxu1 }
 0x369   : > { %v2876_v27 = vpop.f32.mrb[40].mxu0  ;;  %v3524_v28 = vpop.f32.mrb[40].mxu1 }
 0x36a   : > { %v3732_v29 = vmax.f32 %v3728_v3, %v2876_v27  ;;  %v3898_v30 = vmax.f32 %v3894_v4, %v3524_v28  ;;  %v2878_v31 = vpop.f32.mrb[41].mxu0  ;;  %v3526_v32 = vpop.f32.mrb[41].mxu1 }
 0x36b   : > { %v2879_v33 = vpop.f32.mrb[42].mxu0  ;;  %v3527_v34 = vpop.f32.mrb[42].mxu1 }
 0x36c   : > { %v3733_v35 = vmax.f32 %v3729_v10, %v2879_v33  ;;  %v3899_v36 = vmax.f32 %v3895_v12, %v3527_v34  ;;  %v2881_v37 = vpop.f32.mrb[43].mxu0  ;;  %v3529_v38 = vpop.f32.mrb[43].mxu1 }
 0x371   : > { %v2884_v39 = vpop.f32.mrb[44].mxu0  ;;  %v3532_v40 = vpop.f32.mrb[44].mxu1 }
 0x372   : > { %v3734_v41 = vmax.f32 %v3730_v17, %v2884_v39  ;;  %v3900_v42 = vmax.f32 %v3896_v18, %v3532_v40  ;;  %v2886_v43 = vpop.f32.mrb[45].mxu0  ;;  %v3534_v44 = vpop.f32.mrb[45].mxu1 }
 0x373   : > { %v2887_v45 = vpop.f32.mrb[46].mxu0  ;;  %v3535_v46 = vpop.f32.mrb[46].mxu1 }
 0x374   : > { %v3735_v47 = vmax.f32 %v3731_v23, %v2887_v45  ;;  %v3901_v48 = vmax.f32 %v3897_v24, %v3535_v46  ;;  %v2889_v49 = vpop.f32.mrb[47].mxu0  ;;  %v3537_v50 = vpop.f32.mrb[47].mxu1 }
 0x379   : > { %v2892_v51 = vpop.f32.mrb[48].mxu0  ;;  %v3540_v52 = vpop.f32.mrb[48].mxu1 }
 0x37a   : > { %v3736_v53 = vmax.f32 %v3732_v29, %v2892_v51  ;;  %v3902_v54 = vmax.f32 %v3898_v30, %v3540_v52  ;;  %v2894_v55 = vpop.f32.mrb[49].mxu0  ;;  %v3542_v57 = vpop.f32.mrb[49].mxu1 }
 0x37b   : > { %v2895_v58 = vpop.f32.mrb[50].mxu0  ;;  %v3543_v59 = vpop.f32.mrb[50].mxu1  ;;  %v4870_v57 = vld [vmem:[%s5650_s2] ss:$0 sm:$0xff] }
 0x37c   : > { %v3737_v60 = vmax.f32 %v3733_v35, %v2895_v58  ;;  %v3903_v61 = vmax.f32 %v3899_v36, %v3543_v59  ;;  %v2897_v62 = vpop.f32.mrb[51].mxu0  ;;  %v3545_v63 = vpop.f32.mrb[51].mxu1  ;;  %v3832_v58 = vadd.f32 %v4870_v57, %v3831_v11 }
 0x37e   : > { %v3833_v62 = vmax.f32 %v3832_v58, 0.0 }
 0x380   : > { %3834 = vst [vmem:[%s5515_s5 + $0x10] sm:$0xff] %v3833_v62 }
 0x381   : > { %v2900_v0 = vpop.f32.mrb[52].mxu0  ;;  %v3548_v1 = vpop.f32.mrb[52].mxu1 }
 0x382   : > { %v3738_v2 = vmax.f32 %v3734_v41, %v2900_v0  ;;  %v3904_v3 = vmax.f32 %v3900_v42, %v3548_v1  ;;  %v2902_v4 = vpop.f32.mrb[53].mxu0  ;;  %v3550_v5 = vpop.f32.mrb[53].mxu1 }
 0x383   : > { %v2903_v7 = vpop.f32.mrb[54].mxu0  ;;  %v3551_v8 = vpop.f32.mrb[54].mxu1 }
 0x384   : > { %v3739_v9 = vmax.f32 %v3735_v47, %v2903_v7  ;;  %v3905_v10 = vmax.f32 %v3901_v48, %v3551_v8  ;;  %v2905_v12 = vpop.f32.mrb[55].mxu0  ;;  %v3553_v13 = vpop.f32.mrb[55].mxu1 }
 0x389   : > { %v2908_v14 = vpop.f32.mrb[56].mxu0  ;;  %v3556_v15 = vpop.f32.mrb[56].mxu1 }
 0x38a   : > { %v3740_v16 = vmax.f32 %v3736_v53, %v2908_v14  ;;  %v3906_v17 = vmax.f32 %v3902_v54, %v3556_v15  ;;  %v2910_v18 = vpop.f32.mrb[57].mxu0  ;;  %v3558_v19 = vpop.f32.mrb[57].mxu1 }
 0x38b   : > { %v2911_v20 = vpop.f32.mrb[58].mxu0  ;;  %v3559_v21 = vpop.f32.mrb[58].mxu1 }
 0x38c   : > { %v3741_v22 = vmax.f32 %v3737_v60, %v2911_v20  ;;  %v3907_v23 = vmax.f32 %v3903_v61, %v3559_v21  ;;  %v2913_v24 = vpop.f32.mrb[59].mxu0  ;;  %v3561_v25 = vpop.f32.mrb[59].mxu1 }
 0x391   : > { %v2916_v26 = vpop.f32.mrb[60].mxu0  ;;  %v3564_v27 = vpop.f32.mrb[60].mxu1 }
 0x392   : > { %v3742_v28 = vmax.f32 %v3738_v2, %v2916_v26  ;;  %v3908_v29 = vmax.f32 %v3904_v3, %v3564_v27  ;;  %v2918_v30 = vpop.f32.mrb[61].mxu0  ;;  %v3566_v31 = vpop.f32.mrb[61].mxu1 }
 0x393   : > { %v2919_v32 = vpop.f32.mrb[62].mxu0  ;;  %v3567_v33 = vpop.f32.mrb[62].mxu1 }
 0x394   : > { %v3743_v34 = vmax.f32 %v3739_v9, %v2919_v32  ;;  %v3909_v35 = vmax.f32 %v3905_v10, %v3567_v33  ;;  %v2921_v36 = vpop.f32.mrb[63].mxu0  ;;  %v3569_v37 = vpop.f32.mrb[63].mxu1 }
 0x399   : > { %v2924_v38 = vpop.f32.mrb[64].mxu0  ;;  %v3572_v39 = vpop.f32.mrb[64].mxu1 }
 0x39a   : > { %v3744_v40 = vmax.f32 %v3740_v16, %v2924_v38  ;;  %v3910_v41 = vmax.f32 %v3906_v17, %v3572_v39  ;;  %v2926_v42 = vpop.f32.mrb[65].mxu0  ;;  %v3574_v43 = vpop.f32.mrb[65].mxu1 }
 0x39b   : > { %v2927_v44 = vpop.f32.mrb[66].mxu0  ;;  %v3575_v45 = vpop.f32.mrb[66].mxu1 }
 0x39c   : > { %v3747_v46 = vmax.f32 %v3743_v34, %v3744_v40  ;;  %v3913_v47 = vmax.f32 %v3909_v35, %v3910_v41  ;;  %v3745_v48 = vmax.f32 %v3741_v22, %v2927_v44  ;;  %v3911_v49 = vmax.f32 %v3907_v23, %v3575_v45  ;;  %v2929_v50 = vpop.f32.mrb[67].mxu0  ;;  %v3577_v51 = vpop.f32.mrb[67].mxu1 }
 0x39e   : > { %v3746_v52 = vmax.f32 %v3745_v48, %v3742_v28  ;;  %v3912_v53 = vmax.f32 %v3911_v49, %v3908_v29 }
 0x3a0   : > { %v3748_v54 = vmax.f32 %v3746_v52, %v3747_v46  ;;  %v3914_v55 = vmax.f32 %v3912_v53, %v3913_v47 }
 0x3a2   : > { %v3749_v59 = vadd.f32 %v4870_v57, %v3748_v54  ;;  %v3915_v60 = vadd.f32 %v4870_v57, %v3914_v55 }
 0x3a4   : > { %v3750_v61 = vmax.f32 %v3749_v59, 0.0  ;;  %v3916_v63 = vmax.f32 %v3915_v60, 0.0 }
 0x3a6   : > { %3751 = vst [vmem:[%s5515_s5 + $0x8] sm:$0xff] %v3750_v61  ;;  %3917 = vst [vmem:[%s5515_s5 + $0x18] sm:$0xff] %v3916_v63 }
 0x3a7 PF: > { %s13_s12 = sadd.s32 1, %s4877_s12  }
 0x3a8   : > { %p10_p5 = scmp.ge.s32.totalorder %s13_s12, 4  }
 0x3aa   :  { %12 = sbr.rel (!%p10_p5) target bundleno = 1 (0x1), region = 62 }

</bundles_post_ra>
